<compile_context>
chip_gen: v6e
topology: v6e:2x2x1
jax: 0.10.0
libtpu: 0.0.40
codegen_flags: <defaults>
</compile_context>

<pallas_src>
import numpy as np
import jax
import jax.numpy as jnp
from jax import lax
from jax.experimental import pallas as pl
from jax.experimental.pallas import tpu as pltpu

# ---- Conv3d hyper-parameters (from the nn.Module __init__) ----
IN_C, OUT_C = 16, 33
KD, KH, KW = 3, 4, 5
STRIDE = (1, 1, 1)
DILATION = (3, 1, 1)
PADDING = (1, 2, 2)   # the module's `padding` constructor argument

OC_PAD = 128          # lane-dense output-channel padding


def _round_up(x, m):
    return ((x + m - 1) // m) * m


def conv_matmul_kernel(p_ref, w_ref, b_ref, o_ref):
    # p_ref: (TM, K_pad) im2col patch rows
    # w_ref: (K_pad, OC_PAD) weights (resident across the grid)
    # b_ref: (1, OC_PAD) bias
    # One MXU matmul per grid step + bias add; f32 accumulation.
    o_ref[...] = (
        jnp.dot(p_ref[...], w_ref[...], preferred_element_type=jnp.float32)
        + b_ref[...]
    )


def conv3d_pallas(x, w, b, *, padding=PADDING, stride=STRIDE, dilation=DILATION,
                  tm=512):
    N, C, D, H, W = x.shape
    OC = w.shape[0]
    pd, ph, pw = padding
    sd, sh, sw = stride
    dd, dh, dw = dilation

    # --- glue: pad, channels-last, im2col gather (pure data movement) ---
    xp = jnp.pad(x, ((0, 0), (0, 0), (pd, pd), (ph, ph), (pw, pw)))
    Dp, Hp, Wp = D + 2 * pd, H + 2 * ph, W + 2 * pw
    OD = (Dp - (dd * (KD - 1) + 1)) // sd + 1
    OH = (Hp - (dh * (KH - 1) + 1)) // sh + 1
    OW = (Wp - (dw * (KW - 1) + 1)) // sw + 1

    # channels-last once (small), so every tap slice is already in row order
    xcl = jnp.transpose(xp, (0, 2, 3, 4, 1))          # (N, Dp, Hp, Wp, C)

    taps = []
    for kd in range(KD):
        for kh in range(KH):
            for kw in range(KW):
                sl = xcl[:,
                         kd * dd: kd * dd + sd * (OD - 1) + 1: sd,
                         kh * dh: kh * dh + sh * (OH - 1) + 1: sh,
                         kw * dw: kw * dw + sw * (OW - 1) + 1: sw,
                         :]                            # (N, OD, OH, OW, C)
                taps.append(sl)
    # (N, OD, OH, OW, C, KD*KH*KW) -> columns are c*KD*KH*KW + kd*KH*KW + kh*KW + kw,
    # matching the OIDHW weight flattened as (OC, C*KD*KH*KW).
    patches = jnp.stack(taps, axis=-1)
    K = C * KD * KH * KW
    M = N * OD * OH * OW
    patches = patches.reshape(M, K).astype(jnp.float32)

    # --- padding for lane-dense tiles ---
    K_pad = _round_up(K, 128)                          # 960 -> 1024
    M_pad_unit = 128
    # keep at least 2 grid steps (v7x has 2 TensorCores) when M allows
    while tm > M_pad_unit and pl.cdiv(M, tm) < 2:
        tm //= 2
    tm = max(tm, M_pad_unit)
    M_pad = _round_up(M, tm)

    patches = jnp.pad(patches, ((0, M_pad - M), (0, K_pad - K)))

    w2 = w.reshape(OC, K).T.astype(jnp.float32)        # (K, OC)
    w2 = jnp.pad(w2, ((0, K_pad - K), (0, OC_PAD - OC)))   # (K_pad, 128)
    b2 = jnp.pad(b.reshape(1, OC).astype(jnp.float32),
                 ((0, 0), (0, OC_PAD - OC)))               # (1, 128)

    # --- Pallas kernel: tiled (TM, K_pad) x (K_pad, 128) matmul + bias ---
    out = pl.pallas_call(
        conv_matmul_kernel,
        out_shape=jax.ShapeDtypeStruct((M_pad, OC_PAD), jnp.float32),
        grid_spec=pltpu.PrefetchScalarGridSpec(
            num_scalar_prefetch=0,
            grid=(M_pad // tm,),
            in_specs=[
                pl.BlockSpec((tm, K_pad), lambda i: (i, 0)),     # patch rows tile
                pl.BlockSpec((K_pad, OC_PAD), lambda i: (0, 0)),  # full weight
                pl.BlockSpec((1, OC_PAD), lambda i: (0, 0)),      # bias
            ],
            out_specs=pl.BlockSpec((tm, OC_PAD), lambda i: (i, 0)),
        ),
        compiler_params=pltpu.CompilerParams(
            dimension_semantics=("parallel",),
            vmem_limit_bytes=32 * 1024 * 1024),
    )(patches, w2, b2)

    # --- glue: slice off padding, back to NCDHW ---
    out = out[:M, :OC].reshape(N, OD, OH, OW, OC).transpose(0, 4, 1, 2, 3)
    return out


def conv3d_reference(x, w, b, *, padding=PADDING, stride=STRIDE, dilation=DILATION):
    pd, ph, pw = padding
    y = lax.conv_general_dilated(
        x, w,
        window_strides=stride,
        padding=[(pd, pd), (ph, ph), (pw, pw)],
        rhs_dilation=dilation,
        dimension_numbers=("NCDHW", "OIDHW", "NCDHW"),
    )
    return y + b.reshape(1, -1, 1, 1, 1)


if __name__ == "__main__":
    key = jax.random.PRNGKey(0)
    kx, kw, kb = jax.random.split(key, 3)

    # Small shapes consistent with Conv3d(16 -> 33), dilation (3,1,1)
    N, D, H, W = 2, 8, 8, 8
    x = jax.random.normal(kx, (N, IN_C, D, H, W), dtype=jnp.float32)

    # Deterministic synthetic parameters (PyTorch-like uniform fan-in scaling)
    fan_in = IN_C * KD * KH * KW
    bound = 1.0 / np.sqrt(fan_in)
    w = jax.random.uniform(kw, (OUT_C, IN_C, KD, KH, KW),
                           minval=-bound, maxval=bound, dtype=jnp.float32)
    b = jax.random.uniform(kb, (OUT_C,), minval=-bound, maxval=bound,
                           dtype=jnp.float32)

    conv = jax.jit(conv3d_pallas)
    y = conv(x, w, b)
    y = jax.block_until_ready(y)

    y_ref = conv3d_reference(x, w, b)
    np.testing.assert_allclose(np.asarray(y), np.asarray(y_ref),
                               rtol=1e-4, atol=1e-4)

    print("KERNEL_OK")
</pallas_src>

<mosaic_0001>
module attributes {stable_mosaic.version = 11 : i64} {
  func.func @conv_matmul_kernel(%arg0: i32, %arg1: memref<512x1024xf32, #tpu.memory_space<vmem>>, %arg2: memref<1024x128xf32, #tpu.memory_space<vmem>>, %arg3: memref<1x128xf32, #tpu.memory_space<vmem>>, %arg4: memref<512x128xf32, #tpu.memory_space<vmem>>) attributes {dimension_semantics = [#tpu.dimension_semantics<parallel>], iteration_bounds = array<i64: 2>, scalar_prefetch = 0 : i64, scratch_operands = 0 : i64, tpu.core_type = #tpu.core_type<tc>, window_params = [{transform_indices = @transform_0, window_bounds = array<i64: 512, 1024>}, {pipeline_mode = #tpu.pipeline_mode<synchronous>, transform_indices = @transform_1, window_bounds = array<i64: 1024, 128>}, {pipeline_mode = #tpu.pipeline_mode<synchronous>, transform_indices = @transform_2, window_bounds = array<i64: 1, 128>}, {transform_indices = @transform_3, window_bounds = array<i64: 512, 128>}]} {
    %c0 = arith.constant 0 : index
    %c0_0 = arith.constant 0 : index
    %0 = vector.load %arg1[%c0, %c0_0] : memref<512x1024xf32, #tpu.memory_space<vmem>>, vector<512x1024xf32>
    %c0_1 = arith.constant 0 : index
    %c0_2 = arith.constant 0 : index
    %1 = vector.load %arg2[%c0_1, %c0_2] : memref<1024x128xf32, #tpu.memory_space<vmem>>, vector<1024x128xf32>
    %cst = arith.constant dense<0.000000e+00> : vector<512x128xf32>
    %2 = tpu.matmul %0, %1, %cst {dimension_numbers = #tpu.dot_dimension_numbers<[1], [0], [0], [1], [0, 0, 1, 1], [], []>} : vector<512x1024xf32>, vector<1024x128xf32>, vector<512x128xf32> -> vector<512x128xf32>
    %c0_3 = arith.constant 0 : index
    %c0_4 = arith.constant 0 : index
    %3 = vector.load %arg3[%c0_3, %c0_4] : memref<1x128xf32, #tpu.memory_space<vmem>>, vector<1x128xf32>
    %4 = vector.broadcast %3 : vector<1x128xf32> to vector<512x128xf32>
    %5 = arith.addf %2, %4 : vector<512x128xf32>
    %c0_5 = arith.constant 0 : index
    %c0_6 = arith.constant 0 : index
    %6 = vector.load %arg4[%c0_5, %c0_6] : memref<512x128xf32, #tpu.memory_space<vmem>>, vector<512x128xf32>
    tpu.vector_store %arg4[%c0_5, %c0_6], %5 {strides = array<i32>} : memref<512x128xf32, #tpu.memory_space<vmem>>, vector<512x128xf32>,
    return
  }
  func.func @transform_0(%arg0: i32) -> (i32, i32) {
    %c0_i32 = arith.constant 0 : i32
    %c0_i32_0 = arith.constant 0 : i32
    return %arg0, %c0_i32 : i32, i32
  }
  func.func @transform_1(%arg0: i32) -> (i32, i32) {
    %c0_i32 = arith.constant 0 : i32
    %c0_i32_0 = arith.constant 0 : i32
    %c0_i32_1 = arith.constant 0 : i32
    return %c0_i32, %c0_i32_0 : i32, i32
  }
  func.func @transform_2(%arg0: i32) -> (i32, i32) {
    %c0_i32 = arith.constant 0 : i32
    %c0_i32_0 = arith.constant 0 : i32
    %c0_i32_1 = arith.constant 0 : i32
    return %c0_i32, %c0_i32_0 : i32, i32
  }
  func.func @transform_3(%arg0: i32) -> (i32, i32) {
    %c0_i32 = arith.constant 0 : i32
    %c0_i32_0 = arith.constant 0 : i32
    return %arg0, %c0_i32 : i32, i32
  }
}

</mosaic_0001>

<bundles_post_ra>
// kernel: conv3d_pallas.1
= control target key start
LH: loop header
LB: loop body
LE: loop exit
PB: predicated region body
PF: predicated region fallthrough
CT: control target
= control target key end

     0   :  { %s2537_s12 = smov 0   ;;  %s3918_s0 = inlined_call_operand.vmem [shape: f32[1024,1024], index: 0, kind: input, shape index: {}]   ;;  %s3919_s1 = inlined_call_operand.vmem [shape: f32[1024,128], index: 1, kind: input, shape index: {}]   ;;  %s3920_s2 = inlined_call_operand.vmem [shape: f32[1,128], index: 2, kind: input, shape index: {}]   ;;  %s3921_s3 = inlined_call_operand.vmem [shape: f32[1024,128], index: 3, kind: output, shape index: {}]  }
   0x1 LB: > { %s2484_s13 = sadd.s32 4294967295, %s2514_s12   ;;  %p2488_p0 = scmp.ge.s32.totalorder %s2514_s12, 1  ;;  %s2514_s12 = sphi %s2537_s12, %s13_s12  }
   0x2   : > { %p139_p1 = scmp.lt.s32.totalorder %s2514_s12, 3 }
   0x4   : > { %p140_p2 = pnand %p2488_p0, %p139_p1 }
   0x6   : > { %143 = sbr.rel (%p140_p2) target bundleno = 782 (0x30e), region = 32 }
   0xb   : > { %v704_v0 = vld [vmem:[%s3919_s1 + $0x78] sm:$0xff]  ;;  %v2516_v2 = vmov 0.0   ;;  %v703_v3 = vld [vmem:[%s3919_s1 + $0x70] sm:$0xff]  ;;  %v702_v5 = vld [vmem:[%s3919_s1 + $0x68] sm:$0xff]  ;;  %s2489_s4 = sshll.u32 %s2484_s13, 6 }
   0xc   : > { %v736_v1 = vld [vmem:[%s3919_s1 + $0x178] sm:$0xff]  ;;  %824 = vmatprep.subr.mxu0 %v2516_v2  ;;  %1209 = vmatprep.subr.mxu1 %v2516_v2  ;;  %v735_v4 = vld [vmem:[%s3919_s1 + $0x170] sm:$0xff]  ;;  %v734_v6 = vld [vmem:[%s3919_s1 + $0x168] sm:$0xff]  ;;  %p165_p3 = scmp.lt.s32.totalorder %s2489_s4, 127 }
   0xd   : > { %825 = vmatpush1.msra.mxu0 %v704_v0  ;;  %1210 = vmatpush1.msra.mxu1 %v736_v1  ;;  %v701_v7 = vld [vmem:[%s3919_s1 + $0x60] sm:$0xff]  ;;  %v700_v9 = vld [vmem:[%s3919_s1 + $0x58] sm:$0xff]  ;;  %v699_v11 = vld [vmem:[%s3919_s1 + $0x50] sm:$0xff] }
   0xe   : > { %826 = vmatprep.subr.mxu0 %v2516_v2  ;;  %1211 = vmatprep.subr.mxu1 %v2516_v2  ;;  %v733_v8 = vld [vmem:[%s3919_s1 + $0x160] sm:$0xff]  ;;  %v732_v10 = vld [vmem:[%s3919_s1 + $0x158] sm:$0xff]  ;;  %v731_v12 = vld [vmem:[%s3919_s1 + $0x150] sm:$0xff]  ;;  %s3951_s4 = smov (!%p165_p3, %s2489_s4), 127 }
   0xf   : > { %827 = vmatpush1.msra.mxu0 %v703_v3  ;;  %1212 = vmatpush1.msra.mxu1 %v735_v4  ;;  %v698_v13 = vld [vmem:[%s3919_s1 + $0x48] sm:$0xff]  ;;  %v697_v15 = vld [vmem:[%s3919_s1 + $0x40] sm:$0xff]  ;;  %v696_v17 = vld [vmem:[%s3919_s1 + $0x38] sm:$0xff]  ;;  %s2497_s26 = sshll.u32 %s3951_s4, 6  ;;  %s2493_s7 = sshll.u32 %s3951_s4, 3 }
  0x10   : > { %828 = vmatprep.subr.mxu0 %v2516_v2  ;;  %1213 = vmatprep.subr.mxu1 %v2516_v2  ;;  %v730_v14 = vld [vmem:[%s3919_s1 + $0x148] sm:$0xff]  ;;  %v729_v16 = vld [vmem:[%s3919_s1 + $0x140] sm:$0xff]  ;;  %v728_v18 = vld [vmem:[%s3919_s1 + $0x138] sm:$0xff]  ;;  %s2791_s10 = scalar_lea.vmem %s3918_s0, %s2497_s26  ;;  %s3729_s9 = scalar_lea.vmem %s3921_s3, %s2493_s7 }
  0x11   : > { %829 = vmatpush1.msra.mxu0 %v702_v5  ;;  %1214 = vmatpush1.msra.mxu1 %v734_v6  ;;  %v695_v19 = vld [vmem:[%s3919_s1 + $0x30] sm:$0xff]  ;;  %v694_v21 = vld [vmem:[%s3919_s1 + $0x28] sm:$0xff]  ;;  %v693_v23 = vld [vmem:[%s3919_s1 + $0x20] sm:$0xff] }
  0x12   : > { %830 = vmatprep.subr.mxu0 %v2516_v2  ;;  %1215 = vmatprep.subr.mxu1 %v2516_v2  ;;  %v727_v20 = vld [vmem:[%s3919_s1 + $0x130] sm:$0xff]  ;;  %v726_v22 = vld [vmem:[%s3919_s1 + $0x128] sm:$0xff]  ;;  %v725_v24 = vld [vmem:[%s3919_s1 + $0x120] sm:$0xff] }
  0x13   : > { %831 = vmatpush1.msra.mxu0 %v701_v7  ;;  %1216 = vmatpush1.msra.mxu1 %v733_v8  ;;  %v692_v25 = vld [vmem:[%s3919_s1 + $0x18] sm:$0xff]  ;;  %v691_v27 = vld [vmem:[%s3919_s1 + $0x10] sm:$0xff]  ;;  %v690_v29 = vld [vmem:[%s3919_s1 + $0x8] sm:$0xff] }
  0x14   : > { %832 = vmatprep.subr.mxu0 %v2516_v2  ;;  %1217 = vmatprep.subr.mxu1 %v2516_v2  ;;  %v724_v26 = vld [vmem:[%s3919_s1 + $0x118] sm:$0xff]  ;;  %v723_v28 = vld [vmem:[%s3919_s1 + $0x110] sm:$0xff]  ;;  %v722_v30 = vld [vmem:[%s3919_s1 + $0x108] sm:$0xff] }
  0x15   : > { %833 = vmatpush1.msra.mxu0 %v700_v9  ;;  %1218 = vmatpush1.msra.mxu1 %v732_v10  ;;  %v689_v31 = vld [vmem:[%s3919_s1] sm:$0xff]  ;;  %v720_v33 = vld [vmem:[%s3919_s1 + $0xf8] sm:$0xff]  ;;  %v719_v35 = vld [vmem:[%s3919_s1 + $0xf0] sm:$0xff] }
  0x16   : > { %834 = vmatprep.subr.mxu0 %v2516_v2  ;;  %1219 = vmatprep.subr.mxu1 %v2516_v2  ;;  %v721_v32 = vld [vmem:[%s3919_s1 + $0x100] sm:$0xff]  ;;  %v752_v34 = vld [vmem:[%s3919_s1 + $0x1f8] sm:$0xff]  ;;  %v751_v36 = vld [vmem:[%s3919_s1 + $0x1f0] sm:$0xff] }
  0x17   : > { %835 = vmatpush1.msra.mxu0 %v699_v11  ;;  %1220 = vmatpush1.msra.mxu1 %v731_v12  ;;  %v718_v37 = vld [vmem:[%s3919_s1 + $0xe8] sm:$0xff]  ;;  %v717_v39 = vld [vmem:[%s3919_s1 + $0xe0] sm:$0xff]  ;;  %v716_v41 = vld [vmem:[%s3919_s1 + $0xd8] sm:$0xff] }
  0x18   : > { %836 = vmatprep.subr.mxu0 %v2516_v2  ;;  %1221 = vmatprep.subr.mxu1 %v2516_v2  ;;  %v750_v38 = vld [vmem:[%s3919_s1 + $0x1e8] sm:$0xff]  ;;  %v749_v40 = vld [vmem:[%s3919_s1 + $0x1e0] sm:$0xff]  ;;  %v748_v42 = vld [vmem:[%s3919_s1 + $0x1d8] sm:$0xff] }
  0x19   : > { %837 = vmatpush1.msra.mxu0 %v698_v13  ;;  %1222 = vmatpush1.msra.mxu1 %v730_v14  ;;  %v715_v43 = vld [vmem:[%s3919_s1 + $0xd0] sm:$0xff]  ;;  %v714_v45 = vld [vmem:[%s3919_s1 + $0xc8] sm:$0xff]  ;;  %v713_v47 = vld [vmem:[%s3919_s1 + $0xc0] sm:$0xff] }
  0x1a   : > { %838 = vmatprep.subr.mxu0 %v2516_v2  ;;  %1223 = vmatprep.subr.mxu1 %v2516_v2  ;;  %v747_v44 = vld [vmem:[%s3919_s1 + $0x1d0] sm:$0xff]  ;;  %v746_v46 = vld [vmem:[%s3919_s1 + $0x1c8] sm:$0xff]  ;;  %v745_v48 = vld [vmem:[%s3919_s1 + $0x1c0] sm:$0xff] }
  0x1b   : > { %839 = vmatpush1.msra.mxu0 %v697_v15  ;;  %1224 = vmatpush1.msra.mxu1 %v729_v16  ;;  %v712_v49 = vld [vmem:[%s3919_s1 + $0xb8] sm:$0xff]  ;;  %v711_v51 = vld [vmem:[%s3919_s1 + $0xb0] sm:$0xff]  ;;  %v710_v53 = vld [vmem:[%s3919_s1 + $0xa8] sm:$0xff] }
  0x1c   : > { %840 = vmatprep.subr.mxu0 %v2516_v2  ;;  %1225 = vmatprep.subr.mxu1 %v2516_v2  ;;  %v744_v50 = vld [vmem:[%s3919_s1 + $0x1b8] sm:$0xff]  ;;  %v743_v52 = vld [vmem:[%s3919_s1 + $0x1b0] sm:$0xff]  ;;  %v742_v54 = vld [vmem:[%s3919_s1 + $0x1a8] sm:$0xff] }
  0x1d   : > { %841 = vmatpush1.msra.mxu0 %v696_v17  ;;  %1226 = vmatpush1.msra.mxu1 %v728_v18  ;;  %v709_v55 = vld [vmem:[%s3919_s1 + $0xa0] sm:$0xff]  ;;  %v708_v57 = vld [vmem:[%s3919_s1 + $0x98] sm:$0xff]  ;;  %v707_v59 = vld [vmem:[%s3919_s1 + $0x90] sm:$0xff] }
  0x1e   : > { %842 = vmatprep.subr.mxu0 %v2516_v2  ;;  %1227 = vmatprep.subr.mxu1 %v2516_v2  ;;  %v741_v56 = vld [vmem:[%s3919_s1 + $0x1a0] sm:$0xff]  ;;  %v740_v58 = vld [vmem:[%s3919_s1 + $0x198] sm:$0xff]  ;;  %v739_v60 = vld [vmem:[%s3919_s1 + $0x190] sm:$0xff] }
  0x1f   : > { %843 = vmatpush1.msra.mxu0 %v695_v19  ;;  %1228 = vmatpush1.msra.mxu1 %v727_v20  ;;  %v706_v61 = vld [vmem:[%s3919_s1 + $0x88] sm:$0xff]  ;;  %v705_v0 = vld [vmem:[%s3919_s1 + $0x80] sm:$0xff]  ;;  %v180_v4 = vld [vmem:[%s2791_s10 + $0x18] sm:$0xff] }
  0x20   : > { %844 = vmatprep.subr.mxu0 %v2516_v2  ;;  %1229 = vmatprep.subr.mxu1 %v2516_v2  ;;  %v738_v62 = vld [vmem:[%s3919_s1 + $0x188] sm:$0xff]  ;;  %v177_v1 = vld [vmem:[%s2791_s10] sm:$0xff]  ;;  %v179_v5 = vld [vmem:[%s2791_s10 + $0x10] sm:$0xff] }
  0x21   : > { %845 = vmatpush1.msra.mxu0 %v694_v21  ;;  %1230 = vmatpush1.msra.mxu1 %v726_v22  ;;  %v178_v63 = vld [vmem:[%s2791_s10 + $0x8] sm:$0xff]  ;;  %v737_v3 = vld [vmem:[%s3919_s1 + $0x180] sm:$0xff]  ;;  %v768_v6 = vld [vmem:[%s3919_s1 + $0x278] sm:$0xff] }
  0x22   : > { %846 = vmatprep.subr.mxu0 %v2516_v2  ;;  %1231 = vmatprep.subr.mxu1 %v2516_v2  ;;  %v186_v7 = vld [vmem:[%s2791_s10 + $0x48] sm:$0xff]  ;;  %v800_v8 = vld [vmem:[%s3919_s1 + $0x378] sm:$0xff]  ;;  %v185_v9 = vld [vmem:[%s2791_s10 + $0x40] sm:$0xff] }
  0x23   : > { %847 = vmatpush1.msra.mxu0 %v693_v23  ;;  %1232 = vmatpush1.msra.mxu1 %v725_v24  ;;  %v188_v10 = vld [vmem:[%s2791_s10 + $0x58] sm:$0xff]  ;;  %v194_v11 = vld [vmem:[%s2791_s10 + $0x88] sm:$0xff]  ;;  %v187_v12 = vld [vmem:[%s2791_s10 + $0x50] sm:$0xff] }
  0x24   : > { %848 = vmatprep.subr.mxu0 %v2516_v2  ;;  %1233 = vmatprep.subr.mxu1 %v2516_v2  ;;  %v196_v13 = vld [vmem:[%s2791_s10 + $0x98] sm:$0xff]  ;;  %v767_v14 = vld [vmem:[%s3919_s1 + $0x270] sm:$0xff]  ;;  %v193_v15 = vld [vmem:[%s2791_s10 + $0x80] sm:$0xff] }
  0x25   : > { %849 = vmatpush1.msra.mxu0 %v692_v25  ;;  %1234 = vmatpush1.msra.mxu1 %v724_v26  ;;  %v202_v16 = vld [vmem:[%s2791_s10 + $0xc8] sm:$0xff]  ;;  %v799_v17 = vld [vmem:[%s3919_s1 + $0x370] sm:$0xff]  ;;  %v204_v19 = vld [vmem:[%s2791_s10 + $0xd8] sm:$0xff] }
  0x26   : > { %850 = vmatprep.subr.mxu0 %v2516_v2  ;;  %1235 = vmatprep.subr.mxu1 %v2516_v2  ;;  %v195_v18 = vld [vmem:[%s2791_s10 + $0x90] sm:$0xff]  ;;  %v766_v20 = vld [vmem:[%s3919_s1 + $0x268] sm:$0xff]  ;;  %v201_v21 = vld [vmem:[%s2791_s10 + $0xc0] sm:$0xff] }
  0x27   : > { %851 = vmatpush1.msra.mxu0 %v691_v27  ;;  %1236 = vmatpush1.msra.mxu1 %v723_v28  ;;  %v210_v22 = vld [vmem:[%s2791_s10 + $0x108] sm:$0xff]  ;;  %v203_v24 = vld [vmem:[%s2791_s10 + $0xd0] sm:$0xff]  ;;  %v212_v25 = vld [vmem:[%s2791_s10 + $0x118] sm:$0xff] }
  0x28   : > { %852 = vmatprep.subr.mxu0 %v2516_v2  ;;  %1237 = vmatprep.subr.mxu1 %v2516_v2  ;;  %v798_v23 = vld [vmem:[%s3919_s1 + $0x368] sm:$0xff]  ;;  %v765_v26 = vld [vmem:[%s3919_s1 + $0x260] sm:$0xff] }
  0x29   : > { %853 = vmatpush1.msra.mxu0 %v690_v29  ;;  %1238 = vmatpush1.msra.mxu1 %v722_v30  ;;  %v209_v27 = vld [vmem:[%s2791_s10 + $0x100] sm:$0xff]  ;;  %v218_v28 = vld [vmem:[%s2791_s10 + $0x148] sm:$0xff]  ;;  %v211_v30 = vld [vmem:[%s2791_s10 + $0x110] sm:$0xff] }
  0x2a   : > { %854 = vmatprep.subr.mxu0 %v2516_v2  ;;  %1239 = vmatprep.subr.mxu1 %v2516_v2  ;;  %v797_v29 = vld [vmem:[%s3919_s1 + $0x360] sm:$0xff] }
  0x2b   : > { %855 = vmatpush1.msra.mxu0 %v689_v31  ;;  %1240 = vmatpush1.msra.mxu1 %v721_v32  ;;  %v220_v31 = vld [vmem:[%s2791_s10 + $0x158] sm:$0xff] }
  0x2c   : > { %856 = vmatprep.subr.mxu0 %v2516_v2  ;;  %1241 = vmatprep.subr.mxu1 %v2516_v2  ;;  %v764_v32 = vld [vmem:[%s3919_s1 + $0x258] sm:$0xff] }
  0x2d   : > { %857 = vmatpush2.msra.mxu0 %v720_v33  ;;  %1242 = vmatpush2.msra.mxu1 %v752_v34  ;;  %v217_v33 = vld [vmem:[%s2791_s10 + $0x140] sm:$0xff]  ;;  %v226_v34 = vld [vmem:[%s2791_s10 + $0x188] sm:$0xff] }
  0x2e   : > { %858 = vmatprep.subr.mxu0 %v2516_v2  ;;  %1243 = vmatprep.subr.mxu1 %v2516_v2 }
  0x2f   : > { %859 = vmatpush2.msra.mxu0 %v719_v35  ;;  %1244 = vmatpush2.msra.mxu1 %v751_v36  ;;  %v796_v35 = vld [vmem:[%s3919_s1 + $0x358] sm:$0xff]  ;;  %v219_v36 = vld [vmem:[%s2791_s10 + $0x150] sm:$0xff] }
  0x30   : > { %860 = vmatprep.subr.mxu0 %v2516_v2  ;;  %1245 = vmatprep.subr.mxu1 %v2516_v2 }
  0x31   : > { %861 = vmatpush2.msra.mxu0 %v718_v37  ;;  %1246 = vmatpush2.msra.mxu1 %v750_v38  ;;  %v228_v37 = vld [vmem:[%s2791_s10 + $0x198] sm:$0xff]  ;;  %v763_v38 = vld [vmem:[%s3919_s1 + $0x250] sm:$0xff] }
  0x32   : > { %862 = vmatprep.subr.mxu0 %v2516_v2  ;;  %1247 = vmatprep.subr.mxu1 %v2516_v2 }
  0x33   : > { %863 = vmatpush2.msra.mxu0 %v717_v39  ;;  %1248 = vmatpush2.msra.mxu1 %v749_v40  ;;  %v225_v39 = vld [vmem:[%s2791_s10 + $0x180] sm:$0xff]  ;;  %v234_v40 = vld [vmem:[%s2791_s10 + $0x1c8] sm:$0xff] }
  0x34   : > { %864 = vmatprep.subr.mxu0 %v2516_v2  ;;  %1249 = vmatprep.subr.mxu1 %v2516_v2 }
  0x35   : > { %865 = vmatpush2.msra.mxu0 %v716_v41  ;;  %1250 = vmatpush2.msra.mxu1 %v748_v42  ;;  %v795_v41 = vld [vmem:[%s3919_s1 + $0x350] sm:$0xff] }
  0x36   : > { %866 = vmatprep.subr.mxu0 %v2516_v2  ;;  %1251 = vmatprep.subr.mxu1 %v2516_v2  ;;  %v227_v42 = vld [vmem:[%s2791_s10 + $0x190] sm:$0xff] }
  0x37   : > { %867 = vmatpush2.msra.mxu0 %v715_v43  ;;  %1252 = vmatpush2.msra.mxu1 %v747_v44  ;;  %v236_v43 = vld [vmem:[%s2791_s10 + $0x1d8] sm:$0xff]  ;;  %v762_v44 = vld [vmem:[%s3919_s1 + $0x248] sm:$0xff] }
  0x38   : > { %868 = vmatprep.subr.mxu0 %v2516_v2  ;;  %1253 = vmatprep.subr.mxu1 %v2516_v2 }
  0x39   : > { %869 = vmatpush2.msra.mxu0 %v714_v45  ;;  %1254 = vmatpush2.msra.mxu1 %v746_v46  ;;  %v233_v45 = vld [vmem:[%s2791_s10 + $0x1c0] sm:$0xff]  ;;  %v242_v46 = vld [vmem:[%s2791_s10 + $0x208] sm:$0xff] }
  0x3a   : > { %870 = vmatprep.subr.mxu0 %v2516_v2  ;;  %1255 = vmatprep.subr.mxu1 %v2516_v2 }
  0x3b   : > { %871 = vmatpush2.msra.mxu0 %v713_v47  ;;  %1256 = vmatpush2.msra.mxu1 %v745_v48  ;;  %v794_v47 = vld [vmem:[%s3919_s1 + $0x348] sm:$0xff]  ;;  %v235_v48 = vld [vmem:[%s2791_s10 + $0x1d0] sm:$0xff] }
  0x3c   : > { %872 = vmatprep.subr.mxu0 %v2516_v2  ;;  %1257 = vmatprep.subr.mxu1 %v2516_v2 }
  0x3d   : > { %873 = vmatpush2.msra.mxu0 %v712_v49  ;;  %1258 = vmatpush2.msra.mxu1 %v744_v50  ;;  %v244_v49 = vld [vmem:[%s2791_s10 + $0x218] sm:$0xff]  ;;  %v761_v50 = vld [vmem:[%s3919_s1 + $0x240] sm:$0xff] }
  0x3e   : > { %874 = vmatprep.subr.mxu0 %v2516_v2  ;;  %1259 = vmatprep.subr.mxu1 %v2516_v2 }
  0x3f   : > { %875 = vmatpush2.msra.mxu0 %v711_v51  ;;  %1260 = vmatpush2.msra.mxu1 %v743_v52  ;;  %v241_v51 = vld [vmem:[%s2791_s10 + $0x200] sm:$0xff]  ;;  %v250_v52 = vld [vmem:[%s2791_s10 + $0x248] sm:$0xff] }
  0x40   : > { %876 = vmatprep.subr.mxu0 %v2516_v2  ;;  %1261 = vmatprep.subr.mxu1 %v2516_v2 }
  0x41   : > { %877 = vmatpush2.msra.mxu0 %v710_v53  ;;  %1262 = vmatpush2.msra.mxu1 %v742_v54  ;;  %v793_v53 = vld [vmem:[%s3919_s1 + $0x340] sm:$0xff]  ;;  %v243_v54 = vld [vmem:[%s2791_s10 + $0x210] sm:$0xff] }
  0x42   : > { %878 = vmatprep.subr.mxu0 %v2516_v2  ;;  %1263 = vmatprep.subr.mxu1 %v2516_v2 }
  0x43   : > { %879 = vmatpush2.msra.mxu0 %v709_v55  ;;  %1264 = vmatpush2.msra.mxu1 %v741_v56  ;;  %v252_v55 = vld [vmem:[%s2791_s10 + $0x258] sm:$0xff] }
  0x44   : > { %880 = vmatprep.subr.mxu0 %v2516_v2  ;;  %1265 = vmatprep.subr.mxu1 %v2516_v2  ;;  %v760_v56 = vld [vmem:[%s3919_s1 + $0x238] sm:$0xff] }
  0x45   : > { %881 = vmatpush2.msra.mxu0 %v708_v57  ;;  %1266 = vmatpush2.msra.mxu1 %v740_v58  ;;  %v249_v57 = vld [vmem:[%s2791_s10 + $0x240] sm:$0xff]  ;;  %v258_v58 = vld [vmem:[%s2791_s10 + $0x288] sm:$0xff] }
  0x46   : > { %882 = vmatprep.subr.mxu0 %v2516_v2  ;;  %1267 = vmatprep.subr.mxu1 %v2516_v2 }
  0x47   : > { %883 = vmatpush2.msra.mxu0 %v707_v59  ;;  %1268 = vmatpush2.msra.mxu1 %v739_v60  ;;  %v792_v59 = vld [vmem:[%s3919_s1 + $0x338] sm:$0xff]  ;;  %v251_v60 = vld [vmem:[%s2791_s10 + $0x250] sm:$0xff] }
  0x48   : > { %884 = vmatprep.subr.mxu0 %v2516_v2  ;;  %1269 = vmatprep.subr.mxu1 %v2516_v2 }
  0x49   : > { %885 = vmatpush2.msra.mxu0 %v706_v61  ;;  %1270 = vmatpush2.msra.mxu1 %v738_v62  ;;  %v260_v61 = vld [vmem:[%s2791_s10 + $0x298] sm:$0xff]  ;;  %v759_v62 = vld [vmem:[%s3919_s1 + $0x230] sm:$0xff] }
  0x4a   : > { %886 = vmatprep.subr.mxu0 %v2516_v2  ;;  %888 = vmatprep.mubr.f32.mxu0 %v178_v63  ;;  %v257_v63 = vld [vmem:[%s2791_s10 + $0x280] sm:$0xff] }
  0x4b   : > { %887 = vmatpush2.msra.mxu0 %v705_v0  ;;  %1271 = vmatprep.subr.mxu1 %v2516_v2  ;;  %v266_v0 = vld [vmem:[%s2791_s10 + $0x2c8] sm:$0xff] }
  0x4c   : > { %889 = vmatmul.mubr.f32.vlgmr.msra.gmra.mxu0 %v177_v1  ;;  %1272 = vmatpush2.msra.mxu1 %v737_v3  ;;  %v791_v1 = vld [vmem:[%s3919_s1 + $0x330] sm:$0xff] }
  0x4d   : > { %1273 = vmatprep.mubr.f32.mxu1 %v180_v4  ;;  %1594 = vmatprep.subr.mxu0 %v2516_v2  ;;  %v259_v3 = vld [vmem:[%s2791_s10 + $0x290] sm:$0xff]  ;;  %v268_v4 = vld [vmem:[%s2791_s10 + $0x2d8] sm:$0xff] }
  0x4e   : > { %1274 = vmatmul.mubr.f32.vlgmr.msra.gmra.mxu1 %v179_v5  ;;  %1595 = vmatpush1.msra.mxu0 %v768_v6  ;;  %v758_v5 = vld [vmem:[%s3919_s1 + $0x228] sm:$0xff]  ;;  %v265_v6 = vld [vmem:[%s2791_s10 + $0x2c0] sm:$0xff] }
  0x4f   : > { %1979 = vmatprep.subr.mxu1 %v2516_v2  ;;  %893 = vmatprep.mubr.f32.mxu0 %v186_v7  ;;  %v274_v7 = vld [vmem:[%s2791_s10 + $0x308] sm:$0xff] }
  0x50   : > { %1980 = vmatpush1.msra.mxu1 %v800_v8  ;;  %894 = vmatmul.mubr.f32.gmra.mxu0 %v185_v9  ;;  %v790_v8 = vld [vmem:[%s3919_s1 + $0x328] sm:$0xff]  ;;  %v267_v9 = vld [vmem:[%s2791_s10 + $0x2d0] sm:$0xff] }
  0x51   : > { %1278 = vmatprep.mubr.f32.mxu1 %v188_v10  ;;  %898 = vmatprep.mubr.f32.mxu0 %v194_v11  ;;  %v276_v10 = vld [vmem:[%s2791_s10 + $0x318] sm:$0xff]  ;;  %v757_v11 = vld [vmem:[%s3919_s1 + $0x220] sm:$0xff] }
  0x52   : > { %1279 = vmatmul.mubr.f32.gmra.mxu1 %v187_v12  ;;  %1596 = vmatprep.subr.mxu0 %v2516_v2  ;;  %v273_v12 = vld [vmem:[%s2791_s10 + $0x300] sm:$0xff] }
  0x53   : > { %1283 = vmatprep.mubr.f32.mxu1 %v196_v13  ;;  %1597 = vmatpush1.msra.mxu0 %v767_v14  ;;  %v282_v13 = vld [vmem:[%s2791_s10 + $0x348] sm:$0xff]  ;;  %v789_v14 = vld [vmem:[%s3919_s1 + $0x320] sm:$0xff] }
  0x54   : > { %899 = vmatmul.mubr.f32.gmra.mxu0 %v193_v15  ;;  %1981 = vmatprep.subr.mxu1 %v2516_v2  ;;  %v275_v15 = vld [vmem:[%s2791_s10 + $0x310] sm:$0xff] }
  0x55   : > { %903 = vmatprep.mubr.f32.mxu0 %v202_v16  ;;  %1982 = vmatpush1.msra.mxu1 %v799_v17  ;;  %v284_v16 = vld [vmem:[%s2791_s10 + $0x358] sm:$0xff] }
  0x56   : > { %1284 = vmatmul.mubr.f32.gmra.mxu1 %v195_v18  ;;  %1598 = vmatprep.subr.mxu0 %v2516_v2  ;;  %v756_v17 = vld [vmem:[%s3919_s1 + $0x218] sm:$0xff]  ;;  %v281_v18 = vld [vmem:[%s2791_s10 + $0x340] sm:$0xff] }
  0x57   : > { %1288 = vmatprep.mubr.f32.mxu1 %v204_v19  ;;  %1599 = vmatpush1.msra.mxu0 %v766_v20  ;;  %v290_v19 = vld [vmem:[%s2791_s10 + $0x388] sm:$0xff]  ;;  %v788_v20 = vld [vmem:[%s3919_s1 + $0x318] sm:$0xff] }
  0x58   : > { %904 = vmatmul.mubr.f32.gmra.mxu0 %v201_v21  ;;  %1983 = vmatprep.subr.mxu1 %v2516_v2  ;;  %v283_v21 = vld [vmem:[%s2791_s10 + $0x350] sm:$0xff] }
  0x59   : > { %908 = vmatprep.mubr.f32.mxu0 %v210_v22  ;;  %1984 = vmatpush1.msra.mxu1 %v798_v23  ;;  %v292_v22 = vld [vmem:[%s2791_s10 + $0x398] sm:$0xff]  ;;  %v755_v23 = vld [vmem:[%s3919_s1 + $0x210] sm:$0xff] }
  0x5a   : > { %1289 = vmatmul.mubr.f32.gmra.mxu1 %v203_v24  ;;  %1600 = vmatprep.subr.mxu0 %v2516_v2  ;;  %v289_v24 = vld [vmem:[%s2791_s10 + $0x380] sm:$0xff] }
  0x5b   : > { %1293 = vmatprep.mubr.f32.mxu1 %v212_v25  ;;  %1601 = vmatpush1.msra.mxu0 %v765_v26  ;;  %v298_v25 = vld [vmem:[%s2791_s10 + $0x3c8] sm:$0xff]  ;;  %v787_v26 = vld [vmem:[%s3919_s1 + $0x310] sm:$0xff] }
  0x5c   : > { %909 = vmatmul.mubr.f32.gmra.mxu0 %v209_v27  ;;  %1985 = vmatprep.subr.mxu1 %v2516_v2  ;;  %v291_v27 = vld [vmem:[%s2791_s10 + $0x390] sm:$0xff] }
  0x5d   : > { %913 = vmatprep.mubr.f32.mxu0 %v218_v28  ;;  %1986 = vmatpush1.msra.mxu1 %v797_v29  ;;  %v300_v28 = vld [vmem:[%s2791_s10 + $0x3d8] sm:$0xff]  ;;  %v754_v29 = vld [vmem:[%s3919_s1 + $0x208] sm:$0xff] }
  0x5e   : > { %1294 = vmatmul.mubr.f32.gmra.mxu1 %v211_v30  ;;  %1602 = vmatprep.subr.mxu0 %v2516_v2  ;;  %v297_v30 = vld [vmem:[%s2791_s10 + $0x3c0] sm:$0xff] }
  0x5f   : > { %1298 = vmatprep.mubr.f32.mxu1 %v220_v31  ;;  %1603 = vmatpush1.msra.mxu0 %v764_v32  ;;  %v306_v31 = vld [vmem:[%s2791_s10 + $0x408] sm:$0xff] }
  0x60   : > { %914 = vmatmul.mubr.f32.gmra.mxu0 %v217_v33  ;;  %1987 = vmatprep.subr.mxu1 %v2516_v2  ;;  %v786_v32 = vld [vmem:[%s3919_s1 + $0x308] sm:$0xff]  ;;  %v299_v33 = vld [vmem:[%s2791_s10 + $0x3d0] sm:$0xff] }
  0x61   : > { %918 = vmatprep.mubr.f32.mxu0 %v226_v34  ;;  %1988 = vmatpush1.msra.mxu1 %v796_v35  ;;  %v308_v34 = vld [vmem:[%s2791_s10 + $0x418] sm:$0xff]  ;;  %v753_v35 = vld [vmem:[%s3919_s1 + $0x200] sm:$0xff] }
  0x62   : > { %1299 = vmatmul.mubr.f32.gmra.mxu1 %v219_v36  ;;  %1604 = vmatprep.subr.mxu0 %v2516_v2  ;;  %v305_v36 = vld [vmem:[%s2791_s10 + $0x400] sm:$0xff] }
  0x63   : > { %1303 = vmatprep.mubr.f32.mxu1 %v228_v37  ;;  %1605 = vmatpush1.msra.mxu0 %v763_v38  ;;  %v314_v37 = vld [vmem:[%s2791_s10 + $0x448] sm:$0xff]  ;;  %v785_v38 = vld [vmem:[%s3919_s1 + $0x300] sm:$0xff] }
  0x64   : > { %919 = vmatmul.mubr.f32.gmra.mxu0 %v225_v39  ;;  %1989 = vmatprep.subr.mxu1 %v2516_v2  ;;  %v307_v39 = vld [vmem:[%s2791_s10 + $0x410] sm:$0xff] }
  0x65   : > { %923 = vmatprep.mubr.f32.mxu0 %v234_v40  ;;  %1990 = vmatpush1.msra.mxu1 %v795_v41  ;;  %v316_v40 = vld [vmem:[%s2791_s10 + $0x458] sm:$0xff] }
  0x66   : > { %1304 = vmatmul.mubr.f32.gmra.mxu1 %v227_v42  ;;  %1606 = vmatprep.subr.mxu0 %v2516_v2  ;;  %v784_v41 = vld [vmem:[%s3919_s1 + $0x2f8] sm:$0xff]  ;;  %v313_v42 = vld [vmem:[%s2791_s10 + $0x440] sm:$0xff] }
  0x67   : > { %1308 = vmatprep.mubr.f32.mxu1 %v236_v43  ;;  %1607 = vmatpush1.msra.mxu0 %v762_v44  ;;  %v322_v43 = vld [vmem:[%s2791_s10 + $0x488] sm:$0xff]  ;;  %v816_v44 = vld [vmem:[%s3919_s1 + $0x3f8] sm:$0xff] }
  0x68   : > { %924 = vmatmul.mubr.f32.gmra.mxu0 %v233_v45  ;;  %1991 = vmatprep.subr.mxu1 %v2516_v2  ;;  %v315_v45 = vld [vmem:[%s2791_s10 + $0x450] sm:$0xff] }
  0x69   : > { %928 = vmatprep.mubr.f32.mxu0 %v242_v46  ;;  %1992 = vmatpush1.msra.mxu1 %v794_v47  ;;  %v324_v46 = vld [vmem:[%s2791_s10 + $0x498] sm:$0xff]  ;;  %v783_v47 = vld [vmem:[%s3919_s1 + $0x2f0] sm:$0xff] }
  0x6a   : > { %1309 = vmatmul.mubr.f32.gmra.mxu1 %v235_v48  ;;  %1608 = vmatprep.subr.mxu0 %v2516_v2  ;;  %v321_v48 = vld [vmem:[%s2791_s10 + $0x480] sm:$0xff] }
  0x6b   : > { %1313 = vmatprep.mubr.f32.mxu1 %v244_v49  ;;  %1609 = vmatpush1.msra.mxu0 %v761_v50  ;;  %v330_v49 = vld [vmem:[%s2791_s10 + $0x4c8] sm:$0xff]  ;;  %v815_v50 = vld [vmem:[%s3919_s1 + $0x3f0] sm:$0xff] }
  0x6c   : > { %929 = vmatmul.mubr.f32.gmra.mxu0 %v241_v51  ;;  %1993 = vmatprep.subr.mxu1 %v2516_v2  ;;  %v323_v51 = vld [vmem:[%s2791_s10 + $0x490] sm:$0xff] }
  0x6d   : > { %933 = vmatprep.mubr.f32.mxu0 %v250_v52  ;;  %1994 = vmatpush1.msra.mxu1 %v793_v53  ;;  %v332_v52 = vld [vmem:[%s2791_s10 + $0x4d8] sm:$0xff]  ;;  %v782_v53 = vld [vmem:[%s3919_s1 + $0x2e8] sm:$0xff] }
  0x6e   : > { %1314 = vmatmul.mubr.f32.gmra.mxu1 %v243_v54  ;;  %1610 = vmatprep.subr.mxu0 %v2516_v2  ;;  %v329_v54 = vld [vmem:[%s2791_s10 + $0x4c0] sm:$0xff] }
  0x6f   : > { %1318 = vmatprep.mubr.f32.mxu1 %v252_v55  ;;  %1611 = vmatpush1.msra.mxu0 %v760_v56  ;;  %v338_v55 = vld [vmem:[%s2791_s10 + $0x508] sm:$0xff] }
  0x70   : > { %934 = vmatmul.mubr.f32.gmra.mxu0 %v249_v57  ;;  %1995 = vmatprep.subr.mxu1 %v2516_v2  ;;  %v814_v56 = vld [vmem:[%s3919_s1 + $0x3e8] sm:$0xff]  ;;  %v331_v57 = vld [vmem:[%s2791_s10 + $0x4d0] sm:$0xff] }
  0x71   : > { %938 = vmatprep.mubr.f32.mxu0 %v258_v58  ;;  %1996 = vmatpush1.msra.mxu1 %v792_v59  ;;  %v340_v58 = vld [vmem:[%s2791_s10 + $0x518] sm:$0xff]  ;;  %v781_v59 = vld [vmem:[%s3919_s1 + $0x2e0] sm:$0xff] }
  0x72   : > { %1319 = vmatmul.mubr.f32.gmra.mxu1 %v251_v60  ;;  %1612 = vmatprep.subr.mxu0 %v2516_v2  ;;  %v337_v60 = vld [vmem:[%s2791_s10 + $0x500] sm:$0xff] }
  0x73   : > { %1323 = vmatprep.mubr.f32.mxu1 %v260_v61  ;;  %1613 = vmatpush1.msra.mxu0 %v759_v62  ;;  %v346_v61 = vld [vmem:[%s2791_s10 + $0x548] sm:$0xff]  ;;  %v813_v62 = vld [vmem:[%s3919_s1 + $0x3e0] sm:$0xff] }
  0x74   : > { %939 = vmatmul.mubr.f32.gmra.mxu0 %v257_v63  ;;  %1997 = vmatprep.subr.mxu1 %v2516_v2  ;;  %v339_v63 = vld [vmem:[%s2791_s10 + $0x510] sm:$0xff] }
  0x75   : > { %943 = vmatprep.mubr.f32.mxu0 %v266_v0  ;;  %1998 = vmatpush1.msra.mxu1 %v791_v1  ;;  %v348_v0 = vld [vmem:[%s2791_s10 + $0x558] sm:$0xff] }
  0x76   : > { %1324 = vmatmul.mubr.f32.gmra.mxu1 %v259_v3  ;;  %1614 = vmatprep.subr.mxu0 %v2516_v2  ;;  %v780_v1 = vld [vmem:[%s3919_s1 + $0x2d8] sm:$0xff]  ;;  %v345_v3 = vld [vmem:[%s2791_s10 + $0x540] sm:$0xff] }
  0x77   : > { %1328 = vmatprep.mubr.f32.mxu1 %v268_v4  ;;  %1615 = vmatpush1.msra.mxu0 %v758_v5  ;;  %v354_v4 = vld [vmem:[%s2791_s10 + $0x588] sm:$0xff]  ;;  %v812_v5 = vld [vmem:[%s3919_s1 + $0x3d8] sm:$0xff] }
  0x78   : > { %944 = vmatmul.mubr.f32.gmra.mxu0 %v265_v6  ;;  %1999 = vmatprep.subr.mxu1 %v2516_v2  ;;  %v347_v6 = vld [vmem:[%s2791_s10 + $0x550] sm:$0xff] }
  0x79   : > { %948 = vmatprep.mubr.f32.mxu0 %v274_v7  ;;  %2000 = vmatpush1.msra.mxu1 %v790_v8  ;;  %v356_v7 = vld [vmem:[%s2791_s10 + $0x598] sm:$0xff]  ;;  %v779_v8 = vld [vmem:[%s3919_s1 + $0x2d0] sm:$0xff] }
  0x7a   : > { %1329 = vmatmul.mubr.f32.gmra.mxu1 %v267_v9  ;;  %1616 = vmatprep.subr.mxu0 %v2516_v2  ;;  %v353_v9 = vld [vmem:[%s2791_s10 + $0x580] sm:$0xff] }
  0x7b   : > { %1333 = vmatprep.mubr.f32.mxu1 %v276_v10  ;;  %1617 = vmatpush1.msra.mxu0 %v757_v11  ;;  %v362_v10 = vld [vmem:[%s2791_s10 + $0x5c8] sm:$0xff]  ;;  %v811_v11 = vld [vmem:[%s3919_s1 + $0x3d0] sm:$0xff] }
  0x7c   : > { %949 = vmatmul.mubr.f32.gmra.mxu0 %v273_v12  ;;  %2001 = vmatprep.subr.mxu1 %v2516_v2  ;;  %v355_v12 = vld [vmem:[%s2791_s10 + $0x590] sm:$0xff] }
  0x7d   : > { %953 = vmatprep.mubr.f32.mxu0 %v282_v13  ;;  %2002 = vmatpush1.msra.mxu1 %v789_v14  ;;  %v364_v13 = vld [vmem:[%s2791_s10 + $0x5d8] sm:$0xff]  ;;  %v778_v14 = vld [vmem:[%s3919_s1 + $0x2c8] sm:$0xff] }
  0x7e   : > { %1334 = vmatmul.mubr.f32.gmra.mxu1 %v275_v15  ;;  %1618 = vmatprep.subr.mxu0 %v2516_v2  ;;  %v361_v15 = vld [vmem:[%s2791_s10 + $0x5c0] sm:$0xff] }
  0x7f   : > { %1338 = vmatprep.mubr.f32.mxu1 %v284_v16  ;;  %1619 = vmatpush1.msra.mxu0 %v756_v17  ;;  %v370_v16 = vld [vmem:[%s2791_s10 + $0x608] sm:$0xff] }
  0x80   : > { %954 = vmatmul.mubr.f32.gmra.mxu0 %v281_v18  ;;  %2003 = vmatprep.subr.mxu1 %v2516_v2  ;;  %v810_v17 = vld [vmem:[%s3919_s1 + $0x3c8] sm:$0xff]  ;;  %v363_v18 = vld [vmem:[%s2791_s10 + $0x5d0] sm:$0xff] }
  0x81   : > { %958 = vmatprep.mubr.f32.mxu0 %v290_v19  ;;  %2004 = vmatpush1.msra.mxu1 %v788_v20  ;;  %v372_v19 = vld [vmem:[%s2791_s10 + $0x618] sm:$0xff]  ;;  %v777_v20 = vld [vmem:[%s3919_s1 + $0x2c0] sm:$0xff] }
  0x82   : > { %1339 = vmatmul.mubr.f32.gmra.mxu1 %v283_v21  ;;  %1620 = vmatprep.subr.mxu0 %v2516_v2  ;;  %v369_v21 = vld [vmem:[%s2791_s10 + $0x600] sm:$0xff] }
  0x83   : > { %1343 = vmatprep.mubr.f32.mxu1 %v292_v22  ;;  %1621 = vmatpush1.msra.mxu0 %v755_v23  ;;  %v378_v22 = vld [vmem:[%s2791_s10 + $0x648] sm:$0xff]  ;;  %v809_v23 = vld [vmem:[%s3919_s1 + $0x3c0] sm:$0xff] }
  0x84   : > { %959 = vmatmul.mubr.f32.gmra.mxu0 %v289_v24  ;;  %2005 = vmatprep.subr.mxu1 %v2516_v2  ;;  %v371_v24 = vld [vmem:[%s2791_s10 + $0x610] sm:$0xff] }
  0x85   : > { %963 = vmatprep.mubr.f32.mxu0 %v298_v25  ;;  %2006 = vmatpush1.msra.mxu1 %v787_v26  ;;  %v380_v25 = vld [vmem:[%s2791_s10 + $0x658] sm:$0xff] }
  0x86   : > { %1344 = vmatmul.mubr.f32.gmra.mxu1 %v291_v27  ;;  %1622 = vmatprep.subr.mxu0 %v2516_v2  ;;  %v776_v26 = vld [vmem:[%s3919_s1 + $0x2b8] sm:$0xff]  ;;  %v377_v27 = vld [vmem:[%s2791_s10 + $0x640] sm:$0xff] }
  0x87   : > { %1348 = vmatprep.mubr.f32.mxu1 %v300_v28  ;;  %1623 = vmatpush1.msra.mxu0 %v754_v29  ;;  %v386_v28 = vld [vmem:[%s2791_s10 + $0x688] sm:$0xff]  ;;  %v808_v29 = vld [vmem:[%s3919_s1 + $0x3b8] sm:$0xff] }
  0x88   : > { %964 = vmatmul.mubr.f32.gmra.mxu0 %v297_v30  ;;  %2007 = vmatprep.subr.mxu1 %v2516_v2  ;;  %v379_v30 = vld [vmem:[%s2791_s10 + $0x650] sm:$0xff] }
  0x89   : > { %968 = vmatprep.mubr.f32.mxu0 %v306_v31  ;;  %2008 = vmatpush1.msra.mxu1 %v786_v32  ;;  %v388_v31 = vld [vmem:[%s2791_s10 + $0x698] sm:$0xff]  ;;  %v775_v32 = vld [vmem:[%s3919_s1 + $0x2b0] sm:$0xff] }
  0x8a   : > { %1349 = vmatmul.mubr.f32.gmra.mxu1 %v299_v33  ;;  %1624 = vmatprep.subr.mxu0 %v2516_v2  ;;  %v385_v33 = vld [vmem:[%s2791_s10 + $0x680] sm:$0xff] }
  0x8b   : > { %1353 = vmatprep.mubr.f32.mxu1 %v308_v34  ;;  %1625 = vmatpush1.msra.mxu0 %v753_v35  ;;  %v394_v34 = vld [vmem:[%s2791_s10 + $0x6c8] sm:$0xff]  ;;  %v807_v35 = vld [vmem:[%s3919_s1 + $0x3b0] sm:$0xff] }
  0x8c   : > { %969 = vmatmul.mubr.f32.gmra.mxu0 %v305_v36  ;;  %2009 = vmatprep.subr.mxu1 %v2516_v2  ;;  %v387_v36 = vld [vmem:[%s2791_s10 + $0x690] sm:$0xff] }
  0x8d   : > { %973 = vmatprep.mubr.f32.mxu0 %v314_v37  ;;  %2010 = vmatpush1.msra.mxu1 %v785_v38  ;;  %v396_v37 = vld [vmem:[%s2791_s10 + $0x6d8] sm:$0xff]  ;;  %v774_v38 = vld [vmem:[%s3919_s1 + $0x2a8] sm:$0xff] }
  0x8e   : > { %1354 = vmatmul.mubr.f32.gmra.mxu1 %v307_v39  ;;  %1626 = vmatprep.subr.mxu0 %v2516_v2  ;;  %v393_v39 = vld [vmem:[%s2791_s10 + $0x6c0] sm:$0xff] }
  0x8f   : > { %1358 = vmatprep.mubr.f32.mxu1 %v316_v40  ;;  %1627 = vmatpush2.msra.mxu0 %v784_v41  ;;  %v402_v40 = vld [vmem:[%s2791_s10 + $0x708] sm:$0xff] }
  0x90   : > { %974 = vmatmul.mubr.f32.gmra.mxu0 %v313_v42  ;;  %2011 = vmatprep.subr.mxu1 %v2516_v2  ;;  %v806_v41 = vld [vmem:[%s3919_s1 + $0x3a8] sm:$0xff]  ;;  %v395_v42 = vld [vmem:[%s2791_s10 + $0x6d0] sm:$0xff] }
  0x91   : > { %978 = vmatprep.mubr.f32.mxu0 %v322_v43  ;;  %2012 = vmatpush2.msra.mxu1 %v816_v44  ;;  %v404_v43 = vld [vmem:[%s2791_s10 + $0x718] sm:$0xff]  ;;  %v773_v44 = vld [vmem:[%s3919_s1 + $0x2a0] sm:$0xff] }
  0x92   : > { %1359 = vmatmul.mubr.f32.gmra.mxu1 %v315_v45  ;;  %1628 = vmatprep.subr.mxu0 %v2516_v2  ;;  %v401_v45 = vld [vmem:[%s2791_s10 + $0x700] sm:$0xff] }
  0x93   : > { %1363 = vmatprep.mubr.f32.mxu1 %v324_v46  ;;  %1629 = vmatpush2.msra.mxu0 %v783_v47  ;;  %v410_v46 = vld [vmem:[%s2791_s10 + $0x748] sm:$0xff]  ;;  %v805_v47 = vld [vmem:[%s3919_s1 + $0x3a0] sm:$0xff] }
  0x94   : > { %979 = vmatmul.mubr.f32.gmra.mxu0 %v321_v48  ;;  %2013 = vmatprep.subr.mxu1 %v2516_v2  ;;  %v403_v48 = vld [vmem:[%s2791_s10 + $0x710] sm:$0xff] }
  0x95   : > { %983 = vmatprep.mubr.f32.mxu0 %v330_v49  ;;  %2014 = vmatpush2.msra.mxu1 %v815_v50  ;;  %v412_v49 = vld [vmem:[%s2791_s10 + $0x758] sm:$0xff] }
  0x96   : > { %1364 = vmatmul.mubr.f32.gmra.mxu1 %v323_v51  ;;  %1630 = vmatprep.subr.mxu0 %v2516_v2  ;;  %v772_v50 = vld [vmem:[%s3919_s1 + $0x298] sm:$0xff]  ;;  %v409_v51 = vld [vmem:[%s2791_s10 + $0x740] sm:$0xff] }
  0x97   : > { %1368 = vmatprep.mubr.f32.mxu1 %v332_v52  ;;  %1631 = vmatpush2.msra.mxu0 %v782_v53  ;;  %v418_v52 = vld [vmem:[%s2791_s10 + $0x788] sm:$0xff]  ;;  %v804_v53 = vld [vmem:[%s3919_s1 + $0x398] sm:$0xff] }
  0x98   : > { %984 = vmatmul.mubr.f32.gmra.mxu0 %v329_v54  ;;  %2015 = vmatprep.subr.mxu1 %v2516_v2  ;;  %v411_v54 = vld [vmem:[%s2791_s10 + $0x750] sm:$0xff] }
  0x99   : > { %988 = vmatprep.mubr.f32.mxu0 %v338_v55  ;;  %2016 = vmatpush2.msra.mxu1 %v814_v56  ;;  %v420_v55 = vld [vmem:[%s2791_s10 + $0x798] sm:$0xff]  ;;  %v771_v56 = vld [vmem:[%s3919_s1 + $0x290] sm:$0xff] }
  0x9a   : > { %1369 = vmatmul.mubr.f32.gmra.mxu1 %v331_v57  ;;  %1632 = vmatprep.subr.mxu0 %v2516_v2  ;;  %v417_v57 = vld [vmem:[%s2791_s10 + $0x780] sm:$0xff] }
  0x9b   : > { %1373 = vmatprep.mubr.f32.mxu1 %v340_v58  ;;  %1633 = vmatpush2.msra.mxu0 %v781_v59  ;;  %v426_v58 = vld [vmem:[%s2791_s10 + $0x7c8] sm:$0xff]  ;;  %v803_v59 = vld [vmem:[%s3919_s1 + $0x390] sm:$0xff] }
  0x9c   : > { %989 = vmatmul.mubr.f32.gmra.mxu0 %v337_v60  ;;  %2017 = vmatprep.subr.mxu1 %v2516_v2  ;;  %v419_v60 = vld [vmem:[%s2791_s10 + $0x790] sm:$0xff] }
  0x9d   : > { %993 = vmatprep.mubr.f32.mxu0 %v346_v61  ;;  %2018 = vmatpush2.msra.mxu1 %v813_v62  ;;  %v428_v61 = vld [vmem:[%s2791_s10 + $0x7d8] sm:$0xff]  ;;  %v770_v62 = vld [vmem:[%s3919_s1 + $0x288] sm:$0xff] }
  0x9e   : > { %1374 = vmatmul.mubr.f32.gmra.mxu1 %v339_v63  ;;  %1634 = vmatprep.subr.mxu0 %v2516_v2  ;;  %v425_v63 = vld [vmem:[%s2791_s10 + $0x7c0] sm:$0xff] }
  0x9f   : > { %1378 = vmatprep.mubr.f32.mxu1 %v348_v0  ;;  %1635 = vmatpush2.msra.mxu0 %v780_v1  ;;  %v434_v0 = vld [vmem:[%s2791_s10 + $0x808] sm:$0xff] }
  0xa0   : > { %994 = vmatmul.mubr.f32.gmra.mxu0 %v345_v3  ;;  %2019 = vmatprep.subr.mxu1 %v2516_v2  ;;  %v802_v1 = vld [vmem:[%s3919_s1 + $0x388] sm:$0xff]  ;;  %v427_v3 = vld [vmem:[%s2791_s10 + $0x7d0] sm:$0xff] }
  0xa1   : > { %998 = vmatprep.mubr.f32.mxu0 %v354_v4  ;;  %2020 = vmatpush2.msra.mxu1 %v812_v5  ;;  %v436_v4 = vld [vmem:[%s2791_s10 + $0x818] sm:$0xff]  ;;  %v769_v5 = vld [vmem:[%s3919_s1 + $0x280] sm:$0xff] }
  0xa2   : > { %1379 = vmatmul.mubr.f32.gmra.mxu1 %v347_v6  ;;  %1636 = vmatprep.subr.mxu0 %v2516_v2  ;;  %v433_v6 = vld [vmem:[%s2791_s10 + $0x800] sm:$0xff] }
  0xa3   : > { %1383 = vmatprep.mubr.f32.mxu1 %v356_v7  ;;  %1637 = vmatpush2.msra.mxu0 %v779_v8  ;;  %v442_v7 = vld [vmem:[%s2791_s10 + $0x848] sm:$0xff]  ;;  %v801_v8 = vld [vmem:[%s3919_s1 + $0x380] sm:$0xff] }
  0xa4   : > { %999 = vmatmul.mubr.f32.gmra.mxu0 %v353_v9  ;;  %2021 = vmatprep.subr.mxu1 %v2516_v2  ;;  %v435_v9 = vld [vmem:[%s2791_s10 + $0x810] sm:$0xff] }
  0xa5   : > { %1003 = vmatprep.mubr.f32.mxu0 %v362_v10  ;;  %2022 = vmatpush2.msra.mxu1 %v811_v11  ;;  %v444_v10 = vld [vmem:[%s2791_s10 + $0x858] sm:$0xff]  ;;  %v441_v11 = vld [vmem:[%s2791_s10 + $0x840] sm:$0xff] }
  0xa6   : > { %1384 = vmatmul.mubr.f32.gmra.mxu1 %v355_v12  ;;  %1638 = vmatprep.subr.mxu0 %v2516_v2  ;;  %v450_v12 = vld [vmem:[%s2791_s10 + $0x888] sm:$0xff] }
  0xa7   : > { %1388 = vmatprep.mubr.f32.mxu1 %v364_v13  ;;  %1639 = vmatpush2.msra.mxu0 %v778_v14  ;;  %v443_v13 = vld [vmem:[%s2791_s10 + $0x850] sm:$0xff]  ;;  %v452_v14 = vld [vmem:[%s2791_s10 + $0x898] sm:$0xff] }
  0xa8   : > { %1004 = vmatmul.mubr.f32.gmra.mxu0 %v361_v15  ;;  %2023 = vmatprep.subr.mxu1 %v2516_v2  ;;  %v449_v15 = vld [vmem:[%s2791_s10 + $0x880] sm:$0xff] }
  0xa9   : > { %1008 = vmatprep.mubr.f32.mxu0 %v370_v16  ;;  %2024 = vmatpush2.msra.mxu1 %v810_v17  ;;  %v458_v16 = vld [vmem:[%s2791_s10 + $0x8c8] sm:$0xff]  ;;  %v460_v17 = vld [vmem:[%s2791_s10 + $0x8d8] sm:$0xff] }
  0xaa   : > { %1389 = vmatmul.mubr.f32.gmra.mxu1 %v363_v18  ;;  %1640 = vmatprep.subr.mxu0 %v2516_v2  ;;  %v457_v18 = vld [vmem:[%s2791_s10 + $0x8c0] sm:$0xff] }
  0xab   : > { %1393 = vmatprep.mubr.f32.mxu1 %v372_v19  ;;  %1641 = vmatpush2.msra.mxu0 %v777_v20  ;;  %v466_v19 = vld [vmem:[%s2791_s10 + $0x908] sm:$0xff]  ;;  %v459_v20 = vld [vmem:[%s2791_s10 + $0x8d0] sm:$0xff] }
  0xac   : > { %1009 = vmatmul.mubr.f32.gmra.mxu0 %v369_v21  ;;  %2025 = vmatprep.subr.mxu1 %v2516_v2  ;;  %v468_v21 = vld [vmem:[%s2791_s10 + $0x918] sm:$0xff] }
  0xad   : > { %1013 = vmatprep.mubr.f32.mxu0 %v378_v22  ;;  %2026 = vmatpush2.msra.mxu1 %v809_v23  ;;  %v465_v22 = vld [vmem:[%s2791_s10 + $0x900] sm:$0xff]  ;;  %v474_v23 = vld [vmem:[%s2791_s10 + $0x948] sm:$0xff] }
  0xae   : > { %1394 = vmatmul.mubr.f32.gmra.mxu1 %v371_v24  ;;  %1642 = vmatprep.subr.mxu0 %v2516_v2  ;;  %v467_v24 = vld [vmem:[%s2791_s10 + $0x910] sm:$0xff] }
  0xaf   : > { %1398 = vmatprep.mubr.f32.mxu1 %v380_v25  ;;  %1643 = vmatpush2.msra.mxu0 %v776_v26  ;;  %v476_v25 = vld [vmem:[%s2791_s10 + $0x958] sm:$0xff]  ;;  %v473_v26 = vld [vmem:[%s2791_s10 + $0x940] sm:$0xff] }
  0xb0   : > { %1014 = vmatmul.mubr.f32.gmra.mxu0 %v377_v27  ;;  %2027 = vmatprep.subr.mxu1 %v2516_v2  ;;  %v482_v27 = vld [vmem:[%s2791_s10 + $0x988] sm:$0xff] }
  0xb1   : > { %1018 = vmatprep.mubr.f32.mxu0 %v386_v28  ;;  %2028 = vmatpush2.msra.mxu1 %v808_v29  ;;  %v475_v28 = vld [vmem:[%s2791_s10 + $0x950] sm:$0xff]  ;;  %v484_v29 = vld [vmem:[%s2791_s10 + $0x998] sm:$0xff] }
  0xb2   : > { %1399 = vmatmul.mubr.f32.gmra.mxu1 %v379_v30  ;;  %1644 = vmatprep.subr.mxu0 %v2516_v2  ;;  %v481_v30 = vld [vmem:[%s2791_s10 + $0x980] sm:$0xff] }
  0xb3   : > { %1403 = vmatprep.mubr.f32.mxu1 %v388_v31  ;;  %1645 = vmatpush2.msra.mxu0 %v775_v32  ;;  %v490_v31 = vld [vmem:[%s2791_s10 + $0x9c8] sm:$0xff]  ;;  %v483_v32 = vld [vmem:[%s2791_s10 + $0x990] sm:$0xff] }
  0xb4   : > { %1019 = vmatmul.mubr.f32.gmra.mxu0 %v385_v33  ;;  %2029 = vmatprep.subr.mxu1 %v2516_v2  ;;  %v492_v33 = vld [vmem:[%s2791_s10 + $0x9d8] sm:$0xff] }
  0xb5   : > { %1023 = vmatprep.mubr.f32.mxu0 %v394_v34  ;;  %2030 = vmatpush2.msra.mxu1 %v807_v35  ;;  %v489_v34 = vld [vmem:[%s2791_s10 + $0x9c0] sm:$0xff]  ;;  %v498_v35 = vld [vmem:[%s2791_s10 + $0xa08] sm:$0xff] }
  0xb6   : > { %1404 = vmatmul.mubr.f32.gmra.mxu1 %v387_v36  ;;  %1646 = vmatprep.subr.mxu0 %v2516_v2  ;;  %v491_v36 = vld [vmem:[%s2791_s10 + $0x9d0] sm:$0xff] }
  0xb7   : > { %1408 = vmatprep.mubr.f32.mxu1 %v396_v37  ;;  %1647 = vmatpush2.msra.mxu0 %v774_v38  ;;  %v500_v37 = vld [vmem:[%s2791_s10 + $0xa18] sm:$0xff]  ;;  %v497_v38 = vld [vmem:[%s2791_s10 + $0xa00] sm:$0xff] }
  0xb8   : > { %1024 = vmatmul.mubr.f32.gmra.mxu0 %v393_v39  ;;  %2031 = vmatprep.subr.mxu1 %v2516_v2  ;;  %v506_v39 = vld [vmem:[%s2791_s10 + $0xa48] sm:$0xff] }
  0xb9   : > { %1028 = vmatprep.mubr.f32.mxu0 %v402_v40  ;;  %2032 = vmatpush2.msra.mxu1 %v806_v41  ;;  %v499_v40 = vld [vmem:[%s2791_s10 + $0xa10] sm:$0xff]  ;;  %v508_v41 = vld [vmem:[%s2791_s10 + $0xa58] sm:$0xff] }
  0xba   : > { %1409 = vmatmul.mubr.f32.gmra.mxu1 %v395_v42  ;;  %1648 = vmatprep.subr.mxu0 %v2516_v2  ;;  %v505_v42 = vld [vmem:[%s2791_s10 + $0xa40] sm:$0xff] }
  0xbb   : > { %1413 = vmatprep.mubr.f32.mxu1 %v404_v43  ;;  %1649 = vmatpush2.msra.mxu0 %v773_v44  ;;  %v514_v43 = vld [vmem:[%s2791_s10 + $0xa88] sm:$0xff]  ;;  %v507_v44 = vld [vmem:[%s2791_s10 + $0xa50] sm:$0xff] }
  0xbc   : > { %1029 = vmatmul.mubr.f32.gmra.mxu0 %v401_v45  ;;  %2033 = vmatprep.subr.mxu1 %v2516_v2  ;;  %v516_v45 = vld [vmem:[%s2791_s10 + $0xa98] sm:$0xff] }
  0xbd   : > { %1033 = vmatprep.mubr.f32.mxu0 %v410_v46  ;;  %2034 = vmatpush2.msra.mxu1 %v805_v47  ;;  %v513_v46 = vld [vmem:[%s2791_s10 + $0xa80] sm:$0xff]  ;;  %v522_v47 = vld [vmem:[%s2791_s10 + $0xac8] sm:$0xff] }
  0xbe   : > { %1414 = vmatmul.mubr.f32.gmra.mxu1 %v403_v48  ;;  %1650 = vmatprep.subr.mxu0 %v2516_v2  ;;  %v515_v48 = vld [vmem:[%s2791_s10 + $0xa90] sm:$0xff] }
  0xbf   : > { %1418 = vmatprep.mubr.f32.mxu1 %v412_v49  ;;  %1651 = vmatpush2.msra.mxu0 %v772_v50  ;;  %v524_v49 = vld [vmem:[%s2791_s10 + $0xad8] sm:$0xff]  ;;  %v521_v50 = vld [vmem:[%s2791_s10 + $0xac0] sm:$0xff] }
  0xc0   : > { %1034 = vmatmul.mubr.f32.gmra.mxu0 %v409_v51  ;;  %2035 = vmatprep.subr.mxu1 %v2516_v2  ;;  %v530_v51 = vld [vmem:[%s2791_s10 + $0xb08] sm:$0xff] }
  0xc1   : > { %1038 = vmatprep.mubr.f32.mxu0 %v418_v52  ;;  %2036 = vmatpush2.msra.mxu1 %v804_v53  ;;  %v523_v52 = vld [vmem:[%s2791_s10 + $0xad0] sm:$0xff]  ;;  %v532_v53 = vld [vmem:[%s2791_s10 + $0xb18] sm:$0xff] }
  0xc2   : > { %1419 = vmatmul.mubr.f32.gmra.mxu1 %v411_v54  ;;  %1652 = vmatprep.subr.mxu0 %v2516_v2  ;;  %v529_v54 = vld [vmem:[%s2791_s10 + $0xb00] sm:$0xff] }
  0xc3   : > { %1423 = vmatprep.mubr.f32.mxu1 %v420_v55  ;;  %1653 = vmatpush2.msra.mxu0 %v771_v56  ;;  %v538_v55 = vld [vmem:[%s2791_s10 + $0xb48] sm:$0xff]  ;;  %v531_v56 = vld [vmem:[%s2791_s10 + $0xb10] sm:$0xff] }
  0xc4   : > { %1039 = vmatmul.mubr.f32.gmra.mxu0 %v417_v57  ;;  %2037 = vmatprep.subr.mxu1 %v2516_v2  ;;  %v540_v57 = vld [vmem:[%s2791_s10 + $0xb58] sm:$0xff] }
  0xc5   : > { %1043 = vmatprep.mubr.f32.mxu0 %v426_v58  ;;  %2038 = vmatpush2.msra.mxu1 %v803_v59  ;;  %v537_v58 = vld [vmem:[%s2791_s10 + $0xb40] sm:$0xff]  ;;  %v546_v59 = vld [vmem:[%s2791_s10 + $0xb88] sm:$0xff] }
  0xc6   : > { %1424 = vmatmul.mubr.f32.gmra.mxu1 %v419_v60  ;;  %1654 = vmatprep.subr.mxu0 %v2516_v2  ;;  %v539_v60 = vld [vmem:[%s2791_s10 + $0xb50] sm:$0xff] }
  0xc7   : > { %1428 = vmatprep.mubr.f32.mxu1 %v428_v61  ;;  %1655 = vmatpush2.msra.mxu0 %v770_v62  ;;  %v548_v61 = vld [vmem:[%s2791_s10 + $0xb98] sm:$0xff]  ;;  %v545_v62 = vld [vmem:[%s2791_s10 + $0xb80] sm:$0xff] }
  0xc8   : > { %1044 = vmatmul.mubr.f32.gmra.mxu0 %v425_v63  ;;  %2039 = vmatprep.subr.mxu1 %v2516_v2  ;;  %v554_v63 = vld [vmem:[%s2791_s10 + $0xbc8] sm:$0xff] }
  0xc9   : > { %1048 = vmatprep.mubr.f32.mxu0 %v434_v0  ;;  %2040 = vmatpush2.msra.mxu1 %v802_v1  ;;  %v547_v0 = vld [vmem:[%s2791_s10 + $0xb90] sm:$0xff]  ;;  %v556_v1 = vld [vmem:[%s2791_s10 + $0xbd8] sm:$0xff] }
  0xca   : > { %1429 = vmatmul.mubr.f32.gmra.mxu1 %v427_v3  ;;  %1656 = vmatprep.subr.mxu0 %v2516_v2  ;;  %v553_v3 = vld [vmem:[%s2791_s10 + $0xbc0] sm:$0xff] }
  0xcb   : > { %1433 = vmatprep.mubr.f32.mxu1 %v436_v4  ;;  %1657 = vmatpush2.msra.mxu0 %v769_v5  ;;  %v562_v4 = vld [vmem:[%s2791_s10 + $0xc08] sm:$0xff]  ;;  %v555_v5 = vld [vmem:[%s2791_s10 + $0xbd0] sm:$0xff] }
  0xcc   : > { %1049 = vmatmul.mubr.f32.gmra.mxu0 %v433_v6  ;;  %2041 = vmatprep.subr.mxu1 %v2516_v2  ;;  %v451_v2 = vld [vmem:[%s2791_s10 + $0x890] sm:$0xff]  ;;  %v564_v6 = vld [vmem:[%s2791_s10 + $0xc18] sm:$0xff] }
  0xcd   : > { %1053 = vmatprep.mubr.f32.mxu0 %v442_v7  ;;  %2042 = vmatpush2.msra.mxu1 %v801_v8  ;;  %v561_v7 = vld [vmem:[%s2791_s10 + $0xc00] sm:$0xff] }
  0xce   : > { %1434 = vmatmul.mubr.f32.gmra.mxu1 %v435_v9  ;;  %v3265_v8 = vld [vmem:[%s3920_s2] ss:$0 sm:$0xff]  ;;  %v570_v9 = vld [vmem:[%s2791_s10 + $0xc48] sm:$0xff] }
  0xcf   : > { %1438 = vmatprep.mubr.f32.mxu1 %v444_v10  ;;  %v563_v10 = vld [vmem:[%s2791_s10 + $0xc10] sm:$0xff] }
  0xd0   : > { %1054 = vmatmul.mubr.f32.gmra.mxu0 %v441_v11 }
  0xd1   : > { %1058 = vmatprep.mubr.f32.mxu0 %v450_v12  ;;  %v572_v12 = vld [vmem:[%s2791_s10 + $0xc58] sm:$0xff] }
  0xd2   : > { %1439 = vmatmul.mubr.f32.gmra.mxu1 %v443_v13 }
  0xd3   : > { %1443 = vmatprep.mubr.f32.mxu1 %v452_v14  ;;  %v569_v14 = vld [vmem:[%s2791_s10 + $0xc40] sm:$0xff] }
  0xd4   : > { %1059 = vmatmul.mubr.f32.gmra.mxu0 %v449_v15 }
  0xd5   : > { %1063 = vmatprep.mubr.f32.mxu0 %v458_v16 }
  0xd6   : > { %1444 = vmatmul.mubr.f32.gmra.mxu1 %v451_v2  ;;  %v578_v2 = vld [vmem:[%s2791_s10 + $0xc88] sm:$0xff] }
  0xd7   : > { %1448 = vmatprep.mubr.f32.mxu1 %v460_v17 }
  0xd8   : > { %1064 = vmatmul.mubr.f32.gmra.mxu0 %v457_v18  ;;  %v571_v18 = vld [vmem:[%s2791_s10 + $0xc50] sm:$0xff] }
  0xd9   : > { %1068 = vmatprep.mubr.f32.mxu0 %v466_v19 }
  0xda   : > { %1449 = vmatmul.mubr.f32.gmra.mxu1 %v459_v20 }
  0xdb   : > { %1453 = vmatprep.mubr.f32.mxu1 %v468_v21  ;;  %v580_v21 = vld [vmem:[%s2791_s10 + $0xc98] sm:$0xff] }
  0xdc   : > { %1069 = vmatmul.mubr.f32.gmra.mxu0 %v465_v22 }
  0xdd   : > { %1073 = vmatprep.mubr.f32.mxu0 %v474_v23  ;;  %v577_v23 = vld [vmem:[%s2791_s10 + $0xc80] sm:$0xff] }
  0xde   : > { %1454 = vmatmul.mubr.f32.gmra.mxu1 %v467_v24 }
  0xdf   : > { %1458 = vmatprep.mubr.f32.mxu1 %v476_v25 }
  0xe0   : > { %1074 = vmatmul.mubr.f32.gmra.mxu0 %v473_v26  ;;  %v586_v26 = vld [vmem:[%s2791_s10 + $0xcc8] sm:$0xff] }
  0xe1   : > { %1078 = vmatprep.mubr.f32.mxu0 %v482_v27 }
  0xe2   : > { %1459 = vmatmul.mubr.f32.gmra.mxu1 %v475_v28  ;;  %v579_v28 = vld [vmem:[%s2791_s10 + $0xc90] sm:$0xff] }
  0xe3   : > { %1463 = vmatprep.mubr.f32.mxu1 %v484_v29 }
  0xe4   : > { %1079 = vmatmul.mubr.f32.gmra.mxu0 %v481_v30 }
  0xe5   : > { %1083 = vmatprep.mubr.f32.mxu0 %v490_v31  ;;  %v588_v31 = vld [vmem:[%s2791_s10 + $0xcd8] sm:$0xff] }
  0xe6   : > { %1464 = vmatmul.mubr.f32.gmra.mxu1 %v483_v32 }
  0xe7   : > { %1468 = vmatprep.mubr.f32.mxu1 %v492_v33  ;;  %v585_v33 = vld [vmem:[%s2791_s10 + $0xcc0] sm:$0xff] }
  0xe8   : > { %1084 = vmatmul.mubr.f32.gmra.mxu0 %v489_v34 }
  0xe9   : > { %1088 = vmatprep.mubr.f32.mxu0 %v498_v35 }
  0xea   : > { %1469 = vmatmul.mubr.f32.gmra.mxu1 %v491_v36  ;;  %v594_v36 = vld [vmem:[%s2791_s10 + $0xd08] sm:$0xff] }
  0xeb   : > { %1473 = vmatprep.mubr.f32.mxu1 %v500_v37 }
  0xec   : > { %1089 = vmatmul.mubr.f32.gmra.mxu0 %v497_v38  ;;  %v587_v38 = vld [vmem:[%s2791_s10 + $0xcd0] sm:$0xff] }
  0xed   : > { %1093 = vmatprep.mubr.f32.mxu0 %v506_v39 }
  0xee   : > { %1474 = vmatmul.mubr.f32.gmra.mxu1 %v499_v40 }
  0xef   : > { %1478 = vmatprep.mubr.f32.mxu1 %v508_v41  ;;  %v596_v41 = vld [vmem:[%s2791_s10 + $0xd18] sm:$0xff] }
  0xf0   : > { %1094 = vmatmul.mubr.f32.gmra.mxu0 %v505_v42 }
  0xf1   : > { %1098 = vmatprep.mubr.f32.mxu0 %v514_v43  ;;  %v593_v43 = vld [vmem:[%s2791_s10 + $0xd00] sm:$0xff] }
  0xf2   : > { %1479 = vmatmul.mubr.f32.gmra.mxu1 %v507_v44 }
  0xf3   : > { %1483 = vmatprep.mubr.f32.mxu1 %v516_v45 }
  0xf4   : > { %1099 = vmatmul.mubr.f32.gmra.mxu0 %v513_v46  ;;  %v602_v46 = vld [vmem:[%s2791_s10 + $0xd48] sm:$0xff] }
  0xf5   : > { %1103 = vmatprep.mubr.f32.mxu0 %v522_v47 }
  0xf6   : > { %1484 = vmatmul.mubr.f32.gmra.mxu1 %v515_v48  ;;  %v595_v48 = vld [vmem:[%s2791_s10 + $0xd10] sm:$0xff] }
  0xf7   : > { %1488 = vmatprep.mubr.f32.mxu1 %v524_v49 }
  0xf8   : > { %1104 = vmatmul.mubr.f32.gmra.mxu0 %v521_v50 }
  0xf9   : > { %1108 = vmatprep.mubr.f32.mxu0 %v530_v51  ;;  %v604_v51 = vld [vmem:[%s2791_s10 + $0xd58] sm:$0xff] }
  0xfa   : > { %1489 = vmatmul.mubr.f32.gmra.mxu1 %v523_v52 }
  0xfb   : > { %1493 = vmatprep.mubr.f32.mxu1 %v532_v53  ;;  %v601_v53 = vld [vmem:[%s2791_s10 + $0xd40] sm:$0xff] }
  0xfc   : > { %1109 = vmatmul.mubr.f32.gmra.mxu0 %v529_v54 }
  0xfd   : > { %1113 = vmatprep.mubr.f32.mxu0 %v538_v55 }
  0xfe   : > { %1494 = vmatmul.mubr.f32.gmra.mxu1 %v531_v56  ;;  %v610_v56 = vld [vmem:[%s2791_s10 + $0xd88] sm:$0xff] }
  0xff   : > { %1498 = vmatprep.mubr.f32.mxu1 %v540_v57 }
 0x100   : > { %1114 = vmatmul.mubr.f32.gmra.mxu0 %v537_v58  ;;  %v603_v58 = vld [vmem:[%s2791_s10 + $0xd50] sm:$0xff] }
 0x101   : > { %1118 = vmatprep.mubr.f32.mxu0 %v546_v59 }
 0x102   : > { %1499 = vmatmul.mubr.f32.gmra.mxu1 %v539_v60 }
 0x103   : > { %1503 = vmatprep.mubr.f32.mxu1 %v548_v61  ;;  %v612_v61 = vld [vmem:[%s2791_s10 + $0xd98] sm:$0xff] }
 0x104   : > { %1119 = vmatmul.mubr.f32.gmra.mxu0 %v545_v62 }
 0x105   : > { %1123 = vmatprep.mubr.f32.mxu0 %v554_v63  ;;  %v609_v63 = vld [vmem:[%s2791_s10 + $0xd80] sm:$0xff] }
 0x106   : > { %1504 = vmatmul.mubr.f32.gmra.mxu1 %v547_v0 }
 0x107   : > { %1508 = vmatprep.mubr.f32.mxu1 %v556_v1 }
 0x108   : > { %1124 = vmatmul.mubr.f32.gmra.mxu0 %v553_v3  ;;  %v618_v3 = vld [vmem:[%s2791_s10 + $0xdc8] sm:$0xff] }
 0x109   : > { %1128 = vmatprep.mubr.f32.mxu0 %v562_v4 }
 0x10a   : > { %1509 = vmatmul.mubr.f32.gmra.mxu1 %v555_v5  ;;  %v611_v5 = vld [vmem:[%s2791_s10 + $0xd90] sm:$0xff] }
 0x10b   : > { %1513 = vmatprep.mubr.f32.mxu1 %v564_v6 }
 0x10c   : > { %v890_v11 = vpop.f32.mrf.mxu0  ;;  %1129 = vmatmul.mubr.f32.gmra.mxu0 %v561_v7 }
 0x10d   : > { %v891_v13 = vadd.f32 %v3265_v8, %v890_v11  ;;  %1133 = vmatprep.mubr.f32.mxu0 %v570_v9  ;;  %v620_v9 = vld [vmem:[%s2791_s10 + $0xdd8] sm:$0xff]  ;;  %v617_v11 = vld [vmem:[%s2791_s10 + $0xdc0] sm:$0xff] }
 0x10e   : > { %v1275_v15 = vpop.f32.mrf.mxu1  ;;  %1514 = vmatmul.mubr.f32.gmra.mxu1 %v563_v10  ;;  %v892_v16 = vpop.f32.mrf.mxu0 }
 0x10f   : > { %v3273_v17 = vadd.f32 %v1275_v15, %v891_v13  ;;  %1518 = vmatprep.mubr.f32.mxu1 %v572_v12  ;;  %v619_v16 = vld [vmem:[%s2791_s10 + $0xdd0] sm:$0xff] }
 0x110   : > { %v1277_v19 = vpop.f32.mrf.mxu1  ;;  %v895_v20 = vpop.f32.mrf.mxu0  ;;  %1134 = vmatmul.mubr.f32.gmra.mxu0 %v569_v14  ;;  %v626_v14 = vld [vmem:[%s2791_s10 + $0xe08] sm:$0xff] }
 0x111   : > { %v896_v22 = vadd.f32 %v3265_v8, %v895_v20  ;;  %1138 = vmatprep.mubr.f32.mxu0 %v578_v2  ;;  %v628_v19 = vld [vmem:[%s2791_s10 + $0xe18] sm:$0xff] }
 0x112   : > { %v1280_v24 = vpop.f32.mrf.mxu1  ;;  %1519 = vmatmul.mubr.f32.gmra.mxu1 %v571_v18  ;;  %v897_v25 = vpop.f32.mrf.mxu0 }
 0x113   : > { %v3280_v27 = vadd.f32 %v1280_v24, %v896_v22  ;;  %1523 = vmatprep.mubr.f32.mxu1 %v580_v21  ;;  %v625_v21 = vld [vmem:[%s2791_s10 + $0xe00] sm:$0xff]  ;;  %v634_v24 = vld [vmem:[%s2791_s10 + $0xe48] sm:$0xff] }
 0x114   : > { %v1282_v29 = vpop.f32.mrf.mxu1  ;;  %v900_v30 = vpop.f32.mrf.mxu0  ;;  %1139 = vmatmul.mubr.f32.gmra.mxu0 %v577_v23 }
 0x115   : > { %v901_v32 = vadd.f32 %v3265_v8, %v900_v30  ;;  %1143 = vmatprep.mubr.f32.mxu0 %v586_v26  ;;  %v627_v26 = vld [vmem:[%s2791_s10 + $0xe10] sm:$0xff]  ;;  %v636_v30 = vld [vmem:[%s2791_s10 + $0xe58] sm:$0xff] }
 0x116   : > { %v1285_v34 = vpop.f32.mrf.mxu1  ;;  %1524 = vmatmul.mubr.f32.gmra.mxu1 %v579_v28  ;;  %v902_v35 = vpop.f32.mrf.mxu0 }
 0x117   : > { %v3287_v37 = vadd.f32 %v1285_v34, %v901_v32  ;;  %1528 = vmatprep.mubr.f32.mxu1 %v588_v31  ;;  %v633_v32 = vld [vmem:[%s2791_s10 + $0xe40] sm:$0xff]  ;;  %v642_v35 = vld [vmem:[%s2791_s10 + $0xe88] sm:$0xff] }
 0x118   : > { %v1287_v39 = vpop.f32.mrf.mxu1  ;;  %v905_v40 = vpop.f32.mrf.mxu0  ;;  %1144 = vmatmul.mubr.f32.gmra.mxu0 %v585_v33 }
 0x119   : > { %v906_v42 = vadd.f32 %v3265_v8, %v905_v40  ;;  %1148 = vmatprep.mubr.f32.mxu0 %v594_v36 }
 0x11a   : > { %v1290_v44 = vpop.f32.mrf.mxu1  ;;  %1529 = vmatmul.mubr.f32.gmra.mxu1 %v587_v38  ;;  %v907_v45 = vpop.f32.mrf.mxu0  ;;  %v635_v38 = vld [vmem:[%s2791_s10 + $0xe50] sm:$0xff] }
 0x11b   : > { %v3294_v47 = vadd.f32 %v1290_v44, %v906_v42  ;;  %1533 = vmatprep.mubr.f32.mxu1 %v596_v41  ;;  %v644_v41 = vld [vmem:[%s2791_s10 + $0xe98] sm:$0xff] }
 0x11c   : > { %v1292_v49 = vpop.f32.mrf.mxu1  ;;  %v910_v50 = vpop.f32.mrf.mxu0  ;;  %1149 = vmatmul.mubr.f32.gmra.mxu0 %v593_v43  ;;  %v641_v43 = vld [vmem:[%s2791_s10 + $0xe80] sm:$0xff] }
 0x11d   : > { %v911_v52 = vadd.f32 %v3265_v8, %v910_v50  ;;  %1153 = vmatprep.mubr.f32.mxu0 %v602_v46  ;;  %v650_v46 = vld [vmem:[%s2791_s10 + $0xec8] sm:$0xff]  ;;  %v643_v49 = vld [vmem:[%s2791_s10 + $0xe90] sm:$0xff] }
 0x11e   : > { %v1295_v54 = vpop.f32.mrf.mxu1  ;;  %1534 = vmatmul.mubr.f32.gmra.mxu1 %v595_v48  ;;  %v912_v55 = vpop.f32.mrf.mxu0 }
 0x11f   : > { %v3301_v57 = vadd.f32 %v1295_v54, %v911_v52  ;;  %1538 = vmatprep.mubr.f32.mxu1 %v604_v51  ;;  %v652_v52 = vld [vmem:[%s2791_s10 + $0xed8] sm:$0xff]  ;;  %v649_v54 = vld [vmem:[%s2791_s10 + $0xec0] sm:$0xff] }
 0x120   : > { %v1297_v59 = vpop.f32.mrf.mxu1  ;;  %v915_v60 = vpop.f32.mrf.mxu0  ;;  %1154 = vmatmul.mubr.f32.gmra.mxu0 %v601_v53 }
 0x121   : > { %v916_v62 = vadd.f32 %v3265_v8, %v915_v60  ;;  %1158 = vmatprep.mubr.f32.mxu0 %v610_v56  ;;  %v651_v60 = vld [vmem:[%s2791_s10 + $0xed0] sm:$0xff] }
 0x122   : > { %v1300_v0 = vpop.f32.mrf.mxu1  ;;  %1539 = vmatmul.mubr.f32.gmra.mxu1 %v603_v58  ;;  %v917_v1 = vpop.f32.mrf.mxu0  ;;  %v658_v58 = vld [vmem:[%s2791_s10 + $0xf08] sm:$0xff] }
 0x123   : > { %v3308_v4 = vadd.f32 %v1300_v0, %v916_v62  ;;  %1543 = vmatprep.mubr.f32.mxu1 %v612_v61  ;;  %v657_v1 = vld [vmem:[%s2791_s10 + $0xf00] sm:$0xff] }
 0x124   : > { %v1302_v6 = vpop.f32.mrf.mxu1  ;;  %v920_v7 = vpop.f32.mrf.mxu0  ;;  %1159 = vmatmul.mubr.f32.gmra.mxu0 %v609_v63  ;;  %v660_v63 = vld [vmem:[%s2791_s10 + $0xf18] sm:$0xff] }
 0x125   : > { %v921_v10 = vadd.f32 %v3265_v8, %v920_v7  ;;  %1163 = vmatprep.mubr.f32.mxu0 %v618_v3  ;;  %v666_v6 = vld [vmem:[%s2791_s10 + $0xf48] sm:$0xff] }
 0x126   : > { %v1305_v12 = vpop.f32.mrf.mxu1  ;;  %1544 = vmatmul.mubr.f32.gmra.mxu1 %v611_v5  ;;  %v922_v13 = vpop.f32.mrf.mxu0 }
 0x127   : > { %v3315_v15 = vadd.f32 %v1305_v12, %v921_v10  ;;  %1548 = vmatprep.mubr.f32.mxu1 %v620_v9  ;;  %v659_v9 = vld [vmem:[%s2791_s10 + $0xf10] sm:$0xff]  ;;  %v668_v12 = vld [vmem:[%s2791_s10 + $0xf58] sm:$0xff] }
 0x128   : > { %v1307_v2 = vpop.f32.mrf.mxu1  ;;  %v925_v18 = vpop.f32.mrf.mxu0  ;;  %1164 = vmatmul.mubr.f32.gmra.mxu0 %v617_v11 }
 0x129   : > { %v926_v20 = vadd.f32 %v3265_v8, %v925_v18  ;;  %1168 = vmatprep.mubr.f32.mxu0 %v626_v14  ;;  %v665_v14 = vld [vmem:[%s2791_s10 + $0xf40] sm:$0xff]  ;;  %v674_v18 = vld [vmem:[%s2791_s10 + $0xf88] sm:$0xff] }
 0x12a   : > { %v1310_v22 = vpop.f32.mrf.mxu1  ;;  %1549 = vmatmul.mubr.f32.gmra.mxu1 %v619_v16  ;;  %v927_v23 = vpop.f32.mrf.mxu0 }
 0x12b   : > { %v3322_v25 = vadd.f32 %v1310_v22, %v926_v20  ;;  %1553 = vmatprep.mubr.f32.mxu1 %v628_v19  ;;  %v667_v20 = vld [vmem:[%s2791_s10 + $0xf50] sm:$0xff]  ;;  %v676_v23 = vld [vmem:[%s2791_s10 + $0xf98] sm:$0xff] }
 0x12c   : > { %v1312_v28 = vpop.f32.mrf.mxu1  ;;  %v930_v29 = vpop.f32.mrf.mxu0  ;;  %1169 = vmatmul.mubr.f32.gmra.mxu0 %v625_v21 }
 0x12d   : > { %v931_v31 = vadd.f32 %v3265_v8, %v930_v29  ;;  %1173 = vmatprep.mubr.f32.mxu0 %v634_v24 }
 0x12e   : > { %v1315_v33 = vpop.f32.mrf.mxu1  ;;  %1554 = vmatmul.mubr.f32.gmra.mxu1 %v627_v26  ;;  %v932_v34 = vpop.f32.mrf.mxu0  ;;  %v673_v26 = vld [vmem:[%s2791_s10 + $0xf80] sm:$0xff] }
 0x12f   : > { %v3329_v36 = vadd.f32 %v1315_v33, %v931_v31  ;;  %1558 = vmatprep.mubr.f32.mxu1 %v636_v30  ;;  %v682_v30 = vld [vmem:[%s2791_s10 + $0xfc8] sm:$0xff] }
 0x130   : > { %v1317_v39 = vpop.f32.mrf.mxu1  ;;  %v935_v40 = vpop.f32.mrf.mxu0  ;;  %1174 = vmatmul.mubr.f32.gmra.mxu0 %v633_v32  ;;  %v675_v32 = vld [vmem:[%s2791_s10 + $0xf90] sm:$0xff] }
 0x131   : > { %v936_v42 = vadd.f32 %v3265_v8, %v935_v40  ;;  %1178 = vmatprep.mubr.f32.mxu0 %v642_v35  ;;  %v684_v35 = vld [vmem:[%s2791_s10 + $0xfd8] sm:$0xff]  ;;  %v681_v39 = vld [vmem:[%s2791_s10 + $0xfc0] sm:$0xff] }
 0x132   : > { %v1320_v44 = vpop.f32.mrf.mxu1  ;;  %1559 = vmatmul.mubr.f32.gmra.mxu1 %v635_v38  ;;  %v937_v45 = vpop.f32.mrf.mxu0 }
 0x133   : > { %v3336_v48 = vadd.f32 %v1320_v44, %v936_v42  ;;  %1563 = vmatprep.mubr.f32.mxu1 %v644_v41  ;;  %v182_v42 = vld [vmem:[%s2791_s10 + $0x28] sm:$0xff]  ;;  %v683_v44 = vld [vmem:[%s2791_s10 + $0xfd0] sm:$0xff] }
 0x134   : > { %v1322_v50 = vpop.f32.mrf.mxu1  ;;  %v940_v51 = vpop.f32.mrf.mxu0  ;;  %1179 = vmatmul.mubr.f32.gmra.mxu0 %v641_v43 }
 0x135   : > { %v941_v53 = vadd.f32 %v3265_v8, %v940_v51  ;;  %1183 = vmatprep.mubr.f32.mxu0 %v650_v46  ;;  %v181_v51 = vld [vmem:[%s2791_s10 + $0x20] sm:$0xff] }
 0x136   : > { %v1325_v55 = vpop.f32.mrf.mxu1  ;;  %1564 = vmatmul.mubr.f32.gmra.mxu1 %v643_v49  ;;  %v942_v56 = vpop.f32.mrf.mxu0  ;;  %v184_v49 = vld [vmem:[%s2791_s10 + $0x38] sm:$0xff] }
 0x137   : > { %v3343_v59 = vadd.f32 %v1325_v55, %v941_v53  ;;  %1568 = vmatprep.mubr.f32.mxu1 %v652_v52  ;;  %v183_v56 = vld [vmem:[%s2791_s10 + $0x30] sm:$0xff] }
 0x138   : > { %v1327_v61 = vpop.f32.mrf.mxu1  ;;  %v945_v62 = vpop.f32.mrf.mxu0  ;;  %1184 = vmatmul.mubr.f32.gmra.mxu0 %v649_v54  ;;  %v190_v54 = vld [vmem:[%s2791_s10 + $0x68] sm:$0xff] }
 0x139   : > { %v946_v0 = vadd.f32 %v3265_v8, %v945_v62  ;;  %1188 = vmatprep.mubr.f32.mxu0 %v658_v58  ;;  %v192_v61 = vld [vmem:[%s2791_s10 + $0x78] sm:$0xff] }
 0x13a   : > { %v1330_v3 = vpop.f32.mrf.mxu1  ;;  %1569 = vmatmul.mubr.f32.gmra.mxu1 %v651_v60  ;;  %v947_v5 = vpop.f32.mrf.mxu0 }
 0x13b   : > { %v3350_v7 = vadd.f32 %v1330_v3, %v946_v0  ;;  %1573 = vmatprep.mubr.f32.mxu1 %v660_v63  ;;  %v189_v63 = vld [vmem:[%s2791_s10 + $0x60] sm:$0xff]  ;;  %v198_v3 = vld [vmem:[%s2791_s10 + $0xa8] sm:$0xff] }
 0x13c   : > { %v1332_v10 = vpop.f32.mrf.mxu1  ;;  %v950_v11 = vpop.f32.mrf.mxu0  ;;  %1189 = vmatmul.mubr.f32.gmra.mxu0 %v657_v1 }
 0x13d   : > { %v951_v13 = vadd.f32 %v3265_v8, %v950_v11  ;;  %1193 = vmatprep.mubr.f32.mxu0 %v666_v6  ;;  %v191_v6 = vld [vmem:[%s2791_s10 + $0x70] sm:$0xff]  ;;  %v200_v11 = vld [vmem:[%s2791_s10 + $0xb8] sm:$0xff] }
 0x13e   : > { %v1335_v16 = vpop.f32.mrf.mxu1  ;;  %1574 = vmatmul.mubr.f32.gmra.mxu1 %v659_v9  ;;  %v952_v2 = vpop.f32.mrf.mxu0 }
 0x13f   : > { %v3357_v19 = vadd.f32 %v1335_v16, %v951_v13  ;;  %1578 = vmatprep.mubr.f32.mxu1 %v668_v12  ;;  %v197_v13 = vld [vmem:[%s2791_s10 + $0xa0] sm:$0xff]  ;;  %v206_v2 = vld [vmem:[%s2791_s10 + $0xe8] sm:$0xff] }
 0x140   : > { %v1337_v21 = vpop.f32.mrf.mxu1  ;;  %v955_v22 = vpop.f32.mrf.mxu0  ;;  %1194 = vmatmul.mubr.f32.gmra.mxu0 %v665_v14 }
 0x141   : > { %v956_v24 = vadd.f32 %v3265_v8, %v955_v22  ;;  %1198 = vmatprep.mubr.f32.mxu0 %v674_v18 }
 0x142   : > { %v1340_v28 = vpop.f32.mrf.mxu1  ;;  %1579 = vmatmul.mubr.f32.gmra.mxu1 %v667_v20  ;;  %v957_v29 = vpop.f32.mrf.mxu0  ;;  %v199_v20 = vld [vmem:[%s2791_s10 + $0xb0] sm:$0xff] }
 0x143   : > { %v3364_v31 = vadd.f32 %v1340_v28, %v956_v24  ;;  %1583 = vmatprep.mubr.f32.mxu1 %v676_v23  ;;  %v208_v23 = vld [vmem:[%s2791_s10 + $0xf8] sm:$0xff] }
 0x144   : > { %v1342_v33 = vpop.f32.mrf.mxu1  ;;  %v960_v34 = vpop.f32.mrf.mxu0  ;;  %1199 = vmatmul.mubr.f32.gmra.mxu0 %v673_v26  ;;  %v205_v26 = vld [vmem:[%s2791_s10 + $0xe0] sm:$0xff] }
 0x145   : > { %v961_v38 = vadd.f32 %v3265_v8, %v960_v34  ;;  %1203 = vmatprep.mubr.f32.mxu0 %v682_v30  ;;  %v214_v30 = vld [vmem:[%s2791_s10 + $0x128] sm:$0xff]  ;;  %v207_v33 = vld [vmem:[%s2791_s10 + $0xf0] sm:$0xff] }
 0x146   : > { %v1345_v40 = vpop.f32.mrf.mxu1  ;;  %1584 = vmatmul.mubr.f32.gmra.mxu1 %v675_v32  ;;  %v962_v41 = vpop.f32.mrf.mxu0 }
 0x147   : > { %v3371_v43 = vadd.f32 %v1345_v40, %v961_v38  ;;  %1588 = vmatprep.mubr.f32.mxu1 %v684_v35  ;;  %v216_v38 = vld [vmem:[%s2791_s10 + $0x138] sm:$0xff]  ;;  %v213_v40 = vld [vmem:[%s2791_s10 + $0x120] sm:$0xff] }
 0x148   : > { %v1347_v45 = vpop.f32.mrf.mxu1  ;;  %v965_v46 = vpop.f32.mrf.mxu0  ;;  %1204 = vmatmul.mubr.f32.gmra.mxu0 %v681_v39 }
 0x149   : > { %v966_v50 = vadd.f32 %v3265_v8, %v965_v46  ;;  %1658 = vmatprep.mubr.f32.mxu0 %v182_v42  ;;  %v215_v46 = vld [vmem:[%s2791_s10 + $0x130] sm:$0xff] }
 0x14a   : > { %v1350_v52 = vpop.f32.mrf.mxu1  ;;  %1589 = vmatmul.mubr.f32.gmra.mxu1 %v683_v44  ;;  %v967_v53 = vpop.f32.mrf.mxu0  ;;  %v222_v44 = vld [vmem:[%s2791_s10 + $0x168] sm:$0xff] }
 0x14b   : > { %v3378_v55 = vadd.f32 %v1350_v52, %v966_v50  ;;  %2043 = vmatprep.mubr.f32.mxu1 %v184_v49  ;;  %v221_v53 = vld [vmem:[%s2791_s10 + $0x160] sm:$0xff] }
 0x14c   : > { %v1352_v58 = vpop.f32.mrf.mxu1  ;;  %v970_v60 = vpop.f32.mrf.mxu0  ;;  %1659 = vmatmul.mubr.f32.vlgmr.msra.gmra.mxu0 %v181_v51  ;;  %v224_v51 = vld [vmem:[%s2791_s10 + $0x178] sm:$0xff] }
 0x14d   : > { %v971_v62 = vadd.f32 %v3265_v8, %v970_v60  ;;  %1663 = vmatprep.mubr.f32.mxu0 %v190_v54  ;;  %v230_v58 = vld [vmem:[%s2791_s10 + $0x1a8] sm:$0xff] }
 0x14e   : > { %v1355_v0 = vpop.f32.mrf.mxu1  ;;  %2044 = vmatmul.mubr.f32.vlgmr.msra.gmra.mxu1 %v183_v56  ;;  %v972_v1 = vpop.f32.mrf.mxu0 }
 0x14f   : > { %v3385_v5 = vadd.f32 %v1355_v0, %v971_v62  ;;  %2048 = vmatprep.mubr.f32.mxu1 %v192_v61  ;;  %v223_v61 = vld [vmem:[%s2791_s10 + $0x170] sm:$0xff]  ;;  %v232_v0 = vld [vmem:[%s2791_s10 + $0x1b8] sm:$0xff] }
 0x150   : > { %v1357_v9 = vpop.f32.mrf.mxu1  ;;  %v975_v10 = vpop.f32.mrf.mxu0  ;;  %1664 = vmatmul.mubr.f32.gmra.mxu0 %v189_v63 }
 0x151   : > { %v976_v12 = vadd.f32 %v3265_v8, %v975_v10  ;;  %1668 = vmatprep.mubr.f32.mxu0 %v198_v3  ;;  %v229_v3 = vld [vmem:[%s2791_s10 + $0x1a0] sm:$0xff]  ;;  %v238_v10 = vld [vmem:[%s2791_s10 + $0x1e8] sm:$0xff] }
 0x152   : > { %v1360_v14 = vpop.f32.mrf.mxu1  ;;  %2049 = vmatmul.mubr.f32.gmra.mxu1 %v191_v6  ;;  %v977_v16 = vpop.f32.mrf.mxu0 }
 0x153   : > { %v3392_v18 = vadd.f32 %v1360_v14, %v976_v12  ;;  %2053 = vmatprep.mubr.f32.mxu1 %v200_v11  ;;  %v231_v12 = vld [vmem:[%s2791_s10 + $0x1b0] sm:$0xff]  ;;  %v240_v16 = vld [vmem:[%s2791_s10 + $0x1f8] sm:$0xff] }
 0x154   : > { %v1362_v21 = vpop.f32.mrf.mxu1  ;;  %v980_v22 = vpop.f32.mrf.mxu0  ;;  %1669 = vmatmul.mubr.f32.gmra.mxu0 %v197_v13 }
 0x155   : > { %v981_v24 = vadd.f32 %v3265_v8, %v980_v22  ;;  %1673 = vmatprep.mubr.f32.mxu0 %v206_v2 }
 0x156   : > { %v1365_v28 = vpop.f32.mrf.mxu1  ;;  %2054 = vmatmul.mubr.f32.gmra.mxu1 %v199_v20  ;;  %v982_v29 = vpop.f32.mrf.mxu0  ;;  %v237_v20 = vld [vmem:[%s2791_s10 + $0x1e0] sm:$0xff] }
 0x157   : > { %v3399_v32 = vadd.f32 %v1365_v28, %v981_v24  ;;  %2058 = vmatprep.mubr.f32.mxu1 %v208_v23  ;;  %v246_v23 = vld [vmem:[%s2791_s10 + $0x228] sm:$0xff] }
 0x158   : > { %v1367_v34 = vpop.f32.mrf.mxu1  ;;  %v985_v35 = vpop.f32.mrf.mxu0  ;;  %1674 = vmatmul.mubr.f32.gmra.mxu0 %v205_v26  ;;  %v239_v26 = vld [vmem:[%s2791_s10 + $0x1f0] sm:$0xff] }
 0x159   : > { %v986_v39 = vadd.f32 %v3265_v8, %v985_v35  ;;  %1678 = vmatprep.mubr.f32.mxu0 %v214_v30  ;;  %v248_v30 = vld [vmem:[%s2791_s10 + $0x238] sm:$0xff]  ;;  %v245_v34 = vld [vmem:[%s2791_s10 + $0x220] sm:$0xff] }
 0x15a   : > { %v1370_v41 = vpop.f32.mrf.mxu1  ;;  %2059 = vmatmul.mubr.f32.gmra.mxu1 %v207_v33  ;;  %v987_v42 = vpop.f32.mrf.mxu0 }
 0x15b   : > { %v3406_v45 = vadd.f32 %v1370_v41, %v986_v39  ;;  %2063 = vmatprep.mubr.f32.mxu1 %v216_v38  ;;  %v254_v39 = vld [vmem:[%s2791_s10 + $0x268] sm:$0xff]  ;;  %v247_v41 = vld [vmem:[%s2791_s10 + $0x230] sm:$0xff] }
 0x15c   : > { %v1372_v49 = vpop.f32.mrf.mxu1  ;;  %v990_v50 = vpop.f32.mrf.mxu0  ;;  %1679 = vmatmul.mubr.f32.gmra.mxu0 %v213_v40 }
 0x15d   : > { %v991_v52 = vadd.f32 %v3265_v8, %v990_v50  ;;  %1683 = vmatprep.mubr.f32.mxu0 %v222_v44  ;;  %v253_v50 = vld [vmem:[%s2791_s10 + $0x260] sm:$0xff] }
 0x15e   : > { %v1375_v54 = vpop.f32.mrf.mxu1  ;;  %2064 = vmatmul.mubr.f32.gmra.mxu1 %v215_v46  ;;  %v992_v56 = vpop.f32.mrf.mxu0  ;;  %v256_v46 = vld [vmem:[%s2791_s10 + $0x278] sm:$0xff] }
 0x15f   : > { %v3413_v60 = vadd.f32 %v1375_v54, %v991_v52  ;;  %2068 = vmatprep.mubr.f32.mxu1 %v224_v51  ;;  %v255_v56 = vld [vmem:[%s2791_s10 + $0x270] sm:$0xff] }
 0x160   : > { %v1377_v62 = vpop.f32.mrf.mxu1  ;;  %v995_v63 = vpop.f32.mrf.mxu0  ;;  %1684 = vmatmul.mubr.f32.gmra.mxu0 %v221_v53  ;;  %v262_v53 = vld [vmem:[%s2791_s10 + $0x2a8] sm:$0xff] }
 0x161   : > { %v996_v1 = vadd.f32 %v3265_v8, %v995_v63  ;;  %1688 = vmatprep.mubr.f32.mxu0 %v230_v58  ;;  %v264_v62 = vld [vmem:[%s2791_s10 + $0x2b8] sm:$0xff] }
 0x162   : > { %v1380_v6 = vpop.f32.mrf.mxu1  ;;  %2069 = vmatmul.mubr.f32.gmra.mxu1 %v223_v61  ;;  %v997_v9 = vpop.f32.mrf.mxu0 }
 0x163   : > { %v3420_v11 = vadd.f32 %v1380_v6, %v996_v1  ;;  %2073 = vmatprep.mubr.f32.mxu1 %v232_v0  ;;  %v261_v0 = vld [vmem:[%s2791_s10 + $0x2a0] sm:$0xff]  ;;  %v270_v6 = vld [vmem:[%s2791_s10 + $0x2e8] sm:$0xff] }
 0x164   : > { %v1382_v13 = vpop.f32.mrf.mxu1  ;;  %v1000_v14 = vpop.f32.mrf.mxu0  ;;  %1689 = vmatmul.mubr.f32.gmra.mxu0 %v229_v3 }
 0x165   : > { %v1001_v2 = vadd.f32 %v3265_v8, %v1000_v14  ;;  %1693 = vmatprep.mubr.f32.mxu0 %v238_v10  ;;  %v263_v10 = vld [vmem:[%s2791_s10 + $0x2b0] sm:$0xff]  ;;  %v272_v14 = vld [vmem:[%s2791_s10 + $0x2f8] sm:$0xff] }
 0x166   : > { %v1385_v21 = vpop.f32.mrf.mxu1  ;;  %2074 = vmatmul.mubr.f32.gmra.mxu1 %v231_v12  ;;  %v1002_v22 = vpop.f32.mrf.mxu0 }
 0x167   : > { %v3427_v24 = vadd.f32 %v1385_v21, %v1001_v2  ;;  %2078 = vmatprep.mubr.f32.mxu1 %v240_v16  ;;  %v269_v2 = vld [vmem:[%s2791_s10 + $0x2e0] sm:$0xff]  ;;  %v278_v22 = vld [vmem:[%s2791_s10 + $0x328] sm:$0xff] }
 0x168   : > { %v1387_v28 = vpop.f32.mrf.mxu1  ;;  %v1005_v29 = vpop.f32.mrf.mxu0  ;;  %1694 = vmatmul.mubr.f32.gmra.mxu0 %v237_v20 }
 0x169   : > { %v1006_v33 = vadd.f32 %v3265_v8, %v1005_v29  ;;  %1698 = vmatprep.mubr.f32.mxu0 %v246_v23 }
 0x16a   : > { %v1390_v35 = vpop.f32.mrf.mxu1  ;;  %2079 = vmatmul.mubr.f32.gmra.mxu1 %v239_v26  ;;  %v1007_v38 = vpop.f32.mrf.mxu0  ;;  %v271_v26 = vld [vmem:[%s2791_s10 + $0x2f0] sm:$0xff] }
 0x16b   : > { %v3434_v40 = vadd.f32 %v1390_v35, %v1006_v33  ;;  %2083 = vmatprep.mubr.f32.mxu1 %v248_v30  ;;  %v280_v30 = vld [vmem:[%s2791_s10 + $0x338] sm:$0xff] }
 0x16c   : > { %v1392_v42 = vpop.f32.mrf.mxu1  ;;  %v1010_v44 = vpop.f32.mrf.mxu0  ;;  %1699 = vmatmul.mubr.f32.gmra.mxu0 %v245_v34  ;;  %v277_v34 = vld [vmem:[%s2791_s10 + $0x320] sm:$0xff] }
 0x16d   : > { %v1011_v49 = vadd.f32 %v3265_v8, %v1010_v44  ;;  %1703 = vmatprep.mubr.f32.mxu0 %v254_v39  ;;  %v286_v39 = vld [vmem:[%s2791_s10 + $0x368] sm:$0xff]  ;;  %v279_v42 = vld [vmem:[%s2791_s10 + $0x330] sm:$0xff] }
 0x16e   : > { %v1395_v51 = vpop.f32.mrf.mxu1  ;;  %2084 = vmatmul.mubr.f32.gmra.mxu1 %v247_v41  ;;  %v1012_v52 = vpop.f32.mrf.mxu0 }
 0x16f   : > { %v3441_v54 = vadd.f32 %v1395_v51, %v1011_v49  ;;  %2088 = vmatprep.mubr.f32.mxu1 %v256_v46  ;;  %v288_v49 = vld [vmem:[%s2791_s10 + $0x378] sm:$0xff]  ;;  %v285_v51 = vld [vmem:[%s2791_s10 + $0x360] sm:$0xff] }
 0x170   : > { %v1397_v58 = vpop.f32.mrf.mxu1  ;;  %v1015_v61 = vpop.f32.mrf.mxu0  ;;  %1704 = vmatmul.mubr.f32.gmra.mxu0 %v253_v50 }
 0x171   : > { %v1016_v63 = vadd.f32 %v3265_v8, %v1015_v61  ;;  %1708 = vmatprep.mubr.f32.mxu0 %v262_v53  ;;  %v287_v61 = vld [vmem:[%s2791_s10 + $0x370] sm:$0xff] }
 0x172   : > { %v1400_v1 = vpop.f32.mrf.mxu1  ;;  %2089 = vmatmul.mubr.f32.gmra.mxu1 %v255_v56  ;;  %v1017_v3 = vpop.f32.mrf.mxu0  ;;  %v294_v56 = vld [vmem:[%s2791_s10 + $0x3a8] sm:$0xff] }
 0x173   : > { %v3448_v9 = vadd.f32 %v1400_v1, %v1016_v63  ;;  %2093 = vmatprep.mubr.f32.mxu1 %v264_v62  ;;  %v293_v3 = vld [vmem:[%s2791_s10 + $0x3a0] sm:$0xff] }
 0x174   : > { %v1402_v12 = vpop.f32.mrf.mxu1  ;;  %v1020_v13 = vpop.f32.mrf.mxu0  ;;  %1709 = vmatmul.mubr.f32.gmra.mxu0 %v261_v0  ;;  %v296_v0 = vld [vmem:[%s2791_s10 + $0x3b8] sm:$0xff] }
 0x175   : > { %v1021_v16 = vadd.f32 %v3265_v8, %v1020_v13  ;;  %1713 = vmatprep.mubr.f32.mxu0 %v270_v6  ;;  %v302_v12 = vld [vmem:[%s2791_s10 + $0x3e8] sm:$0xff] }
 0x176   : > { %v1405_v20 = vpop.f32.mrf.mxu1  ;;  %2094 = vmatmul.mubr.f32.gmra.mxu1 %v263_v10  ;;  %v1022_v21 = vpop.f32.mrf.mxu0 }
 0x177   : > { %v3455_v23 = vadd.f32 %v1405_v20, %v1021_v16  ;;  %2098 = vmatprep.mubr.f32.mxu1 %v272_v14  ;;  %v295_v14 = vld [vmem:[%s2791_s10 + $0x3b0] sm:$0xff]  ;;  %v304_v20 = vld [vmem:[%s2791_s10 + $0x3f8] sm:$0xff] }
 0x178   : > { %v1407_v28 = vpop.f32.mrf.mxu1  ;;  %v1025_v29 = vpop.f32.mrf.mxu0  ;;  %1714 = vmatmul.mubr.f32.gmra.mxu0 %v269_v2 }
 0x179   : > { %v1026_v33 = vadd.f32 %v3265_v8, %v1025_v29  ;;  %1718 = vmatprep.mubr.f32.mxu0 %v278_v22  ;;  %v301_v22 = vld [vmem:[%s2791_s10 + $0x3e0] sm:$0xff]  ;;  %v310_v29 = vld [vmem:[%s2791_s10 + $0x428] sm:$0xff] }
 0x17a   : > { %v1410_v35 = vpop.f32.mrf.mxu1  ;;  %2099 = vmatmul.mubr.f32.gmra.mxu1 %v271_v26  ;;  %v1027_v38 = vpop.f32.mrf.mxu0 }
 0x17b   : > { %v3462_v41 = vadd.f32 %v1410_v35, %v1026_v33  ;;  %2103 = vmatprep.mubr.f32.mxu1 %v280_v30  ;;  %v303_v33 = vld [vmem:[%s2791_s10 + $0x3f0] sm:$0xff]  ;;  %v312_v38 = vld [vmem:[%s2791_s10 + $0x438] sm:$0xff] }
 0x17c   : > { %v1412_v44 = vpop.f32.mrf.mxu1  ;;  %v1030_v46 = vpop.f32.mrf.mxu0  ;;  %1719 = vmatmul.mubr.f32.gmra.mxu0 %v277_v34 }
 0x17d   : > { %v1031_v50 = vadd.f32 %v3265_v8, %v1030_v46  ;;  %1723 = vmatprep.mubr.f32.mxu0 %v286_v39 }
 0x17e   : > { %v1415_v52 = vpop.f32.mrf.mxu1  ;;  %2104 = vmatmul.mubr.f32.gmra.mxu1 %v279_v42  ;;  %v1032_v53 = vpop.f32.mrf.mxu0  ;;  %v309_v42 = vld [vmem:[%s2791_s10 + $0x420] sm:$0xff] }
 0x17f   : > { %v3469_v58 = vadd.f32 %v1415_v52, %v1031_v50  ;;  %2108 = vmatprep.mubr.f32.mxu1 %v288_v49  ;;  %v318_v49 = vld [vmem:[%s2791_s10 + $0x468] sm:$0xff] }
 0x180   : > { %v1417_v62 = vpop.f32.mrf.mxu1  ;;  %v1035_v63 = vpop.f32.mrf.mxu0  ;;  %1724 = vmatmul.mubr.f32.gmra.mxu0 %v285_v51  ;;  %v311_v51 = vld [vmem:[%s2791_s10 + $0x430] sm:$0xff] }
 0x181   : > { %v1036_v1 = vadd.f32 %v3265_v8, %v1035_v63  ;;  %1728 = vmatprep.mubr.f32.mxu0 %v294_v56  ;;  %v320_v56 = vld [vmem:[%s2791_s10 + $0x478] sm:$0xff]  ;;  %v317_v62 = vld [vmem:[%s2791_s10 + $0x460] sm:$0xff] }
 0x182   : > { %v1420_v6 = vpop.f32.mrf.mxu1  ;;  %2109 = vmatmul.mubr.f32.gmra.mxu1 %v287_v61  ;;  %v1037_v10 = vpop.f32.mrf.mxu0 }
 0x183   : > { %v3476_v13 = vadd.f32 %v1420_v6, %v1036_v1  ;;  %2113 = vmatprep.mubr.f32.mxu1 %v296_v0  ;;  %v326_v1 = vld [vmem:[%s2791_s10 + $0x4a8] sm:$0xff]  ;;  %v319_v6 = vld [vmem:[%s2791_s10 + $0x470] sm:$0xff] }
 0x184   : > { %v1422_v16 = vpop.f32.mrf.mxu1  ;;  %v1040_v2 = vpop.f32.mrf.mxu0  ;;  %1729 = vmatmul.mubr.f32.gmra.mxu0 %v293_v3 }
 0x185   : > { %v1041_v21 = vadd.f32 %v3265_v8, %v1040_v2  ;;  %1733 = vmatprep.mubr.f32.mxu0 %v302_v12  ;;  %v325_v2 = vld [vmem:[%s2791_s10 + $0x4a0] sm:$0xff] }
 0x186   : > { %v1425_v26 = vpop.f32.mrf.mxu1  ;;  %2114 = vmatmul.mubr.f32.gmra.mxu1 %v295_v14  ;;  %v1042_v28 = vpop.f32.mrf.mxu0  ;;  %v328_v14 = vld [vmem:[%s2791_s10 + $0x4b8] sm:$0xff] }
 0x187   : > { %v3483_v30 = vadd.f32 %v1425_v26, %v1041_v21  ;;  %2118 = vmatprep.mubr.f32.mxu1 %v304_v20  ;;  %v327_v28 = vld [vmem:[%s2791_s10 + $0x4b0] sm:$0xff] }
 0x188   : > { %v1427_v34 = vpop.f32.mrf.mxu1  ;;  %v1045_v35 = vpop.f32.mrf.mxu0  ;;  %1734 = vmatmul.mubr.f32.gmra.mxu0 %v301_v22  ;;  %v334_v22 = vld [vmem:[%s2791_s10 + $0x4e8] sm:$0xff] }
 0x189   : > { %v1046_v39 = vadd.f32 %v3265_v8, %v1045_v35  ;;  %1738 = vmatprep.mubr.f32.mxu0 %v310_v29  ;;  %v336_v34 = vld [vmem:[%s2791_s10 + $0x4f8] sm:$0xff] }
 0x18a   : > { %v1430_v44 = vpop.f32.mrf.mxu1  ;;  %2119 = vmatmul.mubr.f32.gmra.mxu1 %v303_v33  ;;  %v1047_v46 = vpop.f32.mrf.mxu0 }
 0x18b   : > { %v3490_v50 = vadd.f32 %v1430_v44, %v1046_v39  ;;  %2123 = vmatprep.mubr.f32.mxu1 %v312_v38  ;;  %v333_v38 = vld [vmem:[%s2791_s10 + $0x4e0] sm:$0xff]  ;;  %v342_v44 = vld [vmem:[%s2791_s10 + $0x528] sm:$0xff] }
 0x18c   : > { %v1432_v52 = vpop.f32.mrf.mxu1  ;;  %v1050_v53 = vpop.f32.mrf.mxu0  ;;  %1739 = vmatmul.mubr.f32.gmra.mxu0 %v309_v42 }
 0x18d   : > { %v1051_v61 = vadd.f32 %v3265_v8, %v1050_v53  ;;  %1743 = vmatprep.mubr.f32.mxu0 %v318_v49  ;;  %v335_v49 = vld [vmem:[%s2791_s10 + $0x4f0] sm:$0xff]  ;;  %v344_v53 = vld [vmem:[%s2791_s10 + $0x538] sm:$0xff] }
 0x18e   : > { %v1435_v63 = vpop.f32.mrf.mxu1  ;;  %2124 = vmatmul.mubr.f32.gmra.mxu1 %v311_v51  ;;  %v1052_v0 = vpop.f32.mrf.mxu0 }
 0x18f   : > { %v3497_v3 = vadd.f32 %v1435_v63, %v1051_v61  ;;  %2128 = vmatprep.mubr.f32.mxu1 %v320_v56  ;;  %v341_v61 = vld [vmem:[%s2791_s10 + $0x520] sm:$0xff]  ;;  %v350_v0 = vld [vmem:[%s2791_s10 + $0x568] sm:$0xff] }
 0x190   : > { %v1437_v10 = vpop.f32.mrf.mxu1  ;;  %v1055_v12 = vpop.f32.mrf.mxu0  ;;  %1744 = vmatmul.mubr.f32.gmra.mxu0 %v317_v62 }
 0x191   : > { %v1056_v16 = vadd.f32 %v3265_v8, %v1055_v12  ;;  %1748 = vmatprep.mubr.f32.mxu0 %v326_v1 }
 0x192   : > { %v1440_v20 = vpop.f32.mrf.mxu1  ;;  %2129 = vmatmul.mubr.f32.gmra.mxu1 %v319_v6  ;;  %v1057_v21 = vpop.f32.mrf.mxu0  ;;  %v343_v6 = vld [vmem:[%s2791_s10 + $0x530] sm:$0xff] }
 0x193   : > { %v3504_v26 = vadd.f32 %v1440_v20, %v1056_v16  ;;  %2133 = vmatprep.mubr.f32.mxu1 %v328_v14  ;;  %v352_v14 = vld [vmem:[%s2791_s10 + $0x578] sm:$0xff] }
 0x194   : > { %v1442_v29 = vpop.f32.mrf.mxu1  ;;  %v1060_v33 = vpop.f32.mrf.mxu0  ;;  %1749 = vmatmul.mubr.f32.gmra.mxu0 %v325_v2  ;;  %v349_v2 = vld [vmem:[%s2791_s10 + $0x560] sm:$0xff] }
 0x195   : > { %v1061_v35 = vadd.f32 %v3265_v8, %v1060_v33  ;;  %1753 = vmatprep.mubr.f32.mxu0 %v334_v22  ;;  %v358_v22 = vld [vmem:[%s2791_s10 + $0x5a8] sm:$0xff]  ;;  %v351_v29 = vld [vmem:[%s2791_s10 + $0x570] sm:$0xff] }
 0x196   : > { %v1445_v39 = vpop.f32.mrf.mxu1  ;;  %2134 = vmatmul.mubr.f32.gmra.mxu1 %v327_v28  ;;  %v1062_v42 = vpop.f32.mrf.mxu0 }
 0x197   : > { %v3511_v46 = vadd.f32 %v1445_v39, %v1061_v35  ;;  %2138 = vmatprep.mubr.f32.mxu1 %v336_v34  ;;  %v360_v35 = vld [vmem:[%s2791_s10 + $0x5b8] sm:$0xff]  ;;  %v357_v39 = vld [vmem:[%s2791_s10 + $0x5a0] sm:$0xff] }
 0x198   : > { %v1447_v51 = vpop.f32.mrf.mxu1  ;;  %v1065_v52 = vpop.f32.mrf.mxu0  ;;  %1754 = vmatmul.mubr.f32.gmra.mxu0 %v333_v38 }
 0x199   : > { %v1066_v56 = vadd.f32 %v3265_v8, %v1065_v52  ;;  %1758 = vmatprep.mubr.f32.mxu0 %v342_v44  ;;  %v359_v52 = vld [vmem:[%s2791_s10 + $0x5b0] sm:$0xff] }
 0x19a   : > { %v1450_v62 = vpop.f32.mrf.mxu1  ;;  %2139 = vmatmul.mubr.f32.gmra.mxu1 %v335_v49  ;;  %v1067_v63 = vpop.f32.mrf.mxu0  ;;  %v366_v49 = vld [vmem:[%s2791_s10 + $0x5e8] sm:$0xff] }
 0x19b   : > { %v3518_v1 = vadd.f32 %v1450_v62, %v1066_v56  ;;  %2143 = vmatprep.mubr.f32.mxu1 %v344_v53  ;;  %v365_v63 = vld [vmem:[%s2791_s10 + $0x5e0] sm:$0xff] }
 0x19c   : > { %v1452_v10 = vpop.f32.mrf.mxu1  ;;  %v1070_v12 = vpop.f32.mrf.mxu0  ;;  %1759 = vmatmul.mubr.f32.gmra.mxu0 %v341_v61  ;;  %v368_v61 = vld [vmem:[%s2791_s10 + $0x5f8] sm:$0xff] }
 0x19d   : > { %v1071_v16 = vadd.f32 %v3265_v8, %v1070_v12  ;;  %1763 = vmatprep.mubr.f32.mxu0 %v350_v0  ;;  %v3532_v8 = vld [vmem:[%s3920_s2] ss:$0 sm:$0xff]  ;;  %v374_v10 = vld [vmem:[%s2791_s10 + $0x628] sm:$0xff] }
 0x19e   : > { %v1455_v20 = vpop.f32.mrf.mxu1  ;;  %2144 = vmatmul.mubr.f32.gmra.mxu1 %v343_v6  ;;  %v1072_v21 = vpop.f32.mrf.mxu0 }
 0x19f   : > { %v3525_v28 = vadd.f32 %v1455_v20, %v1071_v16  ;;  %2148 = vmatprep.mubr.f32.mxu1 %v352_v14  ;;  %v367_v14 = vld [vmem:[%s2791_s10 + $0x5f0] sm:$0xff]  ;;  %v376_v20 = vld [vmem:[%s2791_s10 + $0x638] sm:$0xff] }
 0x1a0   : > { %v1457_v33 = vpop.f32.mrf.mxu1  ;;  %v1075_v34 = vpop.f32.mrf.mxu0  ;;  %1764 = vmatmul.mubr.f32.gmra.mxu0 %v349_v2 }
 0x1a1   : > { %v1076_v38 = vadd.f32 %v3532_v8, %v1075_v34  ;;  %1768 = vmatprep.mubr.f32.mxu0 %v358_v22  ;;  %v373_v22 = vld [vmem:[%s2791_s10 + $0x620] sm:$0xff]  ;;  %v382_v34 = vld [vmem:[%s2791_s10 + $0x668] sm:$0xff] }
 0x1a2   : > { %v1460_v42 = vpop.f32.mrf.mxu1  ;;  %2149 = vmatmul.mubr.f32.gmra.mxu1 %v351_v29  ;;  %v1077_v44 = vpop.f32.mrf.mxu0 }
 0x1a3   : > { %v3537_v51 = vadd.f32 %v1460_v42, %v1076_v38  ;;  %2153 = vmatprep.mubr.f32.mxu1 %v360_v35  ;;  %v375_v38 = vld [vmem:[%s2791_s10 + $0x630] sm:$0xff]  ;;  %v384_v44 = vld [vmem:[%s2791_s10 + $0x678] sm:$0xff] }
 0x1a4   : > { %v1462_v53 = vpop.f32.mrf.mxu1  ;;  %v1080_v56 = vpop.f32.mrf.mxu0  ;;  %1769 = vmatmul.mubr.f32.gmra.mxu0 %v357_v39 }
 0x1a5   : > { %v1081_v62 = vadd.f32 %v3532_v8, %v1080_v56  ;;  %1773 = vmatprep.mubr.f32.mxu0 %v366_v49 }
 0x1a6   : > { %v1465_v0 = vpop.f32.mrf.mxu1  ;;  %2154 = vmatmul.mubr.f32.gmra.mxu1 %v359_v52  ;;  %v1082_v6 = vpop.f32.mrf.mxu0  ;;  %v381_v52 = vld [vmem:[%s2791_s10 + $0x660] sm:$0xff] }
 0x1a7   : > { %v3544_v12 = vadd.f32 %v1465_v0, %v1081_v62  ;;  %2158 = vmatprep.mubr.f32.mxu1 %v368_v61  ;;  %v390_v61 = vld [vmem:[%s2791_s10 + $0x6a8] sm:$0xff] }
 0x1a8   : > { %v1467_v16 = vpop.f32.mrf.mxu1  ;;  %v1085_v2 = vpop.f32.mrf.mxu0  ;;  %1774 = vmatmul.mubr.f32.gmra.mxu0 %v365_v63  ;;  %v383_v63 = vld [vmem:[%s2791_s10 + $0x670] sm:$0xff] }
 0x1a9   : > { %v1086_v21 = vadd.f32 %v3532_v8, %v1085_v2  ;;  %1778 = vmatprep.mubr.f32.mxu0 %v374_v10  ;;  %v392_v10 = vld [vmem:[%s2791_s10 + $0x6b8] sm:$0xff]  ;;  %v389_v16 = vld [vmem:[%s2791_s10 + $0x6a0] sm:$0xff] }
 0x1aa   : > { %v1470_v29 = vpop.f32.mrf.mxu1  ;;  %2159 = vmatmul.mubr.f32.gmra.mxu1 %v367_v14  ;;  %v1087_v33 = vpop.f32.mrf.mxu0 }
 0x1ab   : > { %v3551_v35 = vadd.f32 %v1470_v29, %v1086_v21  ;;  %2163 = vmatprep.mubr.f32.mxu1 %v376_v20  ;;  %v398_v21 = vld [vmem:[%s2791_s10 + $0x6e8] sm:$0xff]  ;;  %v391_v29 = vld [vmem:[%s2791_s10 + $0x6b0] sm:$0xff] }
 0x1ac   : > { %v1472_v39 = vpop.f32.mrf.mxu1  ;;  %v1090_v42 = vpop.f32.mrf.mxu0  ;;  %1779 = vmatmul.mubr.f32.gmra.mxu0 %v373_v22 }
 0x1ad   : > { %v1091_v49 = vadd.f32 %v3532_v8, %v1090_v42  ;;  %1783 = vmatprep.mubr.f32.mxu0 %v382_v34  ;;  %v397_v42 = vld [vmem:[%s2791_s10 + $0x6e0] sm:$0xff] }
 0x1ae   : > { %v1475_v53 = vpop.f32.mrf.mxu1  ;;  %2164 = vmatmul.mubr.f32.gmra.mxu1 %v375_v38  ;;  %v1092_v56 = vpop.f32.mrf.mxu0  ;;  %v400_v38 = vld [vmem:[%s2791_s10 + $0x6f8] sm:$0xff] }
 0x1af   : > { %v3558_v62 = vadd.f32 %v1475_v53, %v1091_v49  ;;  %2168 = vmatprep.mubr.f32.mxu1 %v384_v44  ;;  %v399_v56 = vld [vmem:[%s2791_s10 + $0x6f0] sm:$0xff] }
 0x1b0   : > { %v1477_v0 = vpop.f32.mrf.mxu1  ;;  %v1095_v6 = vpop.f32.mrf.mxu0  ;;  %1784 = vmatmul.mubr.f32.gmra.mxu0 %v381_v52  ;;  %v406_v52 = vld [vmem:[%s2791_s10 + $0x728] sm:$0xff] }
 0x1b1   : > { %v1096_v14 = vadd.f32 %v3532_v8, %v1095_v6  ;;  %1788 = vmatprep.mubr.f32.mxu0 %v390_v61  ;;  %v408_v0 = vld [vmem:[%s2791_s10 + $0x738] sm:$0xff] }
 0x1b2   : > { %v1480_v2 = vpop.f32.mrf.mxu1  ;;  %2169 = vmatmul.mubr.f32.gmra.mxu1 %v383_v63  ;;  %v1097_v20 = vpop.f32.mrf.mxu0 }
 0x1b3   : > { %v3565_v22 = vadd.f32 %v1480_v2, %v1096_v14  ;;  %2173 = vmatprep.mubr.f32.mxu1 %v392_v10  ;;  %v405_v10 = vld [vmem:[%s2791_s10 + $0x720] sm:$0xff]  ;;  %v414_v2 = vld [vmem:[%s2791_s10 + $0x768] sm:$0xff] }
 0x1b4   : > { %v1482_v33 = vpop.f32.mrf.mxu1  ;;  %v1100_v34 = vpop.f32.mrf.mxu0  ;;  %1789 = vmatmul.mubr.f32.gmra.mxu0 %v389_v16 }
 0x1b5   : > { %v1101_v39 = vadd.f32 %v3532_v8, %v1100_v34  ;;  %1793 = vmatprep.mubr.f32.mxu0 %v398_v21  ;;  %v407_v21 = vld [vmem:[%s2791_s10 + $0x730] sm:$0xff]  ;;  %v416_v34 = vld [vmem:[%s2791_s10 + $0x778] sm:$0xff] }
 0x1b6   : > { %v1485_v44 = vpop.f32.mrf.mxu1  ;;  %2174 = vmatmul.mubr.f32.gmra.mxu1 %v391_v29  ;;  %v1102_v49 = vpop.f32.mrf.mxu0 }
 0x1b7   : > { %v3572_v53 = vadd.f32 %v1485_v44, %v1101_v39  ;;  %2178 = vmatprep.mubr.f32.mxu1 %v400_v38  ;;  %v413_v39 = vld [vmem:[%s2791_s10 + $0x760] sm:$0xff]  ;;  %v422_v49 = vld [vmem:[%s2791_s10 + $0x7a8] sm:$0xff] }
 0x1b8   : > { %v1487_v61 = vpop.f32.mrf.mxu1  ;;  %v1105_v63 = vpop.f32.mrf.mxu0  ;;  %1794 = vmatmul.mubr.f32.gmra.mxu0 %v397_v42 }
 0x1b9   : > { %v1106_v6 = vadd.f32 %v3532_v8, %v1105_v63  ;;  %1798 = vmatprep.mubr.f32.mxu0 %v406_v52 }
 0x1ba   : > { %v1490_v14 = vpop.f32.mrf.mxu1  ;;  %2179 = vmatmul.mubr.f32.gmra.mxu1 %v399_v56  ;;  %v1107_v16 = vpop.f32.mrf.mxu0  ;;  %v415_v56 = vld [vmem:[%s2791_s10 + $0x770] sm:$0xff] }
 0x1bb   : > { %v3579_v20 = vadd.f32 %v1490_v14, %v1106_v6  ;;  %2183 = vmatprep.mubr.f32.mxu1 %v408_v0  ;;  %v424_v0 = vld [vmem:[%s2791_s10 + $0x7b8] sm:$0xff] }
 0x1bc   : > { %v1492_v29 = vpop.f32.mrf.mxu1  ;;  %v1110_v33 = vpop.f32.mrf.mxu0  ;;  %1799 = vmatmul.mubr.f32.gmra.mxu0 %v405_v10  ;;  %v421_v10 = vld [vmem:[%s2791_s10 + $0x7a0] sm:$0xff] }
 0x1bd   : > { %v1111_v38 = vadd.f32 %v3532_v8, %v1110_v33  ;;  %1803 = vmatprep.mubr.f32.mxu0 %v414_v2  ;;  %v430_v2 = vld [vmem:[%s2791_s10 + $0x7e8] sm:$0xff]  ;;  %v423_v29 = vld [vmem:[%s2791_s10 + $0x7b0] sm:$0xff] }
 0x1be   : > { %v1495_v42 = vpop.f32.mrf.mxu1  ;;  %2184 = vmatmul.mubr.f32.gmra.mxu1 %v407_v21  ;;  %v1112_v44 = vpop.f32.mrf.mxu0 }
 0x1bf   : > { %v3586_v52 = vadd.f32 %v1495_v42, %v1111_v38  ;;  %2188 = vmatprep.mubr.f32.mxu1 %v416_v34  ;;  %v432_v38 = vld [vmem:[%s2791_s10 + $0x7f8] sm:$0xff]  ;;  %v429_v42 = vld [vmem:[%s2791_s10 + $0x7e0] sm:$0xff] }
 0x1c0   : > { %v1497_v61 = vpop.f32.mrf.mxu1  ;;  %v1115_v63 = vpop.f32.mrf.mxu0  ;;  %1804 = vmatmul.mubr.f32.gmra.mxu0 %v413_v39 }
 0x1c1   : > { %v1116_v6 = vadd.f32 %v3532_v8, %v1115_v63  ;;  %1808 = vmatprep.mubr.f32.mxu0 %v422_v49  ;;  %v431_v63 = vld [vmem:[%s2791_s10 + $0x7f0] sm:$0xff] }
 0x1c2   : > { %v1500_v14 = vpop.f32.mrf.mxu1  ;;  %2189 = vmatmul.mubr.f32.gmra.mxu1 %v415_v56  ;;  %v1117_v16 = vpop.f32.mrf.mxu0  ;;  %v438_v56 = vld [vmem:[%s2791_s10 + $0x828] sm:$0xff] }
 0x1c3   : > { %v3593_v21 = vadd.f32 %v1500_v14, %v1116_v6  ;;  %2193 = vmatprep.mubr.f32.mxu1 %v424_v0  ;;  %v437_v16 = vld [vmem:[%s2791_s10 + $0x820] sm:$0xff] }
 0x1c4   : > { %v1502_v33 = vpop.f32.mrf.mxu1  ;;  %v1120_v34 = vpop.f32.mrf.mxu0  ;;  %1809 = vmatmul.mubr.f32.gmra.mxu0 %v421_v10  ;;  %v440_v10 = vld [vmem:[%s2791_s10 + $0x838] sm:$0xff] }
 0x1c5   : > { %v1121_v39 = vadd.f32 %v3532_v8, %v1120_v34  ;;  %1813 = vmatprep.mubr.f32.mxu0 %v430_v2  ;;  %v446_v33 = vld [vmem:[%s2791_s10 + $0x868] sm:$0xff] }
 0x1c6   : > { %v1505_v44 = vpop.f32.mrf.mxu1  ;;  %2194 = vmatmul.mubr.f32.gmra.mxu1 %v423_v29  ;;  %v1122_v49 = vpop.f32.mrf.mxu0 }
 0x1c7   : > { %v3600_v61 = vadd.f32 %v1505_v44, %v1121_v39  ;;  %2198 = vmatprep.mubr.f32.mxu1 %v432_v38  ;;  %v439_v38 = vld [vmem:[%s2791_s10 + $0x830] sm:$0xff] }
 0x1c8   : > { %v1507_v0 = vpop.f32.mrf.mxu1  ;;  %v1125_v6 = vpop.f32.mrf.mxu0  ;;  %1814 = vmatmul.mubr.f32.gmra.mxu0 %v429_v42  ;;  %v448_v42 = vld [vmem:[%s2791_s10 + $0x878] sm:$0xff] }
 0x1c9   : > { %v1126_v14 = vadd.f32 %v3532_v8, %v1125_v6  ;;  %1818 = vmatprep.mubr.f32.mxu0 %v438_v56  ;;  %v445_v56 = vld [vmem:[%s2791_s10 + $0x860] sm:$0xff]  ;;  %v454_v6 = vld [vmem:[%s2791_s10 + $0x8a8] sm:$0xff] }
 0x1ca   : > { %v1510_v2 = vpop.f32.mrf.mxu1  ;;  %2199 = vmatmul.mubr.f32.gmra.mxu1 %v431_v63  ;;  %v1127_v29 = vpop.f32.mrf.mxu0 }
 0x1cb   : > { %v3607_v34 = vadd.f32 %v1510_v2, %v1126_v14  ;;  %2203 = vmatprep.mubr.f32.mxu1 %v440_v10  ;;  %v447_v10 = vld [vmem:[%s2791_s10 + $0x870] sm:$0xff] }
 0x1cc   : > { %v1512_v39 = vpop.f32.mrf.mxu1  ;;  %v1130_v44 = vpop.f32.mrf.mxu0  ;;  %1819 = vmatmul.mubr.f32.gmra.mxu0 %v437_v16  ;;  %v456_v16 = vld [vmem:[%s2791_s10 + $0x8b8] sm:$0xff] }
 0x1cd   : > { %v1131_v49 = vadd.f32 %v3532_v8, %v1130_v44  ;;  %1823 = vmatprep.mubr.f32.mxu0 %v446_v33  ;;  %v453_v33 = vld [vmem:[%s2791_s10 + $0x8a0] sm:$0xff] }
 0x1ce   : > { %v1515_v0 = vpop.f32.mrf.mxu1  ;;  %2204 = vmatmul.mubr.f32.gmra.mxu1 %v439_v38  ;;  %v1132_v63 = vpop.f32.mrf.mxu0 }
 0x1cf   : > { %v3614_v14 = vadd.f32 %v1515_v0, %v1131_v49  ;;  %2208 = vmatprep.mubr.f32.mxu1 %v448_v42  ;;  %v462_v63 = vld [vmem:[%s2791_s10 + $0x8e8] sm:$0xff]  ;;  %v455_v42 = vld [vmem:[%s2791_s10 + $0x8b0] sm:$0xff] }
 0x1d0   : > { %v1517_v2 = vpop.f32.mrf.mxu1  ;;  %v1135_v29 = vpop.f32.mrf.mxu0  ;;  %1824 = vmatmul.mubr.f32.gmra.mxu0 %v445_v56  ;;  %v464_v56 = vld [vmem:[%s2791_s10 + $0x8f8] sm:$0xff] }
 0x1d1   : > { %3922 = vst [vmem:[#allocation2_spill] sm:$0xff] %v3614_v14  ;;  %v1136_v39 = vadd.f32 %v3532_v8, %v1135_v29  ;;  %1828 = vmatprep.mubr.f32.mxu0 %v454_v6  ;;  %v461_v6 = vld [vmem:[%s2791_s10 + $0x8e0] sm:$0xff] }
 0x1d2   : > { %v1520_v44 = vpop.f32.mrf.mxu1  ;;  %2209 = vmatmul.mubr.f32.gmra.mxu1 %v447_v10  ;;  %v1137_v38 = vpop.f32.mrf.mxu0 }
 0x1d3   : > { %v3621_v49 = vadd.f32 %v1520_v44, %v1136_v39  ;;  %2213 = vmatprep.mubr.f32.mxu1 %v456_v16  ;;  %v470_v38 = vld [vmem:[%s2791_s10 + $0x928] sm:$0xff]  ;;  %v463_v16 = vld [vmem:[%s2791_s10 + $0x8f0] sm:$0xff] }
 0x1d4   : > { %v1522_v0 = vpop.f32.mrf.mxu1  ;;  %v1140_v2 = vpop.f32.mrf.mxu0  ;;  %1829 = vmatmul.mubr.f32.gmra.mxu0 %v453_v33  ;;  %v472_v33 = vld [vmem:[%s2791_s10 + $0x938] sm:$0xff] }
 0x1d5   : > { %3923 = vst [vmem:[#allocation3_spill] sm:$0xff] %v3621_v49  ;;  %v1141_v29 = vadd.f32 %v3532_v8, %v1140_v2  ;;  %1833 = vmatprep.mubr.f32.mxu0 %v462_v63  ;;  %v469_v63 = vld [vmem:[%s2791_s10 + $0x920] sm:$0xff] }
 0x1d6   : > { %v1525_v14 = vpop.f32.mrf.mxu1  ;;  %2214 = vmatmul.mubr.f32.gmra.mxu1 %v455_v42  ;;  %v1142_v10 = vpop.f32.mrf.mxu0 }
 0x1d7   : > { %v3628_v39 = vadd.f32 %v1525_v14, %v1141_v29  ;;  %2218 = vmatprep.mubr.f32.mxu1 %v464_v56  ;;  %v478_v10 = vld [vmem:[%s2791_s10 + $0x968] sm:$0xff]  ;;  %v471_v56 = vld [vmem:[%s2791_s10 + $0x930] sm:$0xff] }
 0x1d8   : > { %v1527_v44 = vpop.f32.mrf.mxu1  ;;  %v1145_v0 = vpop.f32.mrf.mxu0  ;;  %1834 = vmatmul.mubr.f32.gmra.mxu0 %v461_v6  ;;  %v480_v6 = vld [vmem:[%s2791_s10 + $0x978] sm:$0xff] }
 0x1d9   : > { %3924 = vst [vmem:[#allocation4_spill] sm:$0xff] %v3628_v39  ;;  %v1146_v2 = vadd.f32 %v3532_v8, %v1145_v0  ;;  %1838 = vmatprep.mubr.f32.mxu0 %v470_v38  ;;  %v477_v38 = vld [vmem:[%s2791_s10 + $0x960] sm:$0xff] }
 0x1da   : > { %v1530_v49 = vpop.f32.mrf.mxu1  ;;  %2219 = vmatmul.mubr.f32.gmra.mxu1 %v463_v16  ;;  %v1147_v42 = vpop.f32.mrf.mxu0 }
 0x1db   : > { %v3635_v14 = vadd.f32 %v1530_v49, %v1146_v2  ;;  %2223 = vmatprep.mubr.f32.mxu1 %v472_v33  ;;  %v486_v42 = vld [vmem:[%s2791_s10 + $0x9a8] sm:$0xff]  ;;  %v479_v33 = vld [vmem:[%s2791_s10 + $0x970] sm:$0xff] }
 0x1dc   : > { %v1532_v29 = vpop.f32.mrf.mxu1  ;;  %v1150_v44 = vpop.f32.mrf.mxu0  ;;  %1839 = vmatmul.mubr.f32.gmra.mxu0 %v469_v63  ;;  %v488_v63 = vld [vmem:[%s2791_s10 + $0x9b8] sm:$0xff] }
 0x1dd   : > { %3925 = vst [vmem:[#allocation5_spill] sm:$0xff] %v3635_v14  ;;  %v1151_v0 = vadd.f32 %v3532_v8, %v1150_v44  ;;  %1843 = vmatprep.mubr.f32.mxu0 %v478_v10  ;;  %v485_v10 = vld [vmem:[%s2791_s10 + $0x9a0] sm:$0xff] }
 0x1de   : > { %v1535_v39 = vpop.f32.mrf.mxu1  ;;  %2224 = vmatmul.mubr.f32.gmra.mxu1 %v471_v56  ;;  %v1152_v16 = vpop.f32.mrf.mxu0 }
 0x1df   : > { %v3642_v49 = vadd.f32 %v1535_v39, %v1151_v0  ;;  %2228 = vmatprep.mubr.f32.mxu1 %v480_v6  ;;  %v494_v16 = vld [vmem:[%s2791_s10 + $0x9e8] sm:$0xff]  ;;  %v487_v6 = vld [vmem:[%s2791_s10 + $0x9b0] sm:$0xff] }
 0x1e0   : > { %v1537_v2 = vpop.f32.mrf.mxu1  ;;  %v1155_v29 = vpop.f32.mrf.mxu0  ;;  %1844 = vmatmul.mubr.f32.gmra.mxu0 %v477_v38  ;;  %v496_v38 = vld [vmem:[%s2791_s10 + $0x9f8] sm:$0xff] }
 0x1e1   : > { %3926 = vst [vmem:[#allocation6_spill] sm:$0xff] %v3642_v49  ;;  %v1156_v44 = vadd.f32 %v3532_v8, %v1155_v29  ;;  %1848 = vmatprep.mubr.f32.mxu0 %v486_v42  ;;  %v493_v42 = vld [vmem:[%s2791_s10 + $0x9e0] sm:$0xff] }
 0x1e2   : > { %v1540_v14 = vpop.f32.mrf.mxu1  ;;  %2229 = vmatmul.mubr.f32.gmra.mxu1 %v479_v33  ;;  %v1157_v56 = vpop.f32.mrf.mxu0 }
 0x1e3   : > { %v3649_v39 = vadd.f32 %v1540_v14, %v1156_v44  ;;  %2233 = vmatprep.mubr.f32.mxu1 %v488_v63  ;;  %v502_v56 = vld [vmem:[%s2791_s10 + $0xa28] sm:$0xff]  ;;  %v495_v63 = vld [vmem:[%s2791_s10 + $0x9f0] sm:$0xff] }
 0x1e4   : > { %v1542_v0 = vpop.f32.mrf.mxu1  ;;  %v1160_v2 = vpop.f32.mrf.mxu0  ;;  %1849 = vmatmul.mubr.f32.gmra.mxu0 %v485_v10  ;;  %v504_v10 = vld [vmem:[%s2791_s10 + $0xa38] sm:$0xff] }
 0x1e5   : > { %3927 = vst [vmem:[#allocation7_spill] sm:$0xff] %v3649_v39  ;;  %v1161_v29 = vadd.f32 %v3532_v8, %v1160_v2  ;;  %1853 = vmatprep.mubr.f32.mxu0 %v494_v16  ;;  %v501_v16 = vld [vmem:[%s2791_s10 + $0xa20] sm:$0xff] }
 0x1e6   : > { %v1545_v49 = vpop.f32.mrf.mxu1  ;;  %2234 = vmatmul.mubr.f32.gmra.mxu1 %v487_v6  ;;  %v1162_v33 = vpop.f32.mrf.mxu0 }
 0x1e7   : > { %v3656_v14 = vadd.f32 %v1545_v49, %v1161_v29  ;;  %2238 = vmatprep.mubr.f32.mxu1 %v496_v38  ;;  %v510_v33 = vld [vmem:[%s2791_s10 + $0xa68] sm:$0xff]  ;;  %v503_v38 = vld [vmem:[%s2791_s10 + $0xa30] sm:$0xff] }
 0x1e8   : > { %v1547_v44 = vpop.f32.mrf.mxu1  ;;  %v1165_v0 = vpop.f32.mrf.mxu0  ;;  %1854 = vmatmul.mubr.f32.gmra.mxu0 %v493_v42  ;;  %v512_v42 = vld [vmem:[%s2791_s10 + $0xa78] sm:$0xff] }
 0x1e9   : > { %3928 = vst [vmem:[#allocation8_spill] sm:$0xff] %v3656_v14  ;;  %v1166_v2 = vadd.f32 %v3532_v8, %v1165_v0  ;;  %1858 = vmatprep.mubr.f32.mxu0 %v502_v56  ;;  %v509_v56 = vld [vmem:[%s2791_s10 + $0xa60] sm:$0xff] }
 0x1ea   : > { %v1550_v39 = vpop.f32.mrf.mxu1  ;;  %2239 = vmatmul.mubr.f32.gmra.mxu1 %v495_v63  ;;  %v1167_v6 = vpop.f32.mrf.mxu0 }
 0x1eb   : > { %v3663_v49 = vadd.f32 %v1550_v39, %v1166_v2  ;;  %2243 = vmatprep.mubr.f32.mxu1 %v504_v10  ;;  %v518_v6 = vld [vmem:[%s2791_s10 + $0xaa8] sm:$0xff]  ;;  %v511_v10 = vld [vmem:[%s2791_s10 + $0xa70] sm:$0xff] }
 0x1ec   : > { %v1552_v29 = vpop.f32.mrf.mxu1  ;;  %v1170_v44 = vpop.f32.mrf.mxu0  ;;  %1859 = vmatmul.mubr.f32.gmra.mxu0 %v501_v16  ;;  %v520_v16 = vld [vmem:[%s2791_s10 + $0xab8] sm:$0xff] }
 0x1ed   : > { %3929 = vst [vmem:[#allocation9_spill] sm:$0xff] %v3663_v49  ;;  %v1171_v0 = vadd.f32 %v3532_v8, %v1170_v44  ;;  %1863 = vmatprep.mubr.f32.mxu0 %v510_v33  ;;  %v517_v33 = vld [vmem:[%s2791_s10 + $0xaa0] sm:$0xff] }
 0x1ee   : > { %v1555_v14 = vpop.f32.mrf.mxu1  ;;  %2244 = vmatmul.mubr.f32.gmra.mxu1 %v503_v38  ;;  %v1172_v63 = vpop.f32.mrf.mxu0 }
 0x1ef   : > { %v3670_v39 = vadd.f32 %v1555_v14, %v1171_v0  ;;  %2248 = vmatprep.mubr.f32.mxu1 %v512_v42  ;;  %v526_v63 = vld [vmem:[%s2791_s10 + $0xae8] sm:$0xff]  ;;  %v519_v42 = vld [vmem:[%s2791_s10 + $0xab0] sm:$0xff] }
 0x1f0   : > { %v1557_v2 = vpop.f32.mrf.mxu1  ;;  %v1175_v29 = vpop.f32.mrf.mxu0  ;;  %1864 = vmatmul.mubr.f32.gmra.mxu0 %v509_v56  ;;  %v528_v56 = vld [vmem:[%s2791_s10 + $0xaf8] sm:$0xff] }
 0x1f1   : > { %3930 = vst [vmem:[#allocation10_spill] sm:$0xff] %v3670_v39  ;;  %v1176_v44 = vadd.f32 %v3532_v8, %v1175_v29  ;;  %1868 = vmatprep.mubr.f32.mxu0 %v518_v6  ;;  %v525_v6 = vld [vmem:[%s2791_s10 + $0xae0] sm:$0xff] }
 0x1f2   : > { %v1560_v49 = vpop.f32.mrf.mxu1  ;;  %2249 = vmatmul.mubr.f32.gmra.mxu1 %v511_v10  ;;  %v1177_v38 = vpop.f32.mrf.mxu0 }
 0x1f3   : > { %v3677_v14 = vadd.f32 %v1560_v49, %v1176_v44  ;;  %2253 = vmatprep.mubr.f32.mxu1 %v520_v16  ;;  %v534_v38 = vld [vmem:[%s2791_s10 + $0xb28] sm:$0xff]  ;;  %v527_v16 = vld [vmem:[%s2791_s10 + $0xaf0] sm:$0xff] }
 0x1f4   : > { %v1562_v0 = vpop.f32.mrf.mxu1  ;;  %v1180_v2 = vpop.f32.mrf.mxu0  ;;  %1869 = vmatmul.mubr.f32.gmra.mxu0 %v517_v33  ;;  %v536_v33 = vld [vmem:[%s2791_s10 + $0xb38] sm:$0xff] }
 0x1f5   : > { %3931 = vst [vmem:[#allocation11_spill] sm:$0xff] %v3677_v14  ;;  %v1181_v29 = vadd.f32 %v3532_v8, %v1180_v2  ;;  %1873 = vmatprep.mubr.f32.mxu0 %v526_v63  ;;  %v533_v63 = vld [vmem:[%s2791_s10 + $0xb20] sm:$0xff] }
 0x1f6   : > { %v1565_v39 = vpop.f32.mrf.mxu1  ;;  %2254 = vmatmul.mubr.f32.gmra.mxu1 %v519_v42  ;;  %v1182_v10 = vpop.f32.mrf.mxu0 }
 0x1f7   : > { %v3684_v49 = vadd.f32 %v1565_v39, %v1181_v29  ;;  %2258 = vmatprep.mubr.f32.mxu1 %v528_v56  ;;  %v542_v10 = vld [vmem:[%s2791_s10 + $0xb68] sm:$0xff]  ;;  %v535_v56 = vld [vmem:[%s2791_s10 + $0xb30] sm:$0xff] }
 0x1f8   : > { %v1567_v44 = vpop.f32.mrf.mxu1  ;;  %v1185_v0 = vpop.f32.mrf.mxu0  ;;  %1874 = vmatmul.mubr.f32.gmra.mxu0 %v525_v6  ;;  %v544_v6 = vld [vmem:[%s2791_s10 + $0xb78] sm:$0xff] }
 0x1f9   : > { %3932 = vst [vmem:[#allocation12_spill] sm:$0xff] %v3684_v49  ;;  %v1186_v2 = vadd.f32 %v3532_v8, %v1185_v0  ;;  %1878 = vmatprep.mubr.f32.mxu0 %v534_v38  ;;  %v541_v38 = vld [vmem:[%s2791_s10 + $0xb60] sm:$0xff] }
 0x1fa   : > { %v1570_v14 = vpop.f32.mrf.mxu1  ;;  %2259 = vmatmul.mubr.f32.gmra.mxu1 %v527_v16  ;;  %v1187_v42 = vpop.f32.mrf.mxu0 }
 0x1fb   : > { %v3691_v39 = vadd.f32 %v1570_v14, %v1186_v2  ;;  %2263 = vmatprep.mubr.f32.mxu1 %v536_v33  ;;  %v550_v42 = vld [vmem:[%s2791_s10 + $0xba8] sm:$0xff]  ;;  %v543_v33 = vld [vmem:[%s2791_s10 + $0xb70] sm:$0xff] }
 0x1fc   : > { %v1572_v29 = vpop.f32.mrf.mxu1  ;;  %v1190_v44 = vpop.f32.mrf.mxu0  ;;  %1879 = vmatmul.mubr.f32.gmra.mxu0 %v533_v63  ;;  %v552_v63 = vld [vmem:[%s2791_s10 + $0xbb8] sm:$0xff] }
 0x1fd   : > { %3933 = vst [vmem:[#allocation13_spill] sm:$0xff] %v3691_v39  ;;  %v1191_v0 = vadd.f32 %v3532_v8, %v1190_v44  ;;  %1883 = vmatprep.mubr.f32.mxu0 %v542_v10  ;;  %v549_v10 = vld [vmem:[%s2791_s10 + $0xba0] sm:$0xff] }
 0x1fe   : > { %v1575_v49 = vpop.f32.mrf.mxu1  ;;  %2264 = vmatmul.mubr.f32.gmra.mxu1 %v535_v56  ;;  %v1192_v16 = vpop.f32.mrf.mxu0 }
 0x1ff   : > { %v3698_v14 = vadd.f32 %v1575_v49, %v1191_v0  ;;  %2268 = vmatprep.mubr.f32.mxu1 %v544_v6  ;;  %v558_v16 = vld [vmem:[%s2791_s10 + $0xbe8] sm:$0xff]  ;;  %v551_v6 = vld [vmem:[%s2791_s10 + $0xbb0] sm:$0xff] }
 0x200   : > { %v1577_v2 = vpop.f32.mrf.mxu1  ;;  %v1195_v29 = vpop.f32.mrf.mxu0  ;;  %1884 = vmatmul.mubr.f32.gmra.mxu0 %v541_v38  ;;  %v560_v38 = vld [vmem:[%s2791_s10 + $0xbf8] sm:$0xff] }
 0x201   : > { %3934 = vst [vmem:[#allocation14_spill] sm:$0xff] %v3698_v14  ;;  %v1196_v44 = vadd.f32 %v3532_v8, %v1195_v29  ;;  %1888 = vmatprep.mubr.f32.mxu0 %v550_v42  ;;  %v557_v42 = vld [vmem:[%s2791_s10 + $0xbe0] sm:$0xff] }
 0x202   : > { %v1580_v39 = vpop.f32.mrf.mxu1  ;;  %2269 = vmatmul.mubr.f32.gmra.mxu1 %v543_v33  ;;  %v1197_v56 = vpop.f32.mrf.mxu0 }
 0x203   : > { %v3705_v49 = vadd.f32 %v1580_v39, %v1196_v44  ;;  %2273 = vmatprep.mubr.f32.mxu1 %v552_v63  ;;  %v566_v56 = vld [vmem:[%s2791_s10 + $0xc28] sm:$0xff]  ;;  %v559_v63 = vld [vmem:[%s2791_s10 + $0xbf0] sm:$0xff] }
 0x204   : > { %v1582_v0 = vpop.f32.mrf.mxu1  ;;  %v1200_v2 = vpop.f32.mrf.mxu0  ;;  %1889 = vmatmul.mubr.f32.gmra.mxu0 %v549_v10  ;;  %v568_v10 = vld [vmem:[%s2791_s10 + $0xc38] sm:$0xff] }
 0x205   : > { %3935 = vst [vmem:[#allocation15_spill] sm:$0xff] %v3705_v49  ;;  %v1201_v29 = vadd.f32 %v3532_v8, %v1200_v2  ;;  %1893 = vmatprep.mubr.f32.mxu0 %v558_v16  ;;  %v565_v16 = vld [vmem:[%s2791_s10 + $0xc20] sm:$0xff]  ;;  %v574_v49 = vld [vmem:[%s2791_s10 + $0xc68] sm:$0xff] }
 0x206   : > { %v1585_v14 = vpop.f32.mrf.mxu1  ;;  %2274 = vmatmul.mubr.f32.gmra.mxu1 %v551_v6  ;;  %v1202_v33 = vpop.f32.mrf.mxu0 }
 0x207   : > { %v3712_v39 = vadd.f32 %v1585_v14, %v1201_v29  ;;  %2278 = vmatprep.mubr.f32.mxu1 %v560_v38  ;;  %v567_v38 = vld [vmem:[%s2791_s10 + $0xc30] sm:$0xff] }
 0x208   : > { %v1587_v44 = vpop.f32.mrf.mxu1  ;;  %v1205_v0 = vpop.f32.mrf.mxu0  ;;  %1894 = vmatmul.mubr.f32.gmra.mxu0 %v557_v42 }
 0x209   : > { %v1206_v2 = vadd.f32 %v3532_v8, %v1205_v0  ;;  %1898 = vmatprep.mubr.f32.mxu0 %v566_v56  ;;  %v576_v44 = vld [vmem:[%s2791_s10 + $0xc78] sm:$0xff]  ;;  %v573_v56 = vld [vmem:[%s2791_s10 + $0xc60] sm:$0xff] }
 0x20a   : > { %v1590_v6 = vpop.f32.mrf.mxu1  ;;  %2279 = vmatmul.mubr.f32.gmra.mxu1 %v559_v63  ;;  %v1207_v33 = vpop.f32.mrf.mxu0 }
 0x20b   : > { %v3719_v14 = vadd.f32 %v1590_v6, %v1206_v2  ;;  %2283 = vmatprep.mubr.f32.mxu1 %v568_v10  ;;  %v582_v10 = vld [vmem:[%s2791_s10 + $0xca8] sm:$0xff] }
 0x20c   : > { %v1592_v29 = vpop.f32.mrf.mxu1  ;;  %v1660_v42 = vpop.f32.mrf.mxu0  ;;  %1899 = vmatmul.mubr.f32.gmra.mxu0 %v565_v16  ;;  %v575_v16 = vld [vmem:[%s2791_s10 + $0xc70] sm:$0xff] }
 0x20d   : > { %v1661_v8 = vadd.f32 %v1660_v42, %v3273_v17  ;;  %1903 = vmatprep.mubr.f32.mxu0 %v574_v49  ;;  %v584_v49 = vld [vmem:[%s2791_s10 + $0xcb8] sm:$0xff]  ;;  %v581_v29 = vld [vmem:[%s2791_s10 + $0xca0] sm:$0xff] }
 0x20e   : > { %v2045_v63 = vpop.f32.mrf.mxu1  ;;  %2284 = vmatmul.mubr.f32.gmra.mxu1 %v567_v38  ;;  %v1662_v0 = vpop.f32.mrf.mxu0 }
 0x20f   : > { %v2046_v2 = vadd.f32 %v2045_v63, %v1661_v8  ;;  %2288 = vmatprep.mubr.f32.mxu1 %v576_v44  ;;  %v590_v8 = vld [vmem:[%s2791_s10 + $0xce8] sm:$0xff]  ;;  %v583_v63 = vld [vmem:[%s2791_s10 + $0xcb0] sm:$0xff] }
 0x210   : > { %v2047_v6 = vpop.f32.mrf.mxu1  ;;  %v1665_v17 = vpop.f32.mrf.mxu0  ;;  %1904 = vmatmul.mubr.f32.gmra.mxu0 %v573_v56 }
 0x211   : > { %2364 = vst [vmem:[%s3729_s9] sm:$0xff] %v2046_v2  ;;  %v1666_v33 = vadd.f32 %v1665_v17, %v3280_v27  ;;  %1908 = vmatprep.mubr.f32.mxu0 %v582_v10  ;;  %v592_v6 = vld [vmem:[%s2791_s10 + $0xcf8] sm:$0xff]  ;;  %v589_v10 = vld [vmem:[%s2791_s10 + $0xce0] sm:$0xff]  ;;  %v598_v17 = vld [vmem:[%s2791_s10 + $0xd28] sm:$0xff] }
 0x212   : > { %v2050_v38 = vpop.f32.mrf.mxu1  ;;  %2289 = vmatmul.mubr.f32.gmra.mxu1 %v575_v16  ;;  %v1667_v42 = vpop.f32.mrf.mxu0 }
 0x213   : > { %v2051_v44 = vadd.f32 %v2050_v38, %v1666_v33  ;;  %2293 = vmatprep.mubr.f32.mxu1 %v584_v49  ;;  %v591_v33 = vld [vmem:[%s2791_s10 + $0xcf0] sm:$0xff]  ;;  %v600_v42 = vld [vmem:[%s2791_s10 + $0xd38] sm:$0xff] }
 0x214   : > { %v2052_v0 = vpop.f32.mrf.mxu1  ;;  %v1670_v56 = vpop.f32.mrf.mxu0  ;;  %1909 = vmatmul.mubr.f32.gmra.mxu0 %v581_v29 }
 0x215   : > { %2365 = vst [vmem:[%s3729_s9 + $0x8] sm:$0xff] %v2051_v44  ;;  %v1671_v27 = vadd.f32 %v1670_v56, %v3287_v37  ;;  %1913 = vmatprep.mubr.f32.mxu0 %v590_v8  ;;  %v597_v8 = vld [vmem:[%s2791_s10 + $0xd20] sm:$0xff]  ;;  %v606_v0 = vld [vmem:[%s2791_s10 + $0xd68] sm:$0xff] }
 0x216   : > { %v2055_v2 = vpop.f32.mrf.mxu1  ;;  %2294 = vmatmul.mubr.f32.gmra.mxu1 %v583_v63  ;;  %v1672_v16 = vpop.f32.mrf.mxu0 }
 0x217   : > { %v2056_v49 = vadd.f32 %v2055_v2, %v1671_v27  ;;  %2298 = vmatprep.mubr.f32.mxu1 %v592_v6  ;;  %v599_v6 = vld [vmem:[%s2791_s10 + $0xd30] sm:$0xff]  ;;  %v608_v2 = vld [vmem:[%s2791_s10 + $0xd78] sm:$0xff]  ;;  %v605_v16 = vld [vmem:[%s2791_s10 + $0xd60] sm:$0xff] }
 0x218   : > { %v2057_v38 = vpop.f32.mrf.mxu1  ;;  %v1675_v29 = vpop.f32.mrf.mxu0  ;;  %1914 = vmatmul.mubr.f32.gmra.mxu0 %v589_v10 }
 0x219   : > { %2366 = vst [vmem:[%s3729_s9 + $0x10] sm:$0xff] %v2056_v49  ;;  %v1676_v37 = vadd.f32 %v1675_v29, %v3294_v47  ;;  %1918 = vmatprep.mubr.f32.mxu0 %v598_v17  ;;  %v607_v29 = vld [vmem:[%s2791_s10 + $0xd70] sm:$0xff] }
 0x21a   : > { %v2060_v44 = vpop.f32.mrf.mxu1  ;;  %2299 = vmatmul.mubr.f32.gmra.mxu1 %v591_v33  ;;  %v1677_v63 = vpop.f32.mrf.mxu0  ;;  %v614_v33 = vld [vmem:[%s2791_s10 + $0xda8] sm:$0xff] }
 0x21b   : > { %v2061_v56 = vadd.f32 %v2060_v44, %v1676_v37  ;;  %2303 = vmatprep.mubr.f32.mxu1 %v600_v42  ;;  %v613_v44 = vld [vmem:[%s2791_s10 + $0xda0] sm:$0xff] }
 0x21c   : > { %v2062_v27 = vpop.f32.mrf.mxu1  ;;  %v1680_v10 = vpop.f32.mrf.mxu0  ;;  %1919 = vmatmul.mubr.f32.gmra.mxu0 %v597_v8  ;;  %v616_v8 = vld [vmem:[%s2791_s10 + $0xdb8] sm:$0xff] }
 0x21d   : > { %2367 = vst [vmem:[%s3729_s9 + $0x18] sm:$0xff] %v2061_v56  ;;  %v1681_v47 = vadd.f32 %v1680_v10, %v3301_v57  ;;  %1923 = vmatprep.mubr.f32.mxu0 %v606_v0  ;;  %v622_v56 = vld [vmem:[%s2791_s10 + $0xde8] sm:$0xff]  ;;  %v615_v27 = vld [vmem:[%s2791_s10 + $0xdb0] sm:$0xff] }
 0x21e   : > { %v2065_v17 = vpop.f32.mrf.mxu1  ;;  %2304 = vmatmul.mubr.f32.gmra.mxu1 %v599_v6  ;;  %v1682_v49 = vpop.f32.mrf.mxu0 }
 0x21f   : > { %v2066_v38 = vadd.f32 %v2065_v17, %v1681_v47  ;;  %2308 = vmatprep.mubr.f32.mxu1 %v608_v2  ;;  %v624_v47 = vld [vmem:[%s2791_s10 + $0xdf8] sm:$0xff] }
 0x220   : > { %v2067_v42 = vpop.f32.mrf.mxu1  ;;  %v1685_v37 = vpop.f32.mrf.mxu0  ;;  %1924 = vmatmul.mubr.f32.gmra.mxu0 %v605_v16  ;;  %v621_v16 = vld [vmem:[%s2791_s10 + $0xde0] sm:$0xff] }
 0x221   : > { %2368 = vst [vmem:[%s3729_s9 + $0x20] sm:$0xff] %v2066_v38  ;;  %v1686_v57 = vadd.f32 %v1685_v37, %v3308_v4  ;;  %1928 = vmatprep.mubr.f32.mxu0 %v614_v33  ;;  %v630_v33 = vld [vmem:[%s2791_s10 + $0xe28] sm:$0xff] }
 0x222   : > { %v2070_v63 = vpop.f32.mrf.mxu1  ;;  %2309 = vmatmul.mubr.f32.gmra.mxu1 %v607_v29  ;;  %v1687_v0 = vpop.f32.mrf.mxu0  ;;  %v623_v29 = vld [vmem:[%s2791_s10 + $0xdf0] sm:$0xff] }
 0x223   : > { %v2071_v6 = vadd.f32 %v2070_v63, %v1686_v57  ;;  %2313 = vmatprep.mubr.f32.mxu1 %v616_v8  ;;  %v632_v8 = vld [vmem:[%s2791_s10 + $0xe38] sm:$0xff]  ;;  %v629_v57 = vld [vmem:[%s2791_s10 + $0xe20] sm:$0xff]  ;;  %v638_v0 = vld [vmem:[%s2791_s10 + $0xe68] sm:$0xff] }
 0x224   : > { %v2072_v10 = vpop.f32.mrf.mxu1  ;;  %v1690_v2 = vpop.f32.mrf.mxu0  ;;  %1929 = vmatmul.mubr.f32.gmra.mxu0 %v613_v44 }
 0x225   : > { %2369 = vst [vmem:[%s3729_s9 + $0x28] sm:$0xff] %v2071_v6  ;;  %v1691_v4 = vadd.f32 %v1690_v2, %v3315_v15  ;;  %1933 = vmatprep.mubr.f32.mxu0 %v622_v56  ;;  %v631_v6 = vld [vmem:[%s2791_s10 + $0xe30] sm:$0xff]  ;;  %v640_v2 = vld [vmem:[%s2791_s10 + $0xe78] sm:$0xff] }
 0x226   : > { %v2075_v17 = vpop.f32.mrf.mxu1  ;;  %2314 = vmatmul.mubr.f32.gmra.mxu1 %v615_v27  ;;  %v1692_v49 = vpop.f32.mrf.mxu0 }
 0x227   : > { %v2076_v38 = vadd.f32 %v2075_v17, %v1691_v4  ;;  %2318 = vmatprep.mubr.f32.mxu1 %v624_v47  ;;  %v637_v47 = vld [vmem:[%s2791_s10 + $0xe60] sm:$0xff]  ;;  %v646_v17 = vld [vmem:[%s2791_s10 + $0xea8] sm:$0xff] }
 0x228   : > { %v2077_v42 = vpop.f32.mrf.mxu1  ;;  %v1695_v37 = vpop.f32.mrf.mxu0  ;;  %1934 = vmatmul.mubr.f32.gmra.mxu0 %v621_v16 }
 0x229   : > { %2370 = vst [vmem:[%s3729_s9 + $0x30] sm:$0xff] %v2076_v38  ;;  %v1696_v15 = vadd.f32 %v1695_v37, %v3322_v25  ;;  %1938 = vmatprep.mubr.f32.mxu0 %v630_v33  ;;  %v639_v33 = vld [vmem:[%s2791_s10 + $0xe70] sm:$0xff]  ;;  %v648_v42 = vld [vmem:[%s2791_s10 + $0xeb8] sm:$0xff]  ;;  %v645_v37 = vld [vmem:[%s2791_s10 + $0xea0] sm:$0xff] }
 0x22a   : > { %v2080_v44 = vpop.f32.mrf.mxu1  ;;  %2319 = vmatmul.mubr.f32.gmra.mxu1 %v623_v29  ;;  %v1697_v63 = vpop.f32.mrf.mxu0 }
 0x22b   : > { %v2081_v56 = vadd.f32 %v2080_v44, %v1696_v15  ;;  %2323 = vmatprep.mubr.f32.mxu1 %v632_v8  ;;  %v647_v63 = vld [vmem:[%s2791_s10 + $0xeb0] sm:$0xff] }
 0x22c   : > { %v2082_v27 = vpop.f32.mrf.mxu1  ;;  %v1700_v10 = vpop.f32.mrf.mxu0  ;;  %1939 = vmatmul.mubr.f32.gmra.mxu0 %v629_v57  ;;  %v654_v57 = vld [vmem:[%s2791_s10 + $0xee8] sm:$0xff] }
 0x22d   : > { %2371 = vst [vmem:[%s3729_s9 + $0x38] sm:$0xff] %v2081_v56  ;;  %v1701_v25 = vadd.f32 %v1700_v10, %v3329_v36  ;;  %1943 = vmatprep.mubr.f32.mxu0 %v638_v0  ;;  %v653_v27 = vld [vmem:[%s2791_s10 + $0xee0] sm:$0xff] }
 0x22e   : > { %v2085_v4 = vpop.f32.mrf.mxu1  ;;  %2324 = vmatmul.mubr.f32.gmra.mxu1 %v631_v6  ;;  %v1702_v16 = vpop.f32.mrf.mxu0  ;;  %v656_v6 = vld [vmem:[%s2791_s10 + $0xef8] sm:$0xff] }
 0x22f   : > { %v2086_v49 = vadd.f32 %v2085_v4, %v1701_v25  ;;  %2328 = vmatprep.mubr.f32.mxu1 %v640_v2  ;;  %v662_v25 = vld [vmem:[%s2791_s10 + $0xf28] sm:$0xff]  ;;  %v655_v4 = vld [vmem:[%s2791_s10 + $0xef0] sm:$0xff] }
 0x230   : > { %v2087_v38 = vpop.f32.mrf.mxu1  ;;  %v1705_v29 = vpop.f32.mrf.mxu0  ;;  %1944 = vmatmul.mubr.f32.gmra.mxu0 %v637_v47 }
 0x231   : > { %2372 = vst [vmem:[%s3729_s9 + $0x40] sm:$0xff] %v2086_v49  ;;  %v1706_v36 = vadd.f32 %v1705_v29, %v3336_v48  ;;  %1948 = vmatprep.mubr.f32.mxu0 %v646_v17  ;;  %v664_v49 = vld [vmem:[%s2791_s10 + $0xf38] sm:$0xff] }
 0x232   : > { %v2090_v8 = vpop.f32.mrf.mxu1  ;;  %2329 = vmatmul.mubr.f32.gmra.mxu1 %v639_v33  ;;  %v1707_v15 = vpop.f32.mrf.mxu0  ;;  %v661_v33 = vld [vmem:[%s2791_s10 + $0xf20] sm:$0xff] }
 0x233   : > { %v2091_v44 = vadd.f32 %v2090_v8, %v1706_v36  ;;  %2333 = vmatprep.mubr.f32.mxu1 %v648_v42  ;;  %v670_v42 = vld [vmem:[%s2791_s10 + $0xf68] sm:$0xff] }
 0x234   : > { %v2092_v0 = vpop.f32.mrf.mxu1  ;;  %v1710_v56 = vpop.f32.mrf.mxu0  ;;  %1949 = vmatmul.mubr.f32.gmra.mxu0 %v645_v37  ;;  %v663_v37 = vld [vmem:[%s2791_s10 + $0xf30] sm:$0xff] }
 0x235   : > { %2373 = vst [vmem:[%s3729_s9 + $0x48] sm:$0xff] %v2091_v44  ;;  %v1711_v48 = vadd.f32 %v1710_v56, %v3343_v59  ;;  %1953 = vmatprep.mubr.f32.mxu0 %v654_v57  ;;  %v672_v57 = vld [vmem:[%s2791_s10 + $0xf78] sm:$0xff]  ;;  %v669_v44 = vld [vmem:[%s2791_s10 + $0xf60] sm:$0xff]  ;;  %v678_v56 = vld [vmem:[%s2791_s10 + $0xfa8] sm:$0xff] }
 0x236   : > { %v2095_v10 = vpop.f32.mrf.mxu1  ;;  %2334 = vmatmul.mubr.f32.gmra.mxu1 %v647_v63  ;;  %v1712_v2 = vpop.f32.mrf.mxu0 }
 0x237   : > { %v2096_v47 = vadd.f32 %v2095_v10, %v1711_v48  ;;  %2338 = vmatprep.mubr.f32.mxu1 %v656_v6  ;;  %v671_v48 = vld [vmem:[%s2791_s10 + $0xf70] sm:$0xff]  ;;  %v680_v2 = vld [vmem:[%s2791_s10 + $0xfb8] sm:$0xff] }
 0x238   : > { %v2097_v16 = vpop.f32.mrf.mxu1  ;;  %v1715_v17 = vpop.f32.mrf.mxu0  ;;  %1954 = vmatmul.mubr.f32.gmra.mxu0 %v653_v27 }
 0x239   : > { %2374 = vst [vmem:[%s3729_s9 + $0x50] sm:$0xff] %v2096_v47  ;;  %v1716_v59 = vadd.f32 %v1715_v17, %v3350_v7  ;;  %1958 = vmatprep.mubr.f32.mxu0 %v662_v25  ;;  %v677_v25 = vld [vmem:[%s2791_s10 + $0xfa0] sm:$0xff]  ;;  %v686_v16 = vld [vmem:[%s2791_s10 + $0xfe8] sm:$0xff] }
 0x23a   : > { %v2100_v38 = vpop.f32.mrf.mxu1  ;;  %2339 = vmatmul.mubr.f32.gmra.mxu1 %v655_v4  ;;  %v1717_v29 = vpop.f32.mrf.mxu0 }
 0x23b   : > { %v2101_v36 = vadd.f32 %v2100_v38, %v1716_v59  ;;  %2343 = vmatprep.mubr.f32.mxu1 %v664_v49  ;;  %v679_v49 = vld [vmem:[%s2791_s10 + $0xfb0] sm:$0xff]  ;;  %v688_v38 = vld [vmem:[%s2791_s10 + $0xff8] sm:$0xff] }
 0x23c   : > { %v2102_v8 = vpop.f32.mrf.mxu1  ;;  %v1720_v15 = vpop.f32.mrf.mxu0  ;;  %1959 = vmatmul.mubr.f32.gmra.mxu0 %v661_v33 }
 0x23d   : > { %2375 = vst [vmem:[%s3729_s9 + $0x58] sm:$0xff] %v2101_v36  ;;  %v1721_v7 = vadd.f32 %v1720_v15, %v3357_v19  ;;  %1963 = vmatprep.mubr.f32.mxu0 %v670_v42  ;;  %v687_v8 = vld [vmem:[%s2791_s10 + $0xff0] sm:$0xff] }
 0x23e   : > { %v2105_v63 = vpop.f32.mrf.mxu1  ;;  %2344 = vmatmul.mubr.f32.gmra.mxu1 %v663_v37  ;;  %v1722_v0 = vpop.f32.mrf.mxu0 }
 0x23f   : > { %v2106_v6 = vadd.f32 %v2105_v63, %v1721_v7  ;;  %2348 = vmatprep.mubr.f32.mxu1 %v672_v57 }
 0x240   : > { %v2107_v27 = vpop.f32.mrf.mxu1  ;;  %v1725_v10 = vpop.f32.mrf.mxu0  ;;  %1964 = vmatmul.mubr.f32.gmra.mxu0 %v669_v44 }
 0x241   : > { %2376 = vst [vmem:[%s3729_s9 + $0x60] sm:$0xff] %v2106_v6  ;;  %v1726_v19 = vadd.f32 %v1725_v10, %v3364_v31  ;;  %1968 = vmatprep.mubr.f32.mxu0 %v678_v56  ;;  %v685_v31 = vld [vmem:[%s2791_s10 + $0xfe0] sm:$0xff] }
 0x242   : > { %v2110_v47 = vpop.f32.mrf.mxu1  ;;  %2349 = vmatmul.mubr.f32.gmra.mxu1 %v671_v48  ;;  %v1727_v4 = vpop.f32.mrf.mxu0 }
 0x243   : > { %v2111_v17 = vadd.f32 %v2110_v47, %v1726_v19  ;;  %2353 = vmatprep.mubr.f32.mxu1 %v680_v2 }
 0x244   : > { %v2112_v59 = vpop.f32.mrf.mxu1  ;;  %v1730_v33 = vpop.f32.mrf.mxu0  ;;  %1969 = vmatmul.mubr.f32.gmra.mxu0 %v677_v25 }
 0x245   : > { %2377 = vst [vmem:[%s3729_s9 + $0x68] sm:$0xff] %v2111_v17  ;;  %v1731_v29 = vadd.f32 %v1730_v33, %v3371_v43  ;;  %1973 = vmatprep.mubr.f32.mxu0 %v686_v16 }
 0x246   : > { %v2115_v42 = vpop.f32.mrf.mxu1  ;;  %2354 = vmatmul.mubr.f32.gmra.mxu1 %v679_v49  ;;  %v1732_v36 = vpop.f32.mrf.mxu0 }
 0x247   : > { %v2116_v37 = vadd.f32 %v2115_v42, %v1731_v29  ;;  %2358 = vmatprep.mubr.f32.mxu1 %v688_v38 }
 0x248   : > { %v2117_v15 = vpop.f32.mrf.mxu1  ;;  %v1735_v57 = vpop.f32.mrf.mxu0  ;;  %1974 = vmatmul.mubr.f32.gmra.mxu0 %v685_v31 }
 0x249   : > { %2378 = vst [vmem:[%s3729_s9 + $0x70] sm:$0xff] %v2116_v37  ;;  %v1736_v7 = vadd.f32 %v1735_v57, %v3378_v55 }
 0x24a   : > { %v2120_v44 = vpop.f32.mrf.mxu1  ;;  %2359 = vmatmul.mubr.f32.gmra.mxu1 %v687_v8  ;;  %v1737_v63 = vpop.f32.mrf.mxu0 }
 0x24b   : > { %v2121_v43 = vadd.f32 %v2120_v44, %v1736_v7 }
 0x24c   : > { %v2122_v0 = vpop.f32.mrf.mxu1  ;;  %v1740_v56 = vpop.f32.mrf.mxu0 }
 0x24d   : > { %2379 = vst [vmem:[%s3729_s9 + $0x78] sm:$0xff] %v2121_v43  ;;  %v1741_v6 = vadd.f32 %v1740_v56, %v3385_v5 }
 0x24e   : > { %v2125_v48 = vpop.f32.mrf.mxu1  ;;  %v1742_v27 = vpop.f32.mrf.mxu0 }
 0x24f   : > { %v2126_v10 = vadd.f32 %v2125_v48, %v1741_v6 }
 0x250   : > { %v2127_v2 = vpop.f32.mrf.mxu1  ;;  %v1745_v19 = vpop.f32.mrf.mxu0 }
 0x251   : > { %2380 = vst [vmem:[%s3729_s9 + $0x80] sm:$0xff] %v2126_v10  ;;  %v1746_v25 = vadd.f32 %v1745_v19, %v3392_v18 }
 0x252   : > { %v2130_v55 = vpop.f32.mrf.mxu1  ;;  %v1747_v47 = vpop.f32.mrf.mxu0 }
 0x253   : > { %v2131_v4 = vadd.f32 %v2130_v55, %v1746_v25 }
 0x254   : > { %v2132_v16 = vpop.f32.mrf.mxu1  ;;  %v1750_v17 = vpop.f32.mrf.mxu0 }
 0x255   : > { %2381 = vst [vmem:[%s3729_s9 + $0x88] sm:$0xff] %v2131_v4  ;;  %v1751_v49 = vadd.f32 %v1750_v17, %v3399_v32 }
 0x256   : > { %v2135_v59 = vpop.f32.mrf.mxu1  ;;  %v1752_v5 = vpop.f32.mrf.mxu0 }
 0x257   : > { %v2136_v33 = vadd.f32 %v2135_v59, %v1751_v49 }
 0x258   : > { %v2137_v38 = vpop.f32.mrf.mxu1  ;;  %v1755_v29 = vpop.f32.mrf.mxu0 }
 0x259   : > { %2382 = vst [vmem:[%s3729_s9 + $0x90] sm:$0xff] %v2136_v33  ;;  %v1756_v31 = vadd.f32 %v1755_v29, %v3406_v45 }
 0x25a   : > { %v2140_v42 = vpop.f32.mrf.mxu1  ;;  %v1757_v18 = vpop.f32.mrf.mxu0 }
 0x25b   : > { %v2141_v36 = vadd.f32 %v2140_v42, %v1756_v31 }
 0x25c   : > { %v2142_v37 = vpop.f32.mrf.mxu1  ;;  %v1760_v8 = vpop.f32.mrf.mxu0 }
 0x25d   : > { %2383 = vst [vmem:[%s3729_s9 + $0x98] sm:$0xff] %v2141_v36  ;;  %v1761_v15 = vadd.f32 %v1760_v8, %v3413_v60 }
 0x25e   : > { %v2145_v57 = vpop.f32.mrf.mxu1  ;;  %v1762_v32 = vpop.f32.mrf.mxu0 }
 0x25f   : > { %v2146_v7 = vadd.f32 %v2145_v57, %v1761_v15 }
 0x260   : > { %v2147_v44 = vpop.f32.mrf.mxu1  ;;  %v1765_v63 = vpop.f32.mrf.mxu0 }
 0x261   : > { %2384 = vst [vmem:[%s3729_s9 + $0xa0] sm:$0xff] %v2146_v7  ;;  %v1766_v43 = vadd.f32 %v1765_v63, %v3420_v11 }
 0x262   : > { %v2150_v0 = vpop.f32.mrf.mxu1  ;;  %v1767_v45 = vpop.f32.mrf.mxu0 }
 0x263   : > { %v2151_v56 = vadd.f32 %v2150_v0, %v1766_v43 }
 0x264   : > { %v2152_v6 = vpop.f32.mrf.mxu1  ;;  %v1770_v48 = vpop.f32.mrf.mxu0 }
 0x265   : > { %2385 = vst [vmem:[%s3729_s9 + $0xa8] sm:$0xff] %v2151_v56  ;;  %v1771_v27 = vadd.f32 %v1770_v48, %v3427_v24 }
 0x266   : > { %v2155_v10 = vpop.f32.mrf.mxu1  ;;  %v1772_v60 = vpop.f32.mrf.mxu0 }
 0x267   : > { %v2156_v2 = vadd.f32 %v2155_v10, %v1771_v27 }
 0x268   : > { %v2157_v19 = vpop.f32.mrf.mxu1  ;;  %v1775_v25 = vpop.f32.mrf.mxu0 }
 0x269   : > { %2386 = vst [vmem:[%s3729_s9 + $0xb0] sm:$0xff] %v2156_v2  ;;  %v1776_v55 = vadd.f32 %v1775_v25, %v3434_v40 }
 0x26a   : > { %v2160_v47 = vpop.f32.mrf.mxu1  ;;  %v1777_v11 = vpop.f32.mrf.mxu0 }
 0x26b   : > { %v2161_v4 = vadd.f32 %v2160_v47, %v1776_v55 }
 0x26c   : > { %v2162_v16 = vpop.f32.mrf.mxu1  ;;  %v1780_v17 = vpop.f32.mrf.mxu0 }
 0x26d   : > { %2387 = vst [vmem:[%s3729_s9 + $0xb8] sm:$0xff] %v2161_v4  ;;  %v1781_v49 = vadd.f32 %v1780_v17, %v3441_v54 }
 0x26e   : > { %v2165_v59 = vpop.f32.mrf.mxu1  ;;  %v1782_v24 = vpop.f32.mrf.mxu0 }
 0x26f   : > { %v2166_v5 = vadd.f32 %v2165_v59, %v1781_v49 }
 0x270   : > { %v2167_v33 = vpop.f32.mrf.mxu1  ;;  %v1785_v38 = vpop.f32.mrf.mxu0 }
 0x271   : > { %2388 = vst [vmem:[%s3729_s9 + $0xc0] sm:$0xff] %v2166_v5  ;;  %v1786_v29 = vadd.f32 %v1785_v38, %v3448_v9 }
 0x272   : > { %v2170_v31 = vpop.f32.mrf.mxu1  ;;  %v1787_v40 = vpop.f32.mrf.mxu0 }
 0x273   : > { %v2171_v42 = vadd.f32 %v2170_v31, %v1786_v29 }
 0x274   : > { %v2172_v18 = vpop.f32.mrf.mxu1  ;;  %v1790_v36 = vpop.f32.mrf.mxu0 }
 0x275   : > { %2389 = vst [vmem:[%s3729_s9 + $0xc8] sm:$0xff] %v2171_v42  ;;  %v1791_v37 = vadd.f32 %v1790_v36, %v3455_v23 }
 0x276   : > { %v2175_v8 = vpop.f32.mrf.mxu1  ;;  %v1792_v54 = vpop.f32.mrf.mxu0 }
 0x277   : > { %v2176_v15 = vadd.f32 %v2175_v8, %v1791_v37 }
 0x278   : > { %v2177_v57 = vpop.f32.mrf.mxu1  ;;  %v1795_v32 = vpop.f32.mrf.mxu0 }
 0x279   : > { %2390 = vst [vmem:[%s3729_s9 + $0xd0] sm:$0xff] %v2176_v15  ;;  %v1796_v7 = vadd.f32 %v1795_v32, %v3462_v41 }
 0x27a   : > { %v2180_v44 = vpop.f32.mrf.mxu1  ;;  %v1797_v9 = vpop.f32.mrf.mxu0 }
 0x27b   : > { %v2181_v63 = vadd.f32 %v2180_v44, %v1796_v7 }
 0x27c   : > { %v2182_v43 = vpop.f32.mrf.mxu1  ;;  %v1800_v0 = vpop.f32.mrf.mxu0 }
 0x27d   : > { %2391 = vst [vmem:[%s3729_s9 + $0xd8] sm:$0xff] %v2181_v63  ;;  %v1801_v45 = vadd.f32 %v1800_v0, %v3469_v58 }
 0x27e   : > { %v2185_v56 = vpop.f32.mrf.mxu1  ;;  %v1802_v23 = vpop.f32.mrf.mxu0 }
 0x27f   : > { %v2186_v6 = vadd.f32 %v2185_v56, %v1801_v45 }
 0x280   : > { %v2187_v48 = vpop.f32.mrf.mxu1  ;;  %v1805_v27 = vpop.f32.mrf.mxu0 }
 0x281   : > { %2392 = vst [vmem:[%s3729_s9 + $0xe0] sm:$0xff] %v2186_v6  ;;  %v1806_v10 = vadd.f32 %v1805_v27, %v3476_v13 }
 0x282   : > { %v2190_v60 = vpop.f32.mrf.mxu1  ;;  %v1807_v41 = vpop.f32.mrf.mxu0 }
 0x283   : > { %v2191_v2 = vadd.f32 %v2190_v60, %v1806_v10 }
 0x284   : > { %v2192_v19 = vpop.f32.mrf.mxu1  ;;  %v1810_v25 = vpop.f32.mrf.mxu0 }
 0x285   : > { %2393 = vst [vmem:[%s3729_s9 + $0xe8] sm:$0xff] %v2191_v2  ;;  %v1811_v55 = vadd.f32 %v1810_v25, %v3483_v30 }
 0x286   : > { %v2195_v47 = vpop.f32.mrf.mxu1  ;;  %v1812_v58 = vpop.f32.mrf.mxu0 }
 0x287   : > { %v2196_v11 = vadd.f32 %v2195_v47, %v1811_v55 }
 0x288   : > { %v2197_v4 = vpop.f32.mrf.mxu1  ;;  %v1815_v16 = vpop.f32.mrf.mxu0 }
 0x289   : > { %2394 = vst [vmem:[%s3729_s9 + $0xf0] sm:$0xff] %v2196_v11  ;;  %v1816_v17 = vadd.f32 %v1815_v16, %v3490_v50 }
 0x28a   : > { %v2200_v49 = vpop.f32.mrf.mxu1  ;;  %v1817_v13 = vpop.f32.mrf.mxu0 }
 0x28b   : > { %v2201_v59 = vadd.f32 %v2200_v49, %v1816_v17 }
 0x28c   : > { %v2202_v24 = vpop.f32.mrf.mxu1  ;;  %v1820_v5 = vpop.f32.mrf.mxu0 }
 0x28d   : > { %2395 = vst [vmem:[%s3729_s9 + $0xf8] sm:$0xff] %v2201_v59  ;;  %v1821_v33 = vadd.f32 %v1820_v5, %v3497_v3 }
 0x28e   : > { %v2205_v38 = vpop.f32.mrf.mxu1  ;;  %v1822_v30 = vpop.f32.mrf.mxu0 }
 0x28f   : > { %v2206_v29 = vadd.f32 %v2205_v38, %v1821_v33 }
 0x290   : > { %v2207_v31 = vpop.f32.mrf.mxu1  ;;  %v1825_v40 = vpop.f32.mrf.mxu0 }
 0x291   : > { %2396 = vst [vmem:[%s3729_s9 + $0x100] sm:$0xff] %v2206_v29  ;;  %v1826_v42 = vadd.f32 %v1825_v40, %v3504_v26 }
 0x292   : > { %v2210_v18 = vpop.f32.mrf.mxu1  ;;  %v1827_v50 = vpop.f32.mrf.mxu0 }
 0x293   : > { %v2211_v36 = vadd.f32 %v2210_v18, %v1826_v42 }
 0x294   : > { %v2212_v37 = vpop.f32.mrf.mxu1  ;;  %v1830_v8 = vpop.f32.mrf.mxu0 }
 0x295   : > { %2397 = vst [vmem:[%s3729_s9 + $0x108] sm:$0xff] %v2211_v36  ;;  %v1831_v54 = vadd.f32 %v1830_v8, %v3511_v46 }
 0x296   : > { %v2215_v15 = vpop.f32.mrf.mxu1  ;;  %v1832_v3 = vpop.f32.mrf.mxu0 }
 0x297   : > { %v2216_v57 = vadd.f32 %v2215_v15, %v1831_v54 }
 0x298   : > { %v2217_v32 = vpop.f32.mrf.mxu1  ;;  %v1835_v7 = vpop.f32.mrf.mxu0 }
 0x299   : > { %2398 = vst [vmem:[%s3729_s9 + $0x110] sm:$0xff] %v2216_v57  ;;  %v1836_v44 = vadd.f32 %v1835_v7, %v3518_v1 }
 0x29a   : > { %v2220_v9 = vpop.f32.mrf.mxu1  ;;  %v1837_v26 = vpop.f32.mrf.mxu0 }
 0x29b   : > { %v2221_v63 = vadd.f32 %v2220_v9, %v1836_v44 }
 0x29c   : > { %v2222_v43 = vpop.f32.mrf.mxu1  ;;  %v1840_v0 = vpop.f32.mrf.mxu0 }
 0x29d   : > { %2399 = vst [vmem:[%s3729_s9 + $0x118] sm:$0xff] %v2221_v63  ;;  %v1841_v45 = vadd.f32 %v1840_v0, %v3525_v28 }
 0x29e   : > { %v2225_v56 = vpop.f32.mrf.mxu1  ;;  %v1842_v46 = vpop.f32.mrf.mxu0 }
 0x29f   : > { %v2226_v23 = vadd.f32 %v2225_v56, %v1841_v45 }
 0x2a0   : > { %v2227_v6 = vpop.f32.mrf.mxu1  ;;  %v1845_v48 = vpop.f32.mrf.mxu0 }
 0x2a1   : > { %2400 = vst [vmem:[%s3729_s9 + $0x120] sm:$0xff] %v2226_v23  ;;  %v1846_v27 = vadd.f32 %v1845_v48, %v3537_v51 }
 0x2a2   : > { %v2230_v10 = vpop.f32.mrf.mxu1  ;;  %v1847_v1 = vpop.f32.mrf.mxu0 }
 0x2a3   : > { %v2231_v60 = vadd.f32 %v2230_v10, %v1846_v27 }
 0x2a4   : > { %v2232_v41 = vpop.f32.mrf.mxu1  ;;  %v1850_v2 = vpop.f32.mrf.mxu0 }
 0x2a5   : > { %2401 = vst [vmem:[%s3729_s9 + $0x128] sm:$0xff] %v2231_v60  ;;  %v1851_v19 = vadd.f32 %v1850_v2, %v3544_v12 }
 0x2a6   : > { %v2235_v25 = vpop.f32.mrf.mxu1  ;;  %v1852_v28 = vpop.f32.mrf.mxu0 }
 0x2a7   : > { %v2236_v55 = vadd.f32 %v2235_v25, %v1851_v19  ;;  %v3936_v19 = vld [vmem:[#allocation2_spill] sm:$0xff] }
 0x2a8   : > { %v2237_v47 = vpop.f32.mrf.mxu1  ;;  %v1855_v58 = vpop.f32.mrf.mxu0 }
 0x2a9   : > { %2402 = vst [vmem:[%s3729_s9 + $0x130] sm:$0xff] %v2236_v55  ;;  %v1856_v11 = vadd.f32 %v1855_v58, %v3551_v35 }
 0x2aa   : > { %v2240_v4 = vpop.f32.mrf.mxu1  ;;  %v1857_v51 = vpop.f32.mrf.mxu0 }
 0x2ab   : > { %v2241_v16 = vadd.f32 %v2240_v4, %v1856_v11  ;;  %v3937_v11 = vld [vmem:[#allocation3_spill] sm:$0xff] }
 0x2ac   : > { %v2242_v17 = vpop.f32.mrf.mxu1  ;;  %v1860_v49 = vpop.f32.mrf.mxu0 }
 0x2ad   : > { %2403 = vst [vmem:[%s3729_s9 + $0x138] sm:$0xff] %v2241_v16  ;;  %v1861_v13 = vadd.f32 %v1860_v49, %v3558_v62 }
 0x2ae   : > { %v2245_v59 = vpop.f32.mrf.mxu1  ;;  %v1862_v12 = vpop.f32.mrf.mxu0 }
 0x2af   : > { %v2246_v24 = vadd.f32 %v2245_v59, %v1861_v13  ;;  %v3938_v13 = vld [vmem:[#allocation4_spill] sm:$0xff] }
 0x2b0   : > { %v2247_v5 = vpop.f32.mrf.mxu1  ;;  %v1865_v33 = vpop.f32.mrf.mxu0 }
 0x2b1   : > { %2404 = vst [vmem:[%s3729_s9 + $0x140] sm:$0xff] %v2246_v24  ;;  %v1866_v38 = vadd.f32 %v1865_v33, %v3565_v22 }
 0x2b2   : > { %v2250_v30 = vpop.f32.mrf.mxu1  ;;  %v1867_v35 = vpop.f32.mrf.mxu0 }
 0x2b3   : > { %v2251_v29 = vadd.f32 %v2250_v30, %v1866_v38  ;;  %v3939_v30 = vld [vmem:[#allocation5_spill] sm:$0xff] }
 0x2b4   : > { %v2252_v31 = vpop.f32.mrf.mxu1  ;;  %v1870_v40 = vpop.f32.mrf.mxu0 }
 0x2b5   : > { %2405 = vst [vmem:[%s3729_s9 + $0x148] sm:$0xff] %v2251_v29  ;;  %v1871_v42 = vadd.f32 %v1870_v40, %v3572_v53 }
 0x2b6   : > { %v2255_v18 = vpop.f32.mrf.mxu1  ;;  %v1872_v62 = vpop.f32.mrf.mxu0 }
 0x2b7   : > { %v2256_v50 = vadd.f32 %v2255_v18, %v1871_v42  ;;  %v3940_v62 = vld [vmem:[#allocation6_spill] sm:$0xff] }
 0x2b8   : > { %v2257_v36 = vpop.f32.mrf.mxu1  ;;  %v1875_v37 = vpop.f32.mrf.mxu0 }
 0x2b9   : > { %2406 = vst [vmem:[%s3729_s9 + $0x150] sm:$0xff] %v2256_v50  ;;  %v1876_v8 = vadd.f32 %v1875_v37, %v3579_v20 }
 0x2ba   : > { %v2260_v54 = vpop.f32.mrf.mxu1  ;;  %v1877_v22 = vpop.f32.mrf.mxu0 }
 0x2bb   : > { %v2261_v15 = vadd.f32 %v2260_v54, %v1876_v8 }
 0x2bc   : > { %v2262_v3 = vpop.f32.mrf.mxu1  ;;  %v1880_v57 = vpop.f32.mrf.mxu0 }
 0x2bd   : > { %2407 = vst [vmem:[%s3729_s9 + $0x158] sm:$0xff] %v2261_v15  ;;  %v1881_v32 = vadd.f32 %v1880_v57, %v3586_v52  ;;  %v3941_v15 = vld [vmem:[#allocation7_spill] sm:$0xff] }
 0x2be   : > { %v2265_v7 = vpop.f32.mrf.mxu1  ;;  %v1882_v53 = vpop.f32.mrf.mxu0 }
 0x2bf   : > { %v2266_v44 = vadd.f32 %v2265_v7, %v1881_v32 }
 0x2c0   : > { %v2267_v9 = vpop.f32.mrf.mxu1  ;;  %v1885_v26 = vpop.f32.mrf.mxu0 }
 0x2c1   : > { %2408 = vst [vmem:[%s3729_s9 + $0x160] sm:$0xff] %v2266_v44  ;;  %v1886_v63 = vadd.f32 %v1885_v26, %v3593_v21  ;;  %v3942_v9 = vld [vmem:[#allocation8_spill] sm:$0xff] }
 0x2c2   : > { %v2270_v43 = vpop.f32.mrf.mxu1  ;;  %v1887_v20 = vpop.f32.mrf.mxu0 }
 0x2c3   : > { %v2271_v0 = vadd.f32 %v2270_v43, %v1886_v63 }
 0x2c4   : > { %v2272_v45 = vpop.f32.mrf.mxu1  ;;  %v1890_v56 = vpop.f32.mrf.mxu0 }
 0x2c5   : > { %2409 = vst [vmem:[%s3729_s9 + $0x168] sm:$0xff] %v2271_v0  ;;  %v1891_v46 = vadd.f32 %v1890_v56, %v3600_v61  ;;  %v3943_v56 = vld [vmem:[#allocation9_spill] sm:$0xff] }
 0x2c6   : > { %v2275_v23 = vpop.f32.mrf.mxu1  ;;  %v1892_v52 = vpop.f32.mrf.mxu0 }
 0x2c7   : > { %v2276_v6 = vadd.f32 %v2275_v23, %v1891_v46 }
 0x2c8   : > { %v2277_v48 = vpop.f32.mrf.mxu1  ;;  %v1895_v27 = vpop.f32.mrf.mxu0 }
 0x2c9   : > { %2410 = vst [vmem:[%s3729_s9 + $0x170] sm:$0xff] %v2276_v6  ;;  %v1896_v10 = vadd.f32 %v1895_v27, %v3607_v34 }
 0x2ca   : > { %v2280_v1 = vpop.f32.mrf.mxu1  ;;  %v1897_v21 = vpop.f32.mrf.mxu0 }
 0x2cb   : > { %v2281_v60 = vadd.f32 %v2280_v1, %v1896_v10  ;;  %v3944_v10 = vld [vmem:[#allocation10_spill] sm:$0xff] }
 0x2cc   : > { %v2282_v41 = vpop.f32.mrf.mxu1  ;;  %v1900_v2 = vpop.f32.mrf.mxu0 }
 0x2cd   : > { %2411 = vst [vmem:[%s3729_s9 + $0x178] sm:$0xff] %v2281_v60  ;;  %v1901_v25 = vadd.f32 %v1900_v2, %v3936_v19 }
 0x2ce   : > { %v2285_v28 = vpop.f32.mrf.mxu1  ;;  %v1902_v61 = vpop.f32.mrf.mxu0 }
 0x2cf   : > { %v2286_v55 = vadd.f32 %v2285_v28, %v1901_v25  ;;  %v3945_v25 = vld [vmem:[#allocation11_spill] sm:$0xff] }
 0x2d0   : > { %v2287_v47 = vpop.f32.mrf.mxu1  ;;  %v1905_v58 = vpop.f32.mrf.mxu0 }
 0x2d1   : > { %2412 = vst [vmem:[%s3729_s9 + $0x180] sm:$0xff] %v2286_v55  ;;  %v1906_v4 = vadd.f32 %v1905_v58, %v3937_v11 }
 0x2d2   : > { %v2290_v51 = vpop.f32.mrf.mxu1  ;;  %v1907_v34 = vpop.f32.mrf.mxu0 }
 0x2d3   : > { %v2291_v16 = vadd.f32 %v2290_v51, %v1906_v4  ;;  %v3946_v4 = vld [vmem:[#allocation12_spill] sm:$0xff] }
 0x2d4   : > { %v2292_v17 = vpop.f32.mrf.mxu1  ;;  %v1910_v49 = vpop.f32.mrf.mxu0 }
 0x2d5   : > { %2413 = vst [vmem:[%s3729_s9 + $0x188] sm:$0xff] %v2291_v16  ;;  %v1911_v59 = vadd.f32 %v1910_v49, %v3938_v13 }
 0x2d6   : > { %v2295_v12 = vpop.f32.mrf.mxu1  ;;  %v1912_v24 = vpop.f32.mrf.mxu0 }
 0x2d7   : > { %v2296_v5 = vadd.f32 %v2295_v12, %v1911_v59  ;;  %v3947_v59 = vld [vmem:[#allocation13_spill] sm:$0xff] }
 0x2d8   : > { %v2297_v33 = vpop.f32.mrf.mxu1  ;;  %v1915_v38 = vpop.f32.mrf.mxu0 }
 0x2d9   : > { %2414 = vst [vmem:[%s3729_s9 + $0x190] sm:$0xff] %v2296_v5  ;;  %v1916_v35 = vadd.f32 %v1915_v38, %v3939_v30 }
 0x2da   : > { %v2300_v29 = vpop.f32.mrf.mxu1  ;;  %v1917_v31 = vpop.f32.mrf.mxu0 }
 0x2db   : > { %v2301_v40 = vadd.f32 %v2300_v29, %v1916_v35  ;;  %v3948_v35 = vld [vmem:[#allocation14_spill] sm:$0xff] }
 0x2dc   : > { %v2302_v42 = vpop.f32.mrf.mxu1  ;;  %v1920_v18 = vpop.f32.mrf.mxu0 }
 0x2dd   : > { %2415 = vst [vmem:[%s3729_s9 + $0x198] sm:$0xff] %v2301_v40  ;;  %v1921_v50 = vadd.f32 %v1920_v18, %v3940_v62 }
 0x2de   : > { %v2305_v36 = vpop.f32.mrf.mxu1  ;;  %v1922_v37 = vpop.f32.mrf.mxu0 }
 0x2df   : > { %v2306_v8 = vadd.f32 %v2305_v36, %v1921_v50  ;;  %v3949_v50 = vld [vmem:[#allocation15_spill] sm:$0xff] }
 0x2e0   : > { %v2307_v54 = vpop.f32.mrf.mxu1  ;;  %v1925_v22 = vpop.f32.mrf.mxu0 }
 0x2e1   : > { %2416 = vst [vmem:[%s3729_s9 + $0x1a0] sm:$0xff] %v2306_v8  ;;  %v1926_v3 = vadd.f32 %v1925_v22, %v3941_v15 }
 0x2e2   : > { %v2310_v57 = vpop.f32.mrf.mxu1  ;;  %v1927_v32 = vpop.f32.mrf.mxu0 }
 0x2e3   : > { %v2311_v7 = vadd.f32 %v2310_v57, %v1926_v3 }
 0x2e4   : > { %v2312_v53 = vpop.f32.mrf.mxu1  ;;  %v1930_v44 = vpop.f32.mrf.mxu0 }
 0x2e5   : > { %2417 = vst [vmem:[%s3729_s9 + $0x1a8] sm:$0xff] %v2311_v7  ;;  %v1931_v26 = vadd.f32 %v1930_v44, %v3942_v9 }
 0x2e6   : > { %v2315_v63 = vpop.f32.mrf.mxu1  ;;  %v1932_v43 = vpop.f32.mrf.mxu0 }
 0x2e7   : > { %v2316_v20 = vadd.f32 %v2315_v63, %v1931_v26 }
 0x2e8   : > { %v2317_v0 = vpop.f32.mrf.mxu1  ;;  %v1935_v45 = vpop.f32.mrf.mxu0 }
 0x2e9   : > { %2418 = vst [vmem:[%s3729_s9 + $0x1b0] sm:$0xff] %v2316_v20  ;;  %v1936_v46 = vadd.f32 %v1935_v45, %v3943_v56 }
 0x2ea   : > { %v2320_v23 = vpop.f32.mrf.mxu1  ;;  %v1937_v52 = vpop.f32.mrf.mxu0 }
 0x2eb   : > { %v2321_v6 = vadd.f32 %v2320_v23, %v1936_v46 }
 0x2ec   : > { %v2322_v48 = vpop.f32.mrf.mxu1  ;;  %v1940_v27 = vpop.f32.mrf.mxu0 }
 0x2ed   : > { %2419 = vst [vmem:[%s3729_s9 + $0x1b8] sm:$0xff] %v2321_v6  ;;  %v1941_v1 = vadd.f32 %v1940_v27, %v3944_v10 }
 0x2ee   : > { %v2325_v21 = vpop.f32.mrf.mxu1  ;;  %v1942_v60 = vpop.f32.mrf.mxu0 }
 0x2ef   : > { %v2326_v41 = vadd.f32 %v2325_v21, %v1941_v1 }
 0x2f0   : > { %v2327_v2 = vpop.f32.mrf.mxu1  ;;  %v1945_v19 = vpop.f32.mrf.mxu0 }
 0x2f1   : > { %2420 = vst [vmem:[%s3729_s9 + $0x1c0] sm:$0xff] %v2326_v41  ;;  %v1946_v28 = vadd.f32 %v1945_v19, %v3945_v25 }
 0x2f2   : > { %v2330_v61 = vpop.f32.mrf.mxu1  ;;  %v1947_v55 = vpop.f32.mrf.mxu0 }
 0x2f3   : > { %v2331_v47 = vadd.f32 %v2330_v61, %v1946_v28 }
 0x2f4   : > { %v2332_v58 = vpop.f32.mrf.mxu1  ;;  %v1950_v11 = vpop.f32.mrf.mxu0 }
 0x2f5   : > { %2421 = vst [vmem:[%s3729_s9 + $0x1c8] sm:$0xff] %v2331_v47  ;;  %v1951_v51 = vadd.f32 %v1950_v11, %v3946_v4 }
 0x2f6   : > { %v2335_v34 = vpop.f32.mrf.mxu1  ;;  %v1952_v16 = vpop.f32.mrf.mxu0 }
 0x2f7   : > { %v2336_v17 = vadd.f32 %v2335_v34, %v1951_v51 }
 0x2f8   : > { %v2337_v49 = vpop.f32.mrf.mxu1  ;;  %v1955_v13 = vpop.f32.mrf.mxu0 }
 0x2f9   : > { %2422 = vst [vmem:[%s3729_s9 + $0x1d0] sm:$0xff] %v2336_v17  ;;  %v1956_v12 = vadd.f32 %v1955_v13, %v3947_v59 }
 0x2fa   : > { %v2340_v24 = vpop.f32.mrf.mxu1  ;;  %v1957_v5 = vpop.f32.mrf.mxu0 }
 0x2fb   : > { %v2341_v33 = vadd.f32 %v2340_v24, %v1956_v12 }
 0x2fc   : > { %v2342_v38 = vpop.f32.mrf.mxu1  ;;  %v1960_v30 = vpop.f32.mrf.mxu0 }
 0x2fd   : > { %2423 = vst [vmem:[%s3729_s9 + $0x1d8] sm:$0xff] %v2341_v33  ;;  %v1961_v29 = vadd.f32 %v1960_v30, %v3948_v35 }
 0x2fe   : > { %v2345_v31 = vpop.f32.mrf.mxu1  ;;  %v1962_v40 = vpop.f32.mrf.mxu0 }
 0x2ff   : > { %v2346_v42 = vadd.f32 %v2345_v31, %v1961_v29 }
 0x300   : > { %v2347_v18 = vpop.f32.mrf.mxu1  ;;  %v1965_v62 = vpop.f32.mrf.mxu0 }
 0x301   : > { %2424 = vst [vmem:[%s3729_s9 + $0x1e0] sm:$0xff] %v2346_v42  ;;  %v1966_v36 = vadd.f32 %v1965_v62, %v3949_v50 }
 0x302   : > { %v2350_v37 = vpop.f32.mrf.mxu1  ;;  %v1967_v8 = vpop.f32.mrf.mxu0 }
 0x303   : > { %v2351_v54 = vadd.f32 %v2350_v37, %v1966_v36 }
 0x304   : > { %v2352_v22 = vpop.f32.mrf.mxu1  ;;  %v1970_v15 = vpop.f32.mrf.mxu0 }
 0x305   : > { %2425 = vst [vmem:[%s3729_s9 + $0x1e8] sm:$0xff] %v2351_v54  ;;  %v1971_v3 = vadd.f32 %v1970_v15, %v3712_v39 }
 0x306   : > { %v2355_v57 = vpop.f32.mrf.mxu1  ;;  %v1972_v32 = vpop.f32.mrf.mxu0 }
 0x307   : > { %v2356_v7 = vadd.f32 %v2355_v57, %v1971_v3 }
 0x308   : > { %v2357_v53 = vpop.f32.mrf.mxu1  ;;  %v1975_v44 = vpop.f32.mrf.mxu0 }
 0x309   : > { %2426 = vst [vmem:[%s3729_s9 + $0x1f0] sm:$0xff] %v2356_v7  ;;  %v1976_v9 = vadd.f32 %v1975_v44, %v3719_v14 }
 0x30a   : > { %v2360_v26 = vpop.f32.mrf.mxu1  ;;  %v1977_v63 = vpop.f32.mrf.mxu0 }
 0x30b   : > { %v2361_v43 = vadd.f32 %v2360_v26, %v1976_v9 }
 0x30c   : > { %v2362_v20 = vpop.f32.mrf.mxu1 }
 0x30d   : > { %2427 = vst [vmem:[%s3729_s9 + $0x1f8] sm:$0xff] %v2361_v43 }
 0x30e PF: > { %s13_s12 = sadd.s32 1, %s2514_s12  }
 0x30f   : > { %p10_p4 = scmp.ge.s32.totalorder %s13_s12, 4  }
 0x311   :  { %12 = sbr.rel (!%p10_p4) target bundleno = 1 (0x1), region = 62 }

</bundles_post_ra>
